<compile_context>
chip_gen: v7x
topology: tpu7x:2x2x1
jax: 0.10.0
libtpu: 0.0.40
codegen_flags: <defaults>
</compile_context>

<pallas_src>
import functools
import math

import jax
import jax.numpy as jnp
import numpy as np
from jax.experimental import pallas as pl
from jax.experimental.pallas import tpu as pltpu

LOG_STD_MIN = -20.0
LOG_STD_MAX = 2.0
OUT_LANES = 128  # lane-dense fused output width (sample | mean | log_pi | zero padding)

_HIGHEST = jax.lax.Precision.HIGHEST


def _softplus(z):
    # numerically-stable softplus built from jnp ops that lower cleanly on TPU
    return jnp.maximum(z, 0.0) + jnp.log1p(jnp.exp(-jnp.abs(z)))


def _policy_kernel(state_ref, eps_ref, w1_ref, b1_ref, w2_ref, b2_ref,
                   wh_ref, bh_ref, out_ref, *, num_actions):
    A = num_actions
    x = state_ref[...]

    # --- act_net: Linear -> ReLU -> Linear -> ReLU (MXU matmuls + VPU relu) ---
    h = jnp.dot(x, w1_ref[...], precision=_HIGHEST,
                preferred_element_type=jnp.float32) + b1_ref[...]
    h = jnp.maximum(h, 0.0)
    h = jnp.dot(h, w2_ref[...], precision=_HIGHEST,
                preferred_element_type=jnp.float32) + b2_ref[...]
    h = jnp.maximum(h, 0.0)

    # --- fused heads: one (H, 2A) matmul produces [mu | log_std_raw] ---
    heads = jnp.dot(h, wh_ref[...], precision=_HIGHEST,
                    preferred_element_type=jnp.float32) + bh_ref[...]
    mu = heads[:, :A]
    log_std = jnp.tanh(heads[:, A:2 * A])
    log_std = LOG_STD_MIN + 0.5 * (LOG_STD_MAX - LOG_STD_MIN) * (log_std + 1.0)
    std = jnp.exp(log_std)

    # --- SquashedNormal rsample (reparameterized) ---
    eps = eps_ref[...]
    x_pre = mu + std * eps          # pre-tanh sample (what TanhTransform caches)
    sample = jnp.tanh(x_pre)
    mean = jnp.tanh(mu)

    # --- log_prob(sample) = Normal.log_prob(x_pre) - log|det d tanh/dx| ---
    # Reparameterization identity: (x_pre - mu)/std == eps exactly, so no divide
    # and no catastrophic cancellation when std is tiny.
    base_lp = -0.5 * eps * eps - log_std - 0.5 * math.log(2.0 * math.pi)
    log_det = 2.0 * (math.log(2.0) - x_pre - _softplus(-2.0 * x_pre))
    log_pi = jnp.sum(base_lp - log_det, axis=-1, keepdims=True)

    # --- single lane-dense output slab: [sample | mean | log_pi | zeros] ---
    out_ref[...] = jnp.zeros_like(out_ref)           # deterministic padding lanes
    out_ref[:, :A] = sample
    out_ref[:, A:2 * A] = mean
    out_ref[:, 2 * A:2 * A + 1] = log_pi


def _round_up(n, m):
    return ((n + m - 1) // m) * m


def tanh_gaussian_policy(state, params, eps, *, block_batch=128):
    """Fused policy forward. Batch-tiled grid; weights stay resident in VMEM."""
    B, F = state.shape
    A = params["wmu"].shape[1]
    H1 = params["w1"].shape[1]
    H2 = params["w2"].shape[1]

    # Fuse the two heads into one matmul: (H2, 2A) weight, (1, 2A) bias.
    wh = jnp.concatenate([params["wmu"], params["wls"]], axis=1)
    bh = jnp.concatenate([params["bmu"], params["bls"]], axis=1)

    # Batch tile (multiple of 8 sublanes); pad batch up to a multiple of it.
    tb = min(block_batch, _round_up(B, 8))
    Bp = _round_up(B, tb)
    if Bp != B:
        state = jnp.pad(state, ((0, Bp - B), (0, 0)))
        eps = jnp.pad(eps, ((0, Bp - B), (0, 0)))

    grid = (Bp // tb,)

    def batch_spec(last):
        return pl.BlockSpec((tb, last), lambda i: (i, 0))

    def resident(shape):
        return pl.BlockSpec(shape, lambda i: (0, 0))

    kernel = functools.partial(_policy_kernel, num_actions=A)

    out = pl.pallas_call(
        kernel,
        out_shape=jax.ShapeDtypeStruct((Bp, OUT_LANES), jnp.float32),
        grid=grid,
        in_specs=[
            batch_spec(F),                     # state   (tiled over batch)
            batch_spec(A),                     # eps     (tiled over batch)
            resident((F, H1)), resident((1, H1)),     # W1, b1 (resident)
            resident((H1, H2)), resident((1, H2)),    # W2, b2 (resident)
            resident((H2, 2 * A)), resident((1, 2 * A)),  # fused head W, b (resident)
        ],
        out_specs=pl.BlockSpec((tb, OUT_LANES), lambda i: (i, 0)),
        compiler_params=pltpu.CompilerParams(
            dimension_semantics=("parallel",),
        ),
    )(state, eps,
      params["w1"], params["b1"],
      params["w2"], params["b2"],
      wh, bh)

    sample = out[:B, :A]
    mean = out[:B, A:2 * A]
    log_pi = out[:B, 2 * A:2 * A + 1]
    return sample, log_pi, mean


def init_params(key, input_size, hidden, num_actions):
    """Deterministic synthetic init. Weights stored as (in, out); biases as (1, out)."""
    ks = jax.random.split(key, 8)

    def lin(kw, kb, fan_in, fan_out):
        bound = 1.0 / math.sqrt(fan_in)
        w = jax.random.uniform(kw, (fan_in, fan_out), jnp.float32, -bound, bound)
        b = jax.random.uniform(kb, (1, fan_out), jnp.float32, -bound, bound)
        return w, b

    w1, b1 = lin(ks[0], ks[1], input_size, hidden[0])
    w2, b2 = lin(ks[2], ks[3], hidden[0], hidden[1])
    wmu, bmu = lin(ks[4], ks[5], hidden[1], num_actions)
    wls, bls = lin(ks[6], ks[7], hidden[1], num_actions)
    return dict(w1=w1, b1=b1, w2=w2, b2=b2, wmu=wmu, bmu=bmu, wls=wls, bls=bls)


def _reference(state, p, eps):
    """Pure-JAX reference with the separate (unfused) heads, same math as the kernel."""
    dot = functools.partial(jnp.dot, precision=_HIGHEST,
                            preferred_element_type=jnp.float32)
    h = jnp.maximum(dot(state, p["w1"]) + p["b1"], 0.0)
    h = jnp.maximum(dot(h, p["w2"]) + p["b2"], 0.0)
    mu = dot(h, p["wmu"]) + p["bmu"]
    ls = jnp.tanh(dot(h, p["wls"]) + p["bls"])
    ls = LOG_STD_MIN + 0.5 * (LOG_STD_MAX - LOG_STD_MIN) * (ls + 1.0)
    std = jnp.exp(ls)
    x_pre = mu + std * eps
    sample = jnp.tanh(x_pre)
    # Same reparameterization identity as the kernel: (x_pre - mu)/std == eps.
    base_lp = -0.5 * eps * eps - ls - 0.5 * math.log(2 * math.pi)
    log_det = 2.0 * (math.log(2.0) - x_pre - _softplus(-2.0 * x_pre))
    log_pi = jnp.sum(base_lp - log_det, axis=-1, keepdims=True)
    return sample, log_pi, jnp.tanh(mu)


if __name__ == "__main__":
    key = jax.random.PRNGKey(0)
    B, INPUT, HIDDEN, ACTIONS = 256, 16, (64, 64), 8   # B=256, TB=128 -> grid of 2 tiles

    k_state, k_params, k_eps = jax.random.split(key, 3)
    state = jax.random.normal(k_state, (B, INPUT), jnp.float32)
    params = init_params(k_params, INPUT, HIDDEN, ACTIONS)
    # rsample noise generated in plain JAX (reparameterization trick); consumed in-kernel.
    eps = jax.random.normal(k_eps, (B, ACTIONS), jnp.float32)

    sample, log_pi, mean = tanh_gaussian_policy(state, params, eps)
    jax.block_until_ready((sample, log_pi, mean))

    ref_sample, ref_log_pi, ref_mean = _reference(state, params, eps)
    np.testing.assert_allclose(np.asarray(sample), np.asarray(ref_sample), rtol=1e-4, atol=1e-4)
    np.testing.assert_allclose(np.asarray(mean), np.asarray(ref_mean), rtol=1e-4, atol=1e-4)
    # log_pi is O(60) and linear in x_pre, so allow matmul-rounding-scale slack.
    np.testing.assert_allclose(np.asarray(log_pi), np.asarray(ref_log_pi), rtol=2e-3, atol=2e-2)

    print("KERNEL_OK")
</pallas_src>

<mosaic_0001>
module attributes {stable_mosaic.version = 11 : i64} {
  func.func @_policy_kernel(%arg0: i32, %arg1: memref<128x16xf32, #tpu.memory_space<vmem>>, %arg2: memref<128x8xf32, #tpu.memory_space<vmem>>, %arg3: memref<16x64xf32, #tpu.memory_space<vmem>>, %arg4: memref<1x64xf32, #tpu.memory_space<vmem>>, %arg5: memref<64x64xf32, #tpu.memory_space<vmem>>, %arg6: memref<1x64xf32, #tpu.memory_space<vmem>>, %arg7: memref<64x16xf32, #tpu.memory_space<vmem>>, %arg8: memref<1x16xf32, #tpu.memory_space<vmem>>, %arg9: memref<128x128xf32, #tpu.memory_space<vmem>>) attributes {dimension_semantics = [#tpu.dimension_semantics<parallel>], iteration_bounds = array<i64: 2>, scalar_prefetch = 0 : i64, scratch_operands = 0 : i64, tpu.core_type = #tpu.core_type<tc>, window_params = [{transform_indices = @transform_0, window_bounds = array<i64: 128, 16>}, {transform_indices = @transform_1, window_bounds = array<i64: 128, 8>}, {pipeline_mode = #tpu.pipeline_mode<synchronous>, transform_indices = @transform_2, window_bounds = array<i64: 16, 64>}, {pipeline_mode = #tpu.pipeline_mode<synchronous>, transform_indices = @transform_3, window_bounds = array<i64: 1, 64>}, {pipeline_mode = #tpu.pipeline_mode<synchronous>, transform_indices = @transform_4, window_bounds = array<i64: 64, 64>}, {pipeline_mode = #tpu.pipeline_mode<synchronous>, transform_indices = @transform_5, window_bounds = array<i64: 1, 64>}, {pipeline_mode = #tpu.pipeline_mode<synchronous>, transform_indices = @transform_6, window_bounds = array<i64: 64, 16>}, {pipeline_mode = #tpu.pipeline_mode<synchronous>, transform_indices = @transform_7, window_bounds = array<i64: 1, 16>}, {transform_indices = @transform_8, window_bounds = array<i64: 128, 128>}]} {
    %c0 = arith.constant 0 : index
    %c0_0 = arith.constant 0 : index
    %0 = vector.load %arg1[%c0, %c0_0] : memref<128x16xf32, #tpu.memory_space<vmem>>, vector<128x16xf32>
    %c0_1 = arith.constant 0 : index
    %c0_2 = arith.constant 0 : index
    %1 = vector.load %arg3[%c0_1, %c0_2] : memref<16x64xf32, #tpu.memory_space<vmem>>, vector<16x64xf32>
    %cst = arith.constant dense<0.000000e+00> : vector<128x64xf32>
    %2 = tpu.matmul %0, %1, %cst {dimension_numbers = #tpu.dot_dimension_numbers<[1], [0], [0], [1], [0, 0, 1, 1], [], []>, precision = #tpu.contract_precision<fp32>} : vector<128x16xf32>, vector<16x64xf32>, vector<128x64xf32> -> vector<128x64xf32>
    %c0_3 = arith.constant 0 : index
    %c0_4 = arith.constant 0 : index
    %3 = vector.load %arg4[%c0_3, %c0_4] : memref<1x64xf32, #tpu.memory_space<vmem>>, vector<1x64xf32>
    %4 = vector.broadcast %3 : vector<1x64xf32> to vector<128x64xf32>
    %5 = arith.addf %2, %4 : vector<128x64xf32>
    %cst_5 = arith.constant 0.000000e+00 : f32
    %6 = vector.broadcast %cst_5 : f32 to vector<128x64xf32>
    %7 = arith.maximumf %5, %6 : vector<128x64xf32>
    %c0_6 = arith.constant 0 : index
    %c0_7 = arith.constant 0 : index
    %8 = vector.load %arg5[%c0_6, %c0_7] : memref<64x64xf32, #tpu.memory_space<vmem>>, vector<64x64xf32>
    %cst_8 = arith.constant dense<0.000000e+00> : vector<128x64xf32>
    %9 = tpu.matmul %7, %8, %cst_8 {dimension_numbers = #tpu.dot_dimension_numbers<[1], [0], [0], [1], [0, 0, 1, 1], [], []>, precision = #tpu.contract_precision<fp32>} : vector<128x64xf32>, vector<64x64xf32>, vector<128x64xf32> -> vector<128x64xf32>
    %c0_9 = arith.constant 0 : index
    %c0_10 = arith.constant 0 : index
    %10 = vector.load %arg6[%c0_9, %c0_10] : memref<1x64xf32, #tpu.memory_space<vmem>>, vector<1x64xf32>
    %11 = vector.broadcast %10 : vector<1x64xf32> to vector<128x64xf32>
    %12 = arith.addf %9, %11 : vector<128x64xf32>
    %cst_11 = arith.constant 0.000000e+00 : f32
    %13 = vector.broadcast %cst_11 : f32 to vector<128x64xf32>
    %14 = arith.maximumf %12, %13 : vector<128x64xf32>
    %c0_12 = arith.constant 0 : index
    %c0_13 = arith.constant 0 : index
    %15 = vector.load %arg7[%c0_12, %c0_13] : memref<64x16xf32, #tpu.memory_space<vmem>>, vector<64x16xf32>
    %cst_14 = arith.constant dense<0.000000e+00> : vector<128x16xf32>
    %16 = tpu.matmul %14, %15, %cst_14 {dimension_numbers = #tpu.dot_dimension_numbers<[1], [0], [0], [1], [0, 0, 1, 1], [], []>, precision = #tpu.contract_precision<fp32>} : vector<128x64xf32>, vector<64x16xf32>, vector<128x16xf32> -> vector<128x16xf32>
    %c0_15 = arith.constant 0 : index
    %c0_16 = arith.constant 0 : index
    %17 = vector.load %arg8[%c0_15, %c0_16] : memref<1x16xf32, #tpu.memory_space<vmem>>, vector<1x16xf32>
    %18 = vector.broadcast %17 : vector<1x16xf32> to vector<128x16xf32>
    %19 = arith.addf %16, %18 : vector<128x16xf32>
    %20 = vector.extract_strided_slice %19 {offsets = [0, 0], sizes = [128, 8], strides = [1, 1]} : vector<128x16xf32> to vector<128x8xf32>
    %21 = vector.extract_strided_slice %19 {offsets = [0, 8], sizes = [128, 8], strides = [1, 1]} : vector<128x16xf32> to vector<128x8xf32>
    %22 = math.tanh %21 : vector<128x8xf32>
    %cst_17 = arith.constant 1.000000e+00 : f32
    %23 = vector.broadcast %cst_17 : f32 to vector<128x8xf32>
    %24 = arith.addf %22, %23 : vector<128x8xf32>
    %cst_18 = arith.constant 1.100000e+01 : f32
    %25 = vector.broadcast %cst_18 : f32 to vector<128x8xf32>
    %26 = arith.mulf %25, %24 : vector<128x8xf32>
    %cst_19 = arith.constant -2.000000e+01 : f32
    %27 = vector.broadcast %cst_19 : f32 to vector<128x8xf32>
    %28 = arith.addf %27, %26 : vector<128x8xf32>
    %29 = math.exp %28 : vector<128x8xf32>
    %c0_20 = arith.constant 0 : index
    %c0_21 = arith.constant 0 : index
    %30 = vector.load %arg2[%c0_20, %c0_21] : memref<128x8xf32, #tpu.memory_space<vmem>>, vector<128x8xf32>
    %31 = arith.mulf %29, %30 : vector<128x8xf32>
    %32 = arith.addf %20, %31 : vector<128x8xf32>
    %33 = math.tanh %32 : vector<128x8xf32>
    %34 = math.tanh %20 : vector<128x8xf32>
    %cst_22 = arith.constant -5.000000e-01 : f32
    %35 = vector.broadcast %cst_22 : f32 to vector<128x8xf32>
    %36 = arith.mulf %35, %30 : vector<128x8xf32>
    %37 = arith.mulf %36, %30 : vector<128x8xf32>
    %38 = arith.subf %37, %28 : vector<128x8xf32>
    %cst_23 = arith.constant 0.918938517 : f32
    %39 = vector.broadcast %cst_23 : f32 to vector<128x8xf32>
    %40 = arith.subf %38, %39 : vector<128x8xf32>
    %cst_24 = arith.constant 0.693147182 : f32
    %41 = vector.broadcast %cst_24 : f32 to vector<128x8xf32>
    %42 = arith.subf %41, %32 : vector<128x8xf32>
    %cst_25 = arith.constant -2.000000e+00 : f32
    %43 = vector.broadcast %cst_25 : f32 to vector<128x8xf32>
    %44 = arith.mulf %43, %32 : vector<128x8xf32>
    %cst_26 = arith.constant 0.000000e+00 : f32
    %45 = vector.broadcast %cst_26 : f32 to vector<128x8xf32>
    %46 = arith.maximumf %44, %45 : vector<128x8xf32>
    %47 = math.absf %44 : vector<128x8xf32>
    %cst_27 = arith.constant 0.000000e+00 : f32
    %48 = vector.broadcast %cst_27 : f32 to vector<128x8xf32>
    %49 = arith.subf %48, %47 : vector<128x8xf32>
    %50 = math.exp %49 : vector<128x8xf32>
    %51 = math.log1p %50 : vector<128x8xf32>
    %52 = arith.addf %46, %51 : vector<128x8xf32>
    %53 = arith.subf %42, %52 : vector<128x8xf32>
    %cst_28 = arith.constant 2.000000e+00 : f32
    %54 = vector.broadcast %cst_28 : f32 to vector<128x8xf32>
    %55 = arith.mulf %54, %53 : vector<128x8xf32>
    %56 = arith.subf %40, %55 : vector<128x8xf32>
    %cst_29 = arith.constant dense<0.000000e+00> : vector<128xf32>
    %57 = vector.multi_reduction <add>, %56, %cst_29 [1] : vector<128x8xf32> to vector<128xf32>
    %58 = vector.shape_cast %57 : vector<128xf32> to vector<128x1xf32>
    %cst_30 = arith.constant 0.000000e+00 : f32
    %59 = vector.broadcast %cst_30 : f32 to vector<128x128xf32>
    %c0_31 = arith.constant 0 : index
    %c0_32 = arith.constant 0 : index
    %60 = vector.load %arg9[%c0_31, %c0_32] : memref<128x128xf32, #tpu.memory_space<vmem>>, vector<128x128xf32>
    tpu.vector_store %arg9[%c0_31, %c0_32], %59 {strides = array<i32>} : memref<128x128xf32, #tpu.memory_space<vmem>>, vector<128x128xf32>,
    %c0_33 = arith.constant 0 : index
    %c0_34 = arith.constant 0 : index
    %61 = vector.load %arg9[%c0_33, %c0_34] : memref<128x128xf32, #tpu.memory_space<vmem>>, vector<128x8xf32>
    tpu.vector_store %arg9[%c0_33, %c0_34], %33 {strides = array<i32>} : memref<128x128xf32, #tpu.memory_space<vmem>>, vector<128x8xf32>,
    %c0_35 = arith.constant 0 : index
    %c8 = arith.constant 8 : index
    %62 = vector.load %arg9[%c0_35, %c8] : memref<128x128xf32, #tpu.memory_space<vmem>>, vector<128x8xf32>
    tpu.vector_store %arg9[%c0_35, %c8], %34 {strides = array<i32>} : memref<128x128xf32, #tpu.memory_space<vmem>>, vector<128x8xf32>,
    %c0_36 = arith.constant 0 : index
    %c16 = arith.constant 16 : index
    %63 = vector.load %arg9[%c0_36, %c16] : memref<128x128xf32, #tpu.memory_space<vmem>>, vector<128x1xf32>
    tpu.vector_store %arg9[%c0_36, %c16], %58 {strides = array<i32>} : memref<128x128xf32, #tpu.memory_space<vmem>>, vector<128x1xf32>,
    return
  }
  func.func @transform_0(%arg0: i32) -> (i32, i32) {
    %c0_i32 = arith.constant 0 : i32
    %c0_i32_0 = arith.constant 0 : i32
    return %arg0, %c0_i32 : i32, i32
  }
  func.func @transform_1(%arg0: i32) -> (i32, i32) {
    %c0_i32 = arith.constant 0 : i32
    %c0_i32_0 = arith.constant 0 : i32
    return %arg0, %c0_i32 : i32, i32
  }
  func.func @transform_2(%arg0: i32) -> (i32, i32) {
    %c0_i32 = arith.constant 0 : i32
    %c0_i32_0 = arith.constant 0 : i32
    %c0_i32_1 = arith.constant 0 : i32
    return %c0_i32, %c0_i32_0 : i32, i32
  }
  func.func @transform_3(%arg0: i32) -> (i32, i32) {
    %c0_i32 = arith.constant 0 : i32
    %c0_i32_0 = arith.constant 0 : i32
    %c0_i32_1 = arith.constant 0 : i32
    return %c0_i32, %c0_i32_0 : i32, i32
  }
  func.func @transform_4(%arg0: i32) -> (i32, i32) {
    %c0_i32 = arith.constant 0 : i32
    %c0_i32_0 = arith.constant 0 : i32
    %c0_i32_1 = arith.constant 0 : i32
    return %c0_i32, %c0_i32_0 : i32, i32
  }
  func.func @transform_5(%arg0: i32) -> (i32, i32) {
    %c0_i32 = arith.constant 0 : i32
    %c0_i32_0 = arith.constant 0 : i32
    %c0_i32_1 = arith.constant 0 : i32
    return %c0_i32, %c0_i32_0 : i32, i32
  }
  func.func @transform_6(%arg0: i32) -> (i32, i32) {
    %c0_i32 = arith.constant 0 : i32
    %c0_i32_0 = arith.constant 0 : i32
    %c0_i32_1 = arith.constant 0 : i32
    return %c0_i32, %c0_i32_0 : i32, i32
  }
  func.func @transform_7(%arg0: i32) -> (i32, i32) {
    %c0_i32 = arith.constant 0 : i32
    %c0_i32_0 = arith.constant 0 : i32
    %c0_i32_1 = arith.constant 0 : i32
    return %c0_i32, %c0_i32_0 : i32, i32
  }
  func.func @transform_8(%arg0: i32) -> (i32, i32) {
    %c0_i32 = arith.constant 0 : i32
    %c0_i32_0 = arith.constant 0 : i32
    return %arg0, %c0_i32 : i32, i32
  }
}

</mosaic_0001>

<bundles_post_ra>
// kernel: tpu_custom_call.1
= control target key start
LH: loop header
LB: loop body
LE: loop exit
PB: predicated region body
PF: predicated region fallthrough
CT: control target
= control target key end

     0   :  { %13 = vsyncpa [#allocation3], 0  ;;  %s9094_s0 = inlined_call_operand.vmem [shape: f32[256,16], index: 0, kind: input, shape index: {}]   ;;  %s9095_s1 = inlined_call_operand.vmem [shape: f32[256,8], index: 1, kind: input, shape index: {}]   ;;  %s9096_s2 = inlined_call_operand.vmem [shape: f32[16,64], index: 2, kind: input, shape index: {}]   ;;  %s9097_s3 = inlined_call_operand.vmem [shape: f32[1,64], index: 3, kind: input, shape index: {}]   ;;  %s9098_s4 = inlined_call_operand.vmem [shape: f32[64,64], index: 4, kind: input, shape index: {}]   ;;  %s9099_s5 = inlined_call_operand.vmem [shape: f32[1,64], index: 5, kind: input, shape index: {}]   ;;  %s9100_s6 = inlined_call_operand.vmem [shape: f32[64,16], index: 6, kind: input, shape index: {}]   ;;  %s9101_s7 = inlined_call_operand.vmem [shape: f32[1,16], index: 7, kind: input, shape index: {}]   ;;  %s9102_s8 = inlined_call_operand.hbm [shape: f32[256,128], index: 8, kind: output, shape index: {}]  }
   0x1   :  { %15 = vsyncpa [#allocation3 + $0x1], 0  ;;  %s6932_s27 = smov 0   ;;  %s6934_s28 = smov 0  }
   0x2   :  { %s6936_s29 = smov 0   ;;  %s6938_s30 = smov 0  }
   0x3 LB: > { %s6953_s9 = sadd.s32 4294967295, %s6880_s30   ;;  %s5033_s10 = sadd.s32 4294967294, %s6880_s30   ;;  %s6880_s30 = sphi %s6938_s30, %s9323_s30   ;;  %s6876_s29 = sphi %s6936_s29, %s9322_s29   ;;  %s6872_s28 = sphi %s6934_s28, %s9321_s28   ;;  %s6868_s27 = sphi %s6932_s27, %s9320_s27  }
   0x4   : > { %s6957_s11 = sadd.s32 1, %s6880_s30   ;;  %s206_s12 = sadd.s32 1, %s6876_s29 }
   0x5   : > { %s203_s13 = ssub.s32 %s6880_s30, %s6957_s11  ;;  %p216_p0 = scmp.ne.s32.totalorder %s6876_s29, %s6872_s28 }
   0x6   : > { %p204_p1 = scmp.eq.s32.totalorder %s203_s13, 0  ;;  %p217_p2 = scmp.eq.s32.totalorder %s6953_s9, 1 }
   0x7   : > { %p222_p3 = scmp.ne.s32.totalorder %s6872_s28, %s6868_s27  ;;  %p223_p4 = scmp.eq.s32.totalorder %s5033_s10, 1 }
   0x8   : > { %s6968_s14 = scalar_select %p204_p1, %s6876_s29, %s206_s12  }
   0x9   : > { %p6970_p5 = por %p217_p2, %p216_p0  ;;  %p6974_p6 = por %p223_p4, %p222_p3 }
   0xa   : > { %p5036_p7 = scmp.ge.s32.totalorder %s6880_s30, 1  ;;  %p277_p8 = scmp.lt.s32.totalorder %s6880_s30, 3 }
   0xc   : > { %p278_p9 = pnand %p5036_p7, %p277_p8 }
   0xe   : > { %281 = sbr.rel (%p278_p9) target bundleno = 1531 (0x5fb), region = 52 }
  0x15   : > { %v345_v0 = vld [vmem:[%s9096_s2] sm:$0xff]  ;;  %v346_v1 = vld [vmem:[%s9096_s2 + $0x8] sm:$0xff]  ;;  %s5038_s21 = sshll.u32 %s6953_s9, 4  ;;  %vm354_vm0 = vcmask 130048   ;;  %vm1538_vm1 = vcmask 523264   ;;  %s6882_s19 = smov 8  }
  0x16   : > { %v404_v2 = vand.u32 4294901760, %v345_v0  ;;  %v407_v3 = vand.u32 4294901760, %v346_v1  ;;  %p317_p10 = scmp.lt.s32.totalorder %s5038_s21, 31  ;;  %s6883_s20 = smov 120   ;;  %vm4766_vm2 = vcmask 64512   ;;  %vm4911_vm3 = vcmask 130112  }
  0x17   : > { %s313_s23 = sand.u32 1, %s6872_s28   ;;  %s5066_s26 = sshll.u32 %s6953_s9, 11 }
  0x18   : > { %v6987_v4 = vpack.c.bf16 %v407_v3, %v404_v2  ;;  %s9325_s21 = smov (!%p317_p10, %s5038_s21), 31  ;;  %v632_v5 = vsub.f32 %v345_v0, %v404_v2  ;;  %v639_v6 = vsub.f32 %v346_v1, %v407_v3  ;;  %s5037_s24 = sshll.u32 %s313_s23, 7 }
  0x19   : > { %s5039_s22 = sshll.u32 %s9325_s21, 3  ;;  %s9040_s17 = scalar_lea.hbm %s9102_s8, %s5066_s26 }
  0x1a   : > { %6124 = vmatprep.subr.bf16.mxu0 %v6987_v4  ;;  %6112 = vmatprep.subr.bf16.mxu1 %v6987_v4  ;;  %v633_v7 = vand.u32 4294901760, %v632_v5  ;;  %v640_v8 = vand.u32 4294901760, %v639_v6  ;;  %s7000_s25 = scalar_lea.vmem %s9094_s0, %s5039_s22  ;;  %v7012_v21 = vpack.c.bf16 %v639_v6, %v632_v5  ;;  %s8037_s18 = scalar_lea.vmem %s9095_s1, %s5039_s22 }
  0x1b   : > { %6126 = vmatpush3.bf16.msra.mxu0 %v6987_v4  ;;  %6114 = vmatpush3.bf16.msra.mxu1 %v6987_v4  ;;  %v329_v9 = vld [vmem:[%s7000_s25] sm:$0xff]  ;;  %v330_v10 = vld [vmem:[%s7000_s25 + $0x8] sm:$0xff]  ;;  %v331_v13 = vld [vmem:[%s7000_s25 + $0x10] sm:$0xff]  ;;  %s9052_s9 = scalar_lea.sflag [#allocation3], %s313_s23  ;;  %s6885_s21 = smov [#allocation2]  }
  0x1c   : > { %v634_v11 = vsub.f32 %v632_v5, %v633_v7  ;;  %v641_v12 = vsub.f32 %v639_v6, %v640_v8  ;;  %v6127_v14 = vpack.c.bf16 %v640_v8, %v633_v7  ;;  %v356_v15 = vsel %vm354_vm0, %v329_v9, 0  ;;  %v332_v18 = vld [vmem:[%s7000_s25 + $0x18] sm:$0xff]  ;;  %v333_v19 = vld [vmem:[%s7000_s25 + $0x20] sm:$0xff]  ;;  %v334_v20 = vld [vmem:[%s7000_s25 + $0x28] sm:$0xff]  ;;  %s6822_s22 = sshll.u32 %s6885_s21, 4  ;;  %s6823_s22 = int_to_ptr.vmem [resolvable:$false] %s6822_s22 }
  0x1d   : > { %v359_v16 = vsel %vm354_vm0, %v330_v10, 0  ;;  %v362_v17 = vsel %vm354_vm0, %v331_v13, 0  ;;  %v7014_v22 = vand.u32 4294901760, %v356_v15  ;;  %v335_v26 = vld [vmem:[%s7000_s25 + $0x30] sm:$0xff]  ;;  %v365_v28 = vsel %vm354_vm0, %v332_v18, 0  ;;  %v336_v35 = vld [vmem:[%s7000_s25 + $0x38] sm:$0xff] }
  0x1e   : > { %v7016_v23 = vand.u32 4294901760, %v359_v16  ;;  %v635_v24 = vand.u32 4294901760, %v634_v11  ;;  %v642_v25 = vand.u32 4294901760, %v641_v12  ;;  %6128 = vmatprep.subr.bf16.mxu0 %v6127_v14  ;;  %v7019_v27 = vand.u32 4294901760, %v362_v17  ;;  %v337_v56 = vld [vmem:[%s7000_s25 + $0x40] sm:$0xff]  ;;  %v338_v57 = vld [vmem:[%s7000_s25 + $0x48] sm:$0xff] }
  0x1f   : > { %v368_v29 = vsel %vm354_vm0, %v333_v19, 0  ;;  %v371_v30 = vsel %vm354_vm0, %v334_v20, 0  ;;  %v7025_v31 = vsub.f32 %v356_v15, %v7014_v22  ;;  %v7030_v34 = vand.u32 4294901760, %v365_v28  ;;  %v339_v2 = vld [vmem:[%s7000_s25 + $0x50] sm:$0xff]  ;;  %v340_v3 = vld [vmem:[%s7000_s25 + $0x58] sm:$0xff]  ;;  %v341_v12 = vld [vmem:[%s7000_s25 + $0x60] sm:$0xff] }
  0x20   : > { %v7028_v32 = vsub.f32 %v359_v16, %v7016_v23  ;;  %v6115_v33 = vpack.c.bf16 %v642_v25, %v635_v24  ;;  %v7034_v36 = vsub.f32 %v362_v17, %v7019_v27  ;;  %v7036_v37 = vand.u32 4294901760, %v368_v29  ;;  %v342_v13 = vld [vmem:[%s7000_s25 + $0x68] sm:$0xff] }
  0x21   : > { %v7038_v38 = vand.u32 4294901760, %v371_v30  ;;  %v374_v39 = vsel %vm354_vm0, %v335_v26, 0  ;;  %v472_v40 = vand.u32 4294901760, %v7025_v31  ;;  %v7044_v42 = vsub.f32 %v365_v28, %v7030_v34 }
  0x22   : > { %v482_v41 = vand.u32 4294901760, %v7028_v32  ;;  %6116 = vmatprep.subr.bf16.mxu1 %v6115_v33  ;;  %v7046_v43 = vand.u32 4294901760, %v374_v39  ;;  %v492_v44 = vand.u32 4294901760, %v7034_v36  ;;  %v7050_v45 = vsub.f32 %v368_v29, %v7036_v37 }
  0x23   : > { %v7053_v46 = vsub.f32 %v371_v30, %v7038_v38  ;;  %v377_v47 = vsel %vm354_vm0, %v336_v35, 0  ;;  %5551 = vmatprep.mubr.f32.mxu0 %v472_v40  ;;  %v473_v48 = vsub.f32 %v7025_v31, %v472_v40  ;;  %v502_v50 = vand.u32 4294901760, %v7044_v42 }
  0x24   : > { %v483_v49 = vsub.f32 %v7028_v32, %v482_v41  ;;  %v7060_v51 = vsub.f32 %v374_v39, %v7046_v43  ;;  %5552 = vmatmul.mubr.f32.vlgmr.msra.gmra.mrb[0].mxu0 %v482_v41  ;;  %v493_v52 = vsub.f32 %v7034_v36, %v492_v44  ;;  %v512_v53 = vand.u32 4294901760, %v7050_v45 }
  0x25   : > { %v522_v54 = vand.u32 4294901760, %v7053_v46  ;;  %v7065_v55 = vand.u32 4294901760, %v377_v47  ;;  %v474_v58 = vand.u32 4294901760, %v473_v48  ;;  %5554 = vmatprep.mubr.f32.mxu0 %v492_v44  ;;  %6130 = vmatpush3.bf16.msra.mxu0 %v6127_v14  ;;  %v503_v60 = vsub.f32 %v7044_v42, %v502_v50  ;;  %v343_v14 = vld [vmem:[%s7000_s25 + $0x70] sm:$0xff] }
  0x26   : > { %v484_v59 = vand.u32 4294901760, %v483_v49  ;;  %v532_v61 = vand.u32 4294901760, %v7060_v51  ;;  %v494_v62 = vand.u32 4294901760, %v493_v52  ;;  %v513_v63 = vsub.f32 %v7050_v45, %v512_v53  ;;  %6132 = vmatprep.subr.bf16.mxu0 %v6987_v4 }
  0x27   : > { %v523_v0 = vsub.f32 %v7053_v46, %v522_v54  ;;  %v7074_v1 = vsub.f32 %v377_v47, %v7065_v55  ;;  %5467 = vmatprep.mubr.f32.mxu1 %v474_v58  ;;  %v504_v5 = vand.u32 4294901760, %v503_v60  ;;  %v380_v6 = vsel %vm354_vm0, %v337_v56, 0 }
  0x28   : > { %v383_v7 = vsel %vm354_vm0, %v338_v57, 0  ;;  %5468 = vmatmul.mubr.f32.vlgmr.msra.gmra.mrb[0].mxu1 %v484_v59  ;;  %5555 = vmatmul.mubr.f32.gmra.mrb[2].mxu0 %v502_v50  ;;  %v514_v8 = vand.u32 4294901760, %v513_v63  ;;  %v533_v10 = vsub.f32 %v7060_v51, %v532_v61  ;;  %v7083_v11 = vand.u32 4294901760, %v380_v6 }
  0x29   : > { %v542_v9 = vand.u32 4294901760, %v7074_v1  ;;  %6118 = vmatpush3.bf16.msra.mxu1 %v6115_v33  ;;  %5470 = vmatprep.mubr.f32.mxu1 %v494_v62  ;;  %v524_v15 = vand.u32 4294901760, %v523_v0  ;;  %v7088_v16 = vand.u32 4294901760, %v383_v7  ;;  %v386_v17 = vsel %vm354_vm0, %v339_v2, 0  ;;  %v344_v33 = vld [vmem:[%s7000_s25 + $0x78] sm:$0xff]  ;;  %s8386_s25 = scalar_lea.vmem [#allocation2], %s5037_s24 }
  0x2a   : > { %v389_v18 = vsel %vm354_vm0, %v340_v3, 0  ;;  %5557 = vmatprep.mubr.f32.mxu0 %v512_v53  ;;  %v7093_v19 = vsub.f32 %v380_v6, %v7083_v11  ;;  %v7096_v24 = vand.u32 4294901760, %v386_v17  ;;  %6120 = vmatprep.subr.bf16.mxu1 %v7012_v21  ;;  %v392_v28 = vsel %vm354_vm0, %v341_v12, 0  ;;  %s4959_s10 = sshll.u32 %s8386_s25, 4  ;;  %s9044_s10 = int_to_ptr.vmem [resolvable:$true] %s4959_s10 }
  0x2b   : > { %v543_v20 = vsub.f32 %v7074_v1, %v542_v9  ;;  %v7098_v25 = vand.u32 4294901760, %v389_v18  ;;  %v7102_v26 = vsub.f32 %v383_v7, %v7088_v16  ;;  %v395_v29 = vsel %vm354_vm0, %v342_v13, 0  ;;  %p6825_p0 = scmp.lt.s32.totalorder %s9044_s10, %s6823_s22 }
  0x2c   : > { %v398_v30 = vsel %vm354_vm0, %v343_v14, 0  ;;  %5471 = vmatmul.mubr.f32.gmra.mrb[2].mxu1 %v504_v5  ;;  %5558 = vmatmul.mubr.f32.gmra.mrb[4].mxu0 %v522_v54  ;;  %v534_v35 = vand.u32 4294901760, %v533_v10  ;;  %v552_v39 = vand.u32 4294901760, %v7093_v19  ;;  %v7110_v40 = vsub.f32 %v386_v17, %v7096_v24 }
  0x2d   : > { %v7113_v41 = vsub.f32 %v389_v18, %v7098_v25  ;;  %5473 = vmatprep.mubr.f32.mxu1 %v514_v8  ;;  %5560 = vmatprep.mubr.f32.mxu0 %v532_v61  ;;  %v562_v44 = vand.u32 4294901760, %v7102_v26  ;;  %v7116_v47 = vand.u32 4294901760, %v392_v28  ;;  %v7118_v48 = vand.u32 4294901760, %v395_v29 }
  0x2e   : > { %v7120_v49 = vand.u32 4294901760, %v398_v30  ;;  %v553_v50 = vsub.f32 %v7093_v19, %v552_v39  ;;  %v572_v52 = vand.u32 4294901760, %v7110_v40  ;;  %v401_v53 = vsel %vm354_vm0, %v344_v33, 0 }
  0x2f   : > { %v544_v54 = vand.u32 4294901760, %v543_v20  ;;  %v7126_v56 = vsub.f32 %v392_v28, %v7116_v47  ;;  %v563_v57 = vsub.f32 %v7102_v26, %v562_v44  ;;  %v582_v58 = vand.u32 4294901760, %v7113_v41  ;;  %v7154_v28 = vld [vmem:[%s9098_s4] sm:$0xff] }
  0x30   : > { %5474 = vmatmul.mubr.f32.gmra.mrb[4].mxu1 %v524_v15  ;;  %5561 = vmatmul.mubr.f32.gmra.mrb[6].mxu0 %v542_v9  ;;  %v7131_v59 = vsub.f32 %v395_v29, %v7118_v48  ;;  %v7133_v60 = vand.u32 4294901760, %v401_v53  ;;  %v554_v61 = vand.u32 4294901760, %v553_v50  ;;  %v573_v62 = vsub.f32 %v7110_v40, %v572_v52  ;;  %v7159_v29 = vld [vmem:[%s9098_s4 + $0x8] sm:$0xff] }
  0x31   : > { %5476 = vmatprep.mubr.f32.mxu1 %v534_v35  ;;  %5563 = vmatprep.mubr.f32.mxu0 %v552_v39  ;;  %v592_v63 = vand.u32 4294901760, %v7126_v56  ;;  %v7138_v0 = vsub.f32 %v398_v30, %v7120_v49  ;;  %v564_v2 = vand.u32 4294901760, %v563_v57  ;;  %v583_v3 = vsub.f32 %v7113_v41, %v582_v58 }
  0x32   : > { %v602_v5 = vand.u32 4294901760, %v7131_v59  ;;  %v7143_v6 = vsub.f32 %v401_v53, %v7133_v60  ;;  %v574_v7 = vand.u32 4294901760, %v573_v62  ;;  %v1588_v33 = vand.u32 4294901760, %v7154_v28 }
  0x33   : > { %v593_v8 = vsub.f32 %v7126_v56, %v592_v63  ;;  %v612_v9 = vand.u32 4294901760, %v7138_v0  ;;  %v584_v10 = vand.u32 4294901760, %v583_v3  ;;  %v1591_v35 = vand.u32 4294901760, %v7159_v29 }
  0x34   : > { %5477 = vmatmul.mubr.f32.gmra.mrb[6].mxu1 %v544_v54  ;;  %5564 = vmatmul.mubr.f32.gmra.mrb[8].mxu0 %v562_v44  ;;  %v603_v12 = vsub.f32 %v7131_v59, %v602_v5  ;;  %v622_v13 = vand.u32 4294901760, %v7143_v6 }
  0x35   : > { %5479 = vmatprep.mubr.f32.mxu1 %v554_v61  ;;  %5566 = vmatprep.mubr.f32.mxu0 %v572_v52  ;;  %v594_v14 = vand.u32 4294901760, %v593_v8  ;;  %v613_v15 = vsub.f32 %v7138_v0, %v612_v9  ;;  %v7172_v39 = vpack.c.bf16 %v1591_v35, %v1588_v33 }
  0x36   : > { %v604_v17 = vand.u32 4294901760, %v603_v12  ;;  %v623_v18 = vsub.f32 %v7143_v6, %v622_v13 }
  0x37   : > { %v614_v20 = vand.u32 4294901760, %v613_v15 }
  0x38   : > { %5480 = vmatmul.mubr.f32.gmra.mrb[8].mxu1 %v564_v2  ;;  %5567 = vmatmul.mubr.f32.gmra.mrb[10].mxu0 %v582_v58  ;;  %v624_v30 = vand.u32 4294901760, %v623_v18 }
  0x39   : > { %5482 = vmatprep.mubr.f32.mxu1 %v574_v7  ;;  %5569 = vmatprep.mubr.f32.mxu0 %v592_v63 }
  0x3c   : > { %5483 = vmatmul.mubr.f32.gmra.mrb[10].mxu1 %v584_v10  ;;  %5570 = vmatmul.mubr.f32.gmra.mrb[12].mxu0 %v602_v5 }
  0x3d   : > { %5485 = vmatprep.mubr.f32.mxu1 %v594_v14  ;;  %5572 = vmatprep.mubr.f32.mxu0 %v612_v9  ;;  %v7351_v9 = vld [vmem:[%s9097_s3] ss:$0 sm:$0xff] }
  0x40   : > { %5486 = vmatmul.mubr.f32.gmra.mrb[12].mxu1 %v604_v17  ;;  %5573 = vmatmul.mubr.f32.gmra.mrb[14].mxu0 %v622_v13 }
  0x41   : > { %5488 = vmatprep.mubr.f32.mxu1 %v614_v20  ;;  %5579 = vmatprep.mubr.f32.mxu0 %v7014_v22 }
  0x44   : > { %5489 = vmatmul.mubr.f32.gmra.mrb[14].mxu1 %v624_v30  ;;  %5580 = vmatmul.mubr.f32.vlgmr.msra.gmra.mrb[0].mxu0 %v7016_v23 }
  0x45   : > { %5495 = vmatprep.mubr.f32.mxu1 %v7014_v22  ;;  %5582 = vmatprep.mubr.f32.mxu0 %v7019_v27 }
  0x46   : > { %6134 = vmatpush3.bf16.msra.mxu0 %v6987_v4  ;;  %v7205_v4 = vld [vmem:[%s9098_s4 + $0x10] sm:$0xff] }
  0x47   : > { %v1594_v44 = vand.u32 4294901760, %v7205_v4 }
  0x48   : > { %5496 = vmatmul.mubr.f32.vlgmr.msra.gmra.mrb[0].mxu1 %v7016_v23  ;;  %5583 = vmatmul.mubr.f32.gmra.mrb[2].mxu0 %v7030_v34 }
  0x49   : > { %6122 = vmatpush3.bf16.msra.mxu1 %v7012_v21  ;;  %5498 = vmatprep.mubr.f32.mxu1 %v7019_v27  ;;  %v7210_v21 = vld [vmem:[%s9098_s4 + $0x18] sm:$0xff]  ;;  %v7341_v5 = vsub.f32 %v7205_v4, %v1594_v44 }
  0x4a   : > { %5585 = vmatprep.mubr.f32.mxu0 %v7036_v37  ;;  %6136 = vmatprep.subr.bf16.mxu1 %v7172_v39  ;;  %v1597_v50 = vand.u32 4294901760, %v7210_v21 }
  0x4b   : > { %v9113_v10 = vand.u32 4294901760, %v7341_v5 }
  0x4c   : > { %5499 = vmatmul.mubr.f32.gmra.mrb[2].mxu1 %v7030_v34  ;;  %5586 = vmatmul.mubr.f32.gmra.mrb[4].mxu0 %v7038_v38  ;;  %v7224_v52 = vpack.c.bf16 %v1597_v50, %v1594_v44 }
  0x4d   : > { %5501 = vmatprep.mubr.f32.mxu1 %v7036_v37  ;;  %5588 = vmatprep.mubr.f32.mxu0 %v7046_v43 }
  0x50   : > { %5502 = vmatmul.mubr.f32.gmra.mrb[4].mxu1 %v7038_v38  ;;  %5589 = vmatmul.mubr.f32.gmra.mrb[6].mxu0 %v7065_v55 }
  0x51   : > { %5504 = vmatprep.mubr.f32.mxu1 %v7046_v43  ;;  %5591 = vmatprep.mubr.f32.mxu0 %v7083_v11 }
  0x54   : > { %5505 = vmatmul.mubr.f32.gmra.mrb[6].mxu1 %v7065_v55  ;;  %5592 = vmatmul.mubr.f32.gmra.mrb[8].mxu0 %v7088_v16 }
  0x55   : > { %5507 = vmatprep.mubr.f32.mxu1 %v7083_v11  ;;  %5594 = vmatprep.mubr.f32.mxu0 %v7096_v24 }
  0x58   : > { %5508 = vmatmul.mubr.f32.gmra.mrb[8].mxu1 %v7088_v16  ;;  %5595 = vmatmul.mubr.f32.gmra.mrb[10].mxu0 %v7098_v25 }
  0x59   : > { %5510 = vmatprep.mubr.f32.mxu1 %v7096_v24  ;;  %5597 = vmatprep.mubr.f32.mxu0 %v7116_v47 }
  0x5c   : > { %5511 = vmatmul.mubr.f32.gmra.mrb[10].mxu1 %v7098_v25  ;;  %5598 = vmatmul.mubr.f32.gmra.mrb[12].mxu0 %v7118_v48 }
  0x5d   : > { %5513 = vmatprep.mubr.f32.mxu1 %v7116_v47  ;;  %5600 = vmatprep.mubr.f32.mxu0 %v7120_v49 }
  0x60   : > { %5514 = vmatmul.mubr.f32.gmra.mrb[12].mxu1 %v7118_v48  ;;  %5601 = vmatmul.mubr.f32.gmra.mrb[14].mxu0 %v7133_v60 }
  0x61   : > { %5516 = vmatprep.mubr.f32.mxu1 %v7120_v49  ;;  %5607 = vmatprep.mubr.f32.mxu0 %v7014_v22  ;;  %v1527_v22 = vld [vmem:[%s9098_s4 + $0x20] sm:$0xff] }
  0x64   : > { %5517 = vmatmul.mubr.f32.gmra.mrb[14].mxu1 %v7133_v60  ;;  %5608 = vmatmul.mubr.f32.vlgmr.msra.gmra.mrb[0].mxu0 %v7016_v23  ;;  %v1528_v23 = vld [vmem:[%s9098_s4 + $0x28] sm:$0xff] }
  0x65   : > { %5523 = vmatprep.mubr.f32.mxu1 %v7025_v31  ;;  %5610 = vmatprep.mubr.f32.mxu0 %v7019_v27  ;;  %v1600_v27 = vand.u32 4294901760, %v1527_v22  ;;  %v1603_v31 = vand.u32 4294901760, %v1528_v23 }
  0x68   : > { %5524 = vmatmul.mubr.f32.vlgmr.msra.gmra.mrb[0].mxu1 %v7028_v32  ;;  %5611 = vmatmul.mubr.f32.gmra.mrb[2].mxu0 %v7030_v34  ;;  %v7263_v32 = vpack.c.bf16 %v1603_v31, %v1600_v27  ;;  %v1529_v34 = vld [vmem:[%s9098_s4 + $0x30] sm:$0xff] }
  0x69   : > { %5526 = vmatprep.mubr.f32.mxu1 %v7034_v36  ;;  %5613 = vmatprep.mubr.f32.mxu0 %v7036_v37  ;;  %v1530_v36 = vld [vmem:[%s9098_s4 + $0x38] sm:$0xff]  ;;  %v1606_v37 = vand.u32 4294901760, %v1529_v34 }
  0x6a   : > { %6138 = vmatpush3.bf16.msra.mxu1 %v7172_v39 }
  0x6b   : > { %6140 = vmatprep.subr.bf16.mxu1 %v7224_v52  ;;  %v7310_v53 = vsub.f32 %v1529_v34, %v1606_v37 }
  0x6c   : > { %5527 = vmatmul.mubr.f32.gmra.mrb[2].mxu1 %v7044_v42  ;;  %5614 = vmatmul.mubr.f32.gmra.mrb[4].mxu0 %v7038_v38  ;;  %v1609_v38 = vand.u32 4294901760, %v1530_v36 }
  0x6d   : > { %5529 = vmatprep.mubr.f32.mxu1 %v7050_v45  ;;  %5616 = vmatprep.mubr.f32.mxu0 %v7046_v43  ;;  %v7280_v43 = vsub.f32 %v7154_v28, %v1588_v33  ;;  %v7285_v45 = vsub.f32 %v7159_v29, %v1591_v35  ;;  %v9104_v57 = vand.u32 4294901760, %v7310_v53  ;;  %v1838_v29 = vsub.f32 %v7341_v5, %v9113_v10 }
  0x6e   : > { %6142 = vmatpush3.bf16.msra.mxu1 %v7224_v52  ;;  %v7273_v42 = vpack.c.bf16 %v1609_v38, %v1606_v37  ;;  %v7312_v54 = vsub.f32 %v1530_v36, %v1609_v38 }
  0x6f   : > { %6144 = vmatprep.subr.bf16.mxu1 %v7263_v32  ;;  %v1839_v36 = vand.u32 4294901760, %v1838_v29 }
  0x70   : > { %5530 = vmatmul.mubr.f32.gmra.mrb[4].mxu1 %v7053_v46  ;;  %5617 = vmatmul.mubr.f32.gmra.mrb[6].mxu0 %v7065_v55  ;;  %v1823_v46 = vand.u32 4294901760, %v7280_v43  ;;  %v9103_v58 = vand.u32 4294901760, %v7312_v54  ;;  %v7336_v3 = vpack.c.bf16 %v7312_v54, %v7310_v53 }
  0x71   : > { %5532 = vmatprep.mubr.f32.mxu1 %v7060_v51  ;;  %5619 = vmatprep.mubr.f32.mxu0 %v7083_v11  ;;  %v1830_v51 = vand.u32 4294901760, %v7285_v45 }
  0x72   : > { %6146 = vmatpush3.bf16.msra.mxu1 %v7263_v32  ;;  %v1824_v55 = vsub.f32 %v7280_v43, %v1823_v46 }
  0x73   : > { %6148 = vmatprep.subr.bf16.mxu1 %v7273_v42 }
  0x74   : > { %5533 = vmatmul.mubr.f32.gmra.mrb[6].mxu1 %v7074_v1  ;;  %5620 = vmatmul.mubr.f32.gmra.mrb[8].mxu0 %v7088_v16  ;;  %v1831_v1 = vsub.f32 %v7285_v45, %v1830_v51  ;;  %v1825_v11 = vand.u32 4294901760, %v1824_v55 }
  0x75   : > { %5535 = vmatprep.mubr.f32.mxu1 %v7093_v19  ;;  %5622 = vmatprep.mubr.f32.mxu0 %v7096_v24  ;;  %v7298_v24 = vsub.f32 %v1527_v22, %v1600_v27 }
  0x76   : > { %6150 = vmatpush3.bf16.msra.mxu1 %v7273_v42  ;;  %v1832_v16 = vand.u32 4294901760, %v1831_v1 }
  0x78   : > { %5536 = vmatmul.mubr.f32.gmra.mrb[8].mxu1 %v7102_v26  ;;  %5623 = vmatmul.mubr.f32.gmra.mrb[10].mxu0 %v7098_v25  ;;  %v7295_v19 = vpack.c.bf16 %v1832_v16, %v1825_v11  ;;  %v7300_v25 = vsub.f32 %v1528_v23, %v1603_v31  ;;  %v9107_v26 = vand.u32 4294901760, %v7298_v24 }
  0x79   : > { %5538 = vmatprep.mubr.f32.mxu1 %v7110_v40  ;;  %5625 = vmatprep.mubr.f32.mxu0 %v7116_v47 }
  0x7a   : > { %6152 = vmatprep.subr.bf16.mxu1 %v7295_v19  ;;  %v9106_v40 = vand.u32 4294901760, %v7300_v25  ;;  %v7332_v2 = vpack.c.bf16 %v7300_v25, %v7298_v24 }
  0x7c   : > { %5539 = vmatmul.mubr.f32.gmra.mrb[10].mxu1 %v7113_v41  ;;  %5626 = vmatmul.mubr.f32.gmra.mrb[12].mxu0 %v7118_v48  ;;  %v1852_v41 = vsub.f32 %v7298_v24, %v9107_v26  ;;  %v1859_v47 = vsub.f32 %v7300_v25, %v9106_v40 }
  0x7d   : > { %5541 = vmatprep.mubr.f32.mxu1 %v7126_v56  ;;  %5628 = vmatprep.mubr.f32.mxu0 %v7120_v49 }
  0x7e   : > { %v1853_v48 = vand.u32 4294901760, %v1852_v41  ;;  %v1860_v49 = vand.u32 4294901760, %v1859_v47 }
  0x80   : > { %5542 = vmatmul.mubr.f32.gmra.mrb[12].mxu1 %v7131_v59  ;;  %5629 = vmatmul.mubr.f32.gmra.mrb[14].mxu0 %v7133_v60  ;;  %v7314_v56 = vpack.c.bf16 %v1860_v49, %v1853_v48  ;;  %v1866_v59 = vsub.f32 %v7310_v53, %v9104_v57  ;;  %v1873_v60 = vsub.f32 %v7312_v54, %v9103_v58 }
  0x81   : > { %5544 = vmatprep.mubr.f32.mxu1 %v7138_v0  ;;  %v7328_v0 = vpack.c.bf16 %v7285_v45, %v7280_v43  ;;  %v9175_v43 = vand.u32 4294901760, %v7341_v5 }
  0x82   : > { %v1867_v61 = vand.u32 4294901760, %v1866_v59  ;;  %v1874_v62 = vand.u32 4294901760, %v1873_v60 }
  0x84   : > { %5545 = vmatmul.mubr.f32.gmra.mrb[14].mxu1 %v7143_v6  ;;  %v7324_v63 = vpack.c.bf16 %v1874_v62, %v1867_v61  ;;  %v7346_v6 = vsub.f32 %v7210_v21, %v1597_v50 }
  0x86   : > { %v9112_v12 = vand.u32 4294901760, %v7346_v6  ;;  %v9176_v45 = vand.u32 4294901760, %v7346_v6 }
  0x88   : > { %v1845_v30 = vsub.f32 %v7346_v6, %v9112_v12 }
  0x8a   : > { %v1846_v37 = vand.u32 4294901760, %v1845_v30 }
 0x137   : > { %v5609_v7 = vpop.f32.mrb[0].mxu0 }
 0x138   : > { %v1413_v8 = vpop.f32.mrb[1].mxu0 }
 0x13b   : > { %v5525_v13 = vpop.f32.mrb[0].mxu1  ;;  %v5612_v14 = vpop.f32.mrb[2].mxu0 }
 0x13c   : > { %v6327_v15 = vadd.f32 %v5525_v13, %v7351_v9  ;;  %v873_v17 = vpop.f32.mrb[1].mxu1  ;;  %v1425_v18 = vpop.f32.mrb[3].mxu0 }
 0x13d   : > { %v6329_v20 = vadd.f32 %v7351_v9, %v873_v17 }
 0x13e   : > { %v6328_v28 = vadd.f32 %v6327_v15, %v5609_v7 }
 0x13f   : > { %v6330_v33 = vadd.f32 %v6329_v20, %v1413_v8  ;;  %v5528_v35 = vpop.f32.mrb[2].mxu1  ;;  %v5615_v4 = vpop.f32.mrb[4].mxu0 }
 0x140   : > { %v1508_v21 = vmax.f32 %v6328_v28, 0.0  ;;  %v6331_v44 = vadd.f32 %v5528_v35, %v7351_v9  ;;  %v887_v50 = vpop.f32.mrb[3].mxu1  ;;  %v1437_v22 = vpop.f32.mrb[5].mxu0 }
 0x141   : > { %v1507_v23 = vmax.f32 %v6330_v33, 0.0  ;;  %v6333_v27 = vadd.f32 %v7351_v9, %v887_v50 }
 0x142   : > { %v1543_v31 = vsel %vm1538_vm1, %v1508_v21, 0  ;;  %v6332_v34 = vadd.f32 %v6331_v44, %v5612_v14  ;;  %v7380_v14 = vpack.c.bf16 %v1846_v37, %v1839_v36 }
 0x143   : > { %v7366_v38 = vand.u32 4294901760, %v1543_v31  ;;  %v1540_v55 = vsel %vm1538_vm1, %v1507_v23, 0  ;;  %v6334_v1 = vadd.f32 %v6333_v27, %v1425_v18  ;;  %v5531_v11 = vpop.f32.mrb[4].mxu1  ;;  %v5618_v16 = vpop.f32.mrb[6].mxu0 }
 0x144   : > { %v7369_v41 = vand.u32 4294901760, %v1540_v55  ;;  %v1510_v47 = vmax.f32 %v6332_v34, 0.0  ;;  %v6335_v48 = vadd.f32 %v5531_v11, %v7351_v9  ;;  %v901_v49 = vpop.f32.mrb[5].mxu1  ;;  %v1449_v59 = vpop.f32.mrb[7].mxu0 }
 0x145   : > { %v7373_v60 = vsub.f32 %v1543_v31, %v7366_v38  ;;  %v1509_v61 = vmax.f32 %v6334_v1, 0.0  ;;  %v6337_v62 = vadd.f32 %v7351_v9, %v901_v49 }
 0x146   : > { %v7377_v7 = vsub.f32 %v1540_v55, %v7369_v41  ;;  %v1549_v8 = vsel %vm1538_vm1, %v1510_v47, 0  ;;  %v6336_v13 = vadd.f32 %v6335_v48, %v5615_v4 }
 0x147   : > { %v9110_v15 = vand.u32 4294901760, %v7373_v60  ;;  %v7383_v17 = vand.u32 4294901760, %v1549_v8  ;;  %v1546_v18 = vsel %vm1538_vm1, %v1509_v61, 0  ;;  %v6338_v20 = vadd.f32 %v6337_v62, %v1437_v22  ;;  %v5534_v28 = vpop.f32.mrb[6].mxu1  ;;  %v5621_v29 = vpop.f32.mrb[8].mxu0 }
 0x148   : > { %v7386_v30 = vand.u32 4294901760, %v1546_v18  ;;  %v1512_v33 = vmax.f32 %v6336_v13, 0.0  ;;  %v6339_v35 = vadd.f32 %v5534_v28, %v7351_v9  ;;  %v915_v21 = vpop.f32.mrb[7].mxu1  ;;  %v1461_v44 = vpop.f32.mrb[9].mxu0  ;;  %v1662_v4 = vand.u32 4294901760, %v7377_v7 }
 0x149   : > { %v1673_v50 = vsub.f32 %v7373_v60, %v9110_v15  ;;  %v7394_v23 = vsub.f32 %v1549_v8, %v7383_v17  ;;  %v1511_v27 = vmax.f32 %v6338_v20, 0.0  ;;  %v6341_v22 = vadd.f32 %v7351_v9, %v915_v21 }
 0x14a   : > { %v7398_v31 = vsub.f32 %v1546_v18, %v7386_v30  ;;  %v1555_v34 = vsel %vm1538_vm1, %v1512_v33, 0  ;;  %v6340_v36 = vadd.f32 %v6339_v35, %v5618_v16  ;;  %v1663_v37 = vsub.f32 %v7377_v7, %v1662_v4 }
 0x14b   : > { %v1674_v55 = vand.u32 4294901760, %v1673_v50  ;;  %v7404_v1 = vand.u32 4294901760, %v1555_v34  ;;  %v1552_v11 = vsel %vm1538_vm1, %v1511_v27, 0  ;;  %v6342_v47 = vadd.f32 %v6341_v22, %v1449_v59  ;;  %v5537_v48 = vpop.f32.mrb[8].mxu1  ;;  %v5624_v49 = vpop.f32.mrb[10].mxu0 }
 0x14c   : > { %v7407_v61 = vand.u32 4294901760, %v1552_v11  ;;  %v1514_v62 = vmax.f32 %v6340_v36, 0.0  ;;  %v6343_v8 = vadd.f32 %v5537_v48, %v7351_v9  ;;  %v929_v13 = vpop.f32.mrb[9].mxu1  ;;  %v1473_v18 = vpop.f32.mrb[11].mxu0  ;;  %v1664_v16 = vand.u32 4294901760, %v1663_v37 }
 0x14d   : > { %v7411_v20 = vsub.f32 %v1555_v34, %v7404_v1  ;;  %v1513_v28 = vmax.f32 %v6342_v47, 0.0  ;;  %v6345_v33 = vadd.f32 %v7351_v9, %v929_v13  ;;  %v9108_v35 = vand.u32 4294901760, %v7398_v31 }
 0x14e   : > { %v7416_v59 = vsub.f32 %v1552_v11, %v7407_v61  ;;  %v1561_v21 = vsel %vm1538_vm1, %v1514_v62, 0  ;;  %v6344_v50 = vadd.f32 %v6343_v8, %v5621_v29  ;;  %5647 = vmatprep.mubr.f32.mxu1 %v1664_v16  ;;  %v9105_v27 = vand.u32 4294901760, %v7394_v23 }
 0x14f   : > { %v7420_v22 = vand.u32 4294901760, %v1561_v21  ;;  %v1558_v36 = vsel %vm1538_vm1, %v1513_v28, 0  ;;  %v6346_v34 = vadd.f32 %v6345_v33, %v1461_v44  ;;  %v5540_v37 = vpop.f32.mrb[10].mxu1  ;;  %v5627_v47 = vpop.f32.mrb[12].mxu0  ;;  %5648 = vmatmul.mubr.f32.vlgmr.msra.gmra.mrb[16].mxu1 %v1674_v55  ;;  %v1683_v48 = vsub.f32 %v7398_v31, %v9108_v35 }
 0x150   : > { %v7426_v11 = vand.u32 4294901760, %v1558_v36  ;;  %v1516_v13 = vmax.f32 %v6344_v50, 0.0  ;;  %v6347_v29 = vadd.f32 %v5540_v37, %v7351_v9  ;;  %6154 = vmatpush3.bf16.msra.mxu1 %v7295_v19  ;;  %v943_v62 = vpop.f32.mrb[11].mxu1  ;;  %v1485_v8 = vpop.f32.mrb[13].mxu0  ;;  %v1693_v44 = vsub.f32 %v7394_v23, %v9105_v27 }
 0x151   : > { %v7434_v16 = vsub.f32 %v1561_v21, %v7420_v22  ;;  %v1515_v55 = vmax.f32 %v6346_v34, 0.0  ;;  %v6349_v28 = vadd.f32 %v7351_v9, %v943_v62  ;;  %v1684_v33 = vand.u32 4294901760, %v1683_v48  ;;  %6156 = vmatprep.subr.bf16.mxu1 %v7380_v14 }
 0x152   : > { %v7439_v50 = vsub.f32 %v1558_v36, %v7426_v11  ;;  %v1567_v19 = vsel %vm1538_vm1, %v1516_v13, 0  ;;  %v6348_v37 = vadd.f32 %v6347_v29, %v5624_v49  ;;  %v1694_v58 = vand.u32 4294901760, %v1693_v44 }
 0x153   : > { %v7442_v57 = vand.u32 4294901760, %v1567_v19  ;;  %v1564_v27 = vsel %vm1538_vm1, %v1515_v55, 0  ;;  %v6350_v40 = vadd.f32 %v6349_v28, %v1473_v18  ;;  %5650 = vmatprep.mubr.f32.mxu1 %v1684_v33  ;;  %v5543_v21 = vpop.f32.mrb[12].mxu1  ;;  %v5630_v34 = vpop.f32.mrb[14].mxu0  ;;  %v9109_v62 = vand.u32 4294901760, %v7416_v59 }
 0x154   : > { %v7446_v48 = vand.u32 4294901760, %v1564_v27  ;;  %v1518_v26 = vmax.f32 %v6348_v37, 0.0  ;;  %v6351_v36 = vadd.f32 %v5543_v21, %v7351_v9  ;;  %5651 = vmatmul.mubr.f32.gmra.mrb[18].mxu1 %v1694_v58  ;;  %v957_v35 = vpop.f32.mrb[13].mxu1  ;;  %v1497_v13 = vpop.f32.mrb[15].mxu0  ;;  %v9111_v49 = vand.u32 4294901760, %v7411_v20 }
 0x155   : > { %v7451_v29 = vsub.f32 %v1567_v19, %v7442_v57  ;;  %v1517_v44 = vmax.f32 %v6350_v40, 0.0  ;;  %v6353_v18 = vadd.f32 %v7351_v9, %v957_v35  ;;  %v1703_v55 = vsub.f32 %v7416_v59, %v9109_v62  ;;  %6158 = vmatpush3.bf16.msra.mxu1 %v7380_v14 }
 0x156   : > { %v7459_v28 = vsub.f32 %v1564_v27, %v7446_v48  ;;  %v1573_v58 = vsel %vm1538_vm1, %v1518_v26, 0  ;;  %v6352_v33 = vadd.f32 %v6351_v36, %v5627_v47  ;;  %v1713_v19 = vsub.f32 %v7411_v20, %v9111_v49  ;;  %6160 = vmatprep.subr.bf16.mxu1 %v7314_v56 }
 0x157   : > { %v7466_v40 = vand.u32 4294901760, %v1573_v58  ;;  %v1570_v35 = vsel %vm1538_vm1, %v1517_v44, 0  ;;  %v6354_v37 = vadd.f32 %v6353_v18, %v1485_v8  ;;  %v1704_v21 = vand.u32 4294901760, %v1703_v55  ;;  %v5546_v62 = vpop.f32.mrb[14].mxu1 }
 0x158   : > { %v7469_v14 = vand.u32 4294901760, %v1570_v35  ;;  %v1520_v27 = vmax.f32 %v6352_v33, 0.0  ;;  %v6355_v15 = vadd.f32 %v5546_v62, %v7351_v9  ;;  %v1714_v26 = vand.u32 4294901760, %v1713_v19  ;;  %v971_v47 = vpop.f32.mrb[15].mxu1 }
 0x159   : > { %v7473_v36 = vsub.f32 %v1573_v58, %v7466_v40  ;;  %v1519_v49 = vmax.f32 %v6354_v37, 0.0  ;;  %5653 = vmatprep.mubr.f32.mxu1 %v1704_v21  ;;  %v6357_v12 = vadd.f32 %v7351_v9, %v971_v47  ;;  %v1722_v10 = vand.u32 4294901760, %v7439_v50  ;;  %6162 = vmatpush3.bf16.msra.mxu1 %v7314_v56 }
 0x15a   : > { %v7479_v8 = vsub.f32 %v1570_v35, %v7469_v14  ;;  %v1579_v44 = vsel %vm1538_vm1, %v1520_v27, 0  ;;  %v6356_v18 = vadd.f32 %v6355_v15, %v5630_v34  ;;  %5654 = vmatmul.mubr.f32.gmra.mrb[20].mxu1 %v1714_v26  ;;  %v9117_v62 = vand.u32 4294901760, %v7434_v16  ;;  %6164 = vmatprep.subr.bf16.mxu1 %v7324_v63 }
 0x15b   : > { %v7484_v55 = vand.u32 4294901760, %v1579_v44  ;;  %v1576_v58 = vsel %vm1538_vm1, %v1519_v49, 0  ;;  %v6358_v9 = vadd.f32 %v6357_v12, %v1497_v13  ;;  %v1723_v56 = vsub.f32 %v7439_v50, %v1722_v10 }
 0x15c   : > { %v7490_v33 = vand.u32 4294901760, %v1576_v58  ;;  %v1522_v19 = vmax.f32 %v6356_v18, 0.0  ;;  %v1733_v15 = vsub.f32 %v7434_v16, %v9117_v62  ;;  %v9114_v34 = vand.u32 4294901760, %v7459_v28 }
 0x15d   : > { %v7497_v35 = vsub.f32 %v1579_v44, %v7484_v55  ;;  %v1521_v37 = vmax.f32 %v6358_v9, 0.0  ;;  %v1724_v21 = vand.u32 4294901760, %v1723_v56  ;;  %v9115_v12 = vand.u32 4294901760, %v7451_v29  ;;  %6166 = vmatpush3.bf16.msra.mxu1 %v7324_v63 }
 0x15e   : > { %v7502_v13 = vsub.f32 %v1576_v58, %v7490_v33  ;;  %v1585_v49 = vsel %vm1538_vm1, %v1522_v19, 0  ;;  %v1734_v27 = vand.u32 4294901760, %v1733_v15  ;;  %v1743_v26 = vsub.f32 %v7459_v28, %v9114_v34  ;;  %6168 = vmatprep.subr.bf16.mxu1 %v7328_v0 }
 0x15f   : > { %v7509_v47 = vand.u32 4294901760, %v1585_v49  ;;  %v1582_v44 = vsel %vm1538_vm1, %v1521_v37, 0  ;;  %5656 = vmatprep.mubr.f32.mxu1 %v1724_v21  ;;  %v1753_v63 = vsub.f32 %v7451_v29, %v9115_v12  ;;  %v9116_v18 = vand.u32 4294901760, %v7479_v8 }
 0x160   : > { %v7516_v58 = vand.u32 4294901760, %v1582_v44  ;;  %5657 = vmatmul.mubr.f32.gmra.mrb[22].mxu1 %v1734_v27  ;;  %v1744_v9 = vand.u32 4294901760, %v1743_v26  ;;  %v9118_v56 = vand.u32 4294901760, %v7473_v36  ;;  %v9119_v19 = vand.u32 4294901760, %v7502_v13 }
 0x161   : > { %v7521_v15 = vsub.f32 %v1585_v49, %v7509_v47  ;;  %v1754_v34 = vand.u32 4294901760, %v1753_v63  ;;  %v1763_v37 = vsub.f32 %v7479_v8, %v9116_v18  ;;  %v1792_v49 = vand.u32 4294901760, %v7497_v35 }
 0x162   : > { %v7527_v21 = vsub.f32 %v1582_v44, %v7516_v58  ;;  %5659 = vmatprep.mubr.f32.mxu1 %v1744_v9  ;;  %v1773_v27 = vsub.f32 %v7473_v36, %v9118_v56  ;;  %v1783_v26 = vsub.f32 %v7502_v13, %v9119_v19 }
 0x163   : > { %v1764_v12 = vand.u32 4294901760, %v1763_v37  ;;  %v1793_v44 = vsub.f32 %v7497_v35, %v1792_v49  ;;  %v1812_v56 = vand.u32 4294901760, %v7521_v15 }
 0x164   : > { %5660 = vmatmul.mubr.f32.gmra.mrb[24].mxu1 %v1754_v34  ;;  %v1802_v63 = vand.u32 4294901760, %v7527_v21  ;;  %v1784_v18 = vand.u32 4294901760, %v1783_v26  ;;  %v1774_v62 = vand.u32 4294901760, %v1773_v27  ;;  %v6171_v27 = vpack.c.bf16 %v7346_v6, %v7341_v5 }
 0x165   : > { %5662 = vmatprep.mubr.f32.mxu1 %v1764_v12  ;;  %v1794_v37 = vand.u32 4294901760, %v1793_v44  ;;  %v1813_v34 = vsub.f32 %v7521_v15, %v1812_v56  ;;  %v9182_v5 = vand.u32 4294901760, %v7416_v59  ;;  %v9183_v6 = vand.u32 4294901760, %v7310_v53 }
 0x166   : > { %v1803_v9 = vsub.f32 %v7527_v21, %v1802_v63  ;;  %v9188_v53 = vand.u32 4294901760, %v7451_v29 }
 0x167   : > { %v1814_v12 = vand.u32 4294901760, %v1813_v34  ;;  %v6199_v34 = vpack.c.bf16 %v1830_v51, %v1823_v46  ;;  %v6203_v46 = vpack.c.bf16 %v9176_v45, %v9175_v43  ;;  %v9177_v51 = vand.u32 4294901760, %v7373_v60 }
 0x168   : > { %5663 = vmatmul.mubr.f32.gmra.mrb[26].mxu1 %v1774_v62  ;;  %v1804_v19 = vand.u32 4294901760, %v1803_v9 }
 0x169   : > { %5665 = vmatprep.mubr.f32.mxu1 %v1784_v18 }
 0x16c   : > { %5666 = vmatmul.mubr.f32.gmra.mrb[28].mxu1 %v1794_v37 }
 0x16d   : > { %5668 = vmatprep.mubr.f32.mxu1 %v1804_v19  ;;  %v7592_v19 = vld [vmem:[%s9100_s6 + $0x18] sm:$0xff] }
 0x16e   : > { %v9120_v44 = vand.u32 4294901760, %v7592_v19  ;;  %v9193_v43 = vand.u32 4294901760, %v7592_v19 }
 0x170   : > { %5669 = vmatmul.mubr.f32.gmra.mrb[30].mxu1 %v1814_v12  ;;  %v9178_v12 = vand.u32 4294901760, %v7398_v31  ;;  %v7811_v45 = vsub.f32 %v7592_v19, %v9193_v43 }
 0x171   : > { %5687 = vmatprep.mubr.f32.mxu1 %v7369_v41 }
 0x174   : > { %5688 = vmatmul.mubr.f32.vlgmr.msra.gmra.mrb[16].mxu1 %v7366_v38 }
 0x175   : > { %6170 = vmatpush3.bf16.msra.mxu1 %v7328_v0  ;;  %5690 = vmatprep.mubr.f32.mxu1 %v7386_v30  ;;  %v7574_v0 = vld [vmem:[%s9100_s6] sm:$0xff] }
 0x176   : > { %6172 = vmatprep.subr.bf16.mxu1 %v6171_v27  ;;  %v2849_v62 = vand.u32 4294901760, %v7574_v0 }
 0x178   : > { %5691 = vmatmul.mubr.f32.gmra.mrb[18].mxu1 %v7383_v17 }
 0x179   : > { %5693 = vmatprep.mubr.f32.mxu1 %v7407_v61  ;;  %6174 = vmatpush3.bf16.msra.mxu1 %v6171_v27  ;;  %v9179_v27 = vand.u32 4294901760, %v7298_v24  ;;  %v9186_v24 = vand.u32 4294901760, %v7434_v16 }
 0x17a   : > { %6176 = vmatprep.subr.bf16.mxu1 %v7332_v2 }
 0x17c   : > { %5694 = vmatmul.mubr.f32.gmra.mrb[20].mxu1 %v7404_v1 }
 0x17d   : > { %5696 = vmatprep.mubr.f32.mxu1 %v7426_v11  ;;  %6178 = vmatpush3.bf16.msra.mxu1 %v7332_v2  ;;  %v7579_v2 = vld [vmem:[%s9100_s6 + $0x8] sm:$0xff] }
 0x17e   : > { %6180 = vmatprep.subr.bf16.mxu1 %v7336_v3  ;;  %v2852_v18 = vand.u32 4294901760, %v7579_v2 }
 0x180   : > { %5697 = vmatmul.mubr.f32.gmra.mrb[22].mxu1 %v7420_v22  ;;  %v7600_v9 = vpack.c.bf16 %v2852_v18, %v2849_v62 }
 0x181   : > { %5699 = vmatprep.mubr.f32.mxu1 %v7446_v48  ;;  %6182 = vmatpush3.bf16.msra.mxu1 %v7336_v3  ;;  %v7584_v3 = vld [vmem:[%s9100_s6 + $0x10] sm:$0xff] }
 0x182   : > { %6184 = vmatprep.subr.bf16.mxu1 %v7172_v39  ;;  %v9121_v26 = vand.u32 4294901760, %v7584_v3  ;;  %6232 = vmatprep.subr.bf16.mxu0 %v7600_v9 }
 0x183   : > { %6234 = vmatpush3.bf16.msra.mxu0 %v7600_v9 }
 0x184   : > { %5700 = vmatmul.mubr.f32.gmra.mrb[24].mxu1 %v7442_v57  ;;  %v7607_v37 = vpack.c.bf16 %v9120_v44, %v9121_v26  ;;  %v9180_v44 = vand.u32 4294901760, %v7300_v25  ;;  %v9187_v25 = vand.u32 4294901760, %v7459_v28 }
 0x185   : > { %5702 = vmatprep.mubr.f32.mxu1 %v7469_v14 }
 0x186   : > { %6236 = vmatprep.subr.bf16.mxu0 %v7607_v37  ;;  %v6207_v26 = vpack.c.bf16 %v9180_v44, %v9179_v27  ;;  %v9192_v44 = vand.u32 4294901760, %v7584_v3 }
 0x187   : > { %6238 = vmatpush3.bf16.msra.mxu0 %v7607_v37 }
 0x188   : > { %5703 = vmatmul.mubr.f32.gmra.mrb[26].mxu1 %v7466_v40 }
 0x189   : > { %5705 = vmatprep.mubr.f32.mxu1 %v7490_v33 }
 0x18c   : > { %5706 = vmatmul.mubr.f32.gmra.mrb[28].mxu1 %v7484_v55 }
 0x18d   : > { %5708 = vmatprep.mubr.f32.mxu1 %v7516_v58 }
 0x190   : > { %5709 = vmatmul.mubr.f32.gmra.mrb[30].mxu1 %v7509_v47 }
 0x191   : > { %5727 = vmatprep.mubr.f32.mxu1 %v7377_v7  ;;  %v9181_v7 = vand.u32 4294901760, %v7394_v23 }
 0x194   : > { %5728 = vmatmul.mubr.f32.vlgmr.msra.gmra.mrb[16].mxu1 %v7373_v60  ;;  %v9184_v60 = vand.u32 4294901760, %v7312_v54  ;;  %v9189_v54 = vand.u32 4294901760, %v7479_v8 }
 0x195   : > { %6186 = vmatpush3.bf16.msra.mxu1 %v7172_v39  ;;  %5730 = vmatprep.mubr.f32.mxu1 %v7398_v31  ;;  %v9185_v31 = vand.u32 4294901760, %v7411_v20 }
 0x196   : > { %6188 = vmatprep.subr.bf16.mxu1 %v7224_v52 }
 0x198   : > { %5731 = vmatmul.mubr.f32.gmra.mrb[18].mxu1 %v7394_v23  ;;  %v9190_v23 = vand.u32 4294901760, %v7473_v36 }
 0x199   : > { %5733 = vmatprep.mubr.f32.mxu1 %v7416_v59  ;;  %6190 = vmatpush3.bf16.msra.mxu1 %v7224_v52 }
 0x19a   : > { %6192 = vmatprep.subr.bf16.mxu1 %v7263_v32 }
 0x19c   : > { %5734 = vmatmul.mubr.f32.gmra.mrb[20].mxu1 %v7411_v20  ;;  %v7750_v20 = vsub.f32 %v7579_v2, %v2852_v18 }
 0x19d   : > { %5736 = vmatprep.mubr.f32.mxu1 %v7439_v50  ;;  %6194 = vmatpush3.bf16.msra.mxu1 %v7263_v32 }
 0x19e   : > { %6196 = vmatprep.subr.bf16.mxu1 %v7273_v42 }
 0x1a0   : > { %5737 = vmatmul.mubr.f32.gmra.mrb[22].mxu1 %v7434_v16 }
 0x1a1   : > { %5739 = vmatprep.mubr.f32.mxu1 %v7459_v28  ;;  %6198 = vmatpush3.bf16.msra.mxu1 %v7273_v42 }
 0x1a2   : > { %6200 = vmatprep.subr.bf16.mxu1 %v6199_v34 }
 0x1a4   : > { %5740 = vmatmul.mubr.f32.gmra.mrb[24].mxu1 %v7451_v29 }
 0x1a5   : > { %5742 = vmatprep.mubr.f32.mxu1 %v7479_v8 }
 0x1a8   : > { %5743 = vmatmul.mubr.f32.gmra.mrb[26].mxu1 %v7473_v36 }
 0x1a9   : > { %5745 = vmatprep.mubr.f32.mxu1 %v7502_v13 }
 0x1ac   : > { %5746 = vmatmul.mubr.f32.gmra.mrb[28].mxu1 %v7497_v35 }
 0x1ad   : > { %5748 = vmatprep.mubr.f32.mxu1 %v7527_v21 }
 0x1b0   : > { %5749 = vmatmul.mubr.f32.gmra.mrb[30].mxu1 %v7521_v15 }
 0x1b1   : > { %5767 = vmatprep.mubr.f32.mxu1 %v1662_v4  ;;  %v6211_v4 = vpack.c.bf16 %v9184_v60, %v9183_v6 }
 0x1b4   : > { %5768 = vmatmul.mubr.f32.vlgmr.msra.gmra.mrb[16].mxu1 %v9177_v51 }
 0x1b5   : > { %6202 = vmatpush3.bf16.msra.mxu1 %v6199_v34  ;;  %5770 = vmatprep.mubr.f32.mxu1 %v9178_v12  ;;  %v7806_v34 = vsub.f32 %v7584_v3, %v9192_v44 }
 0x1b6   : > { %6204 = vmatprep.subr.bf16.mxu1 %v6203_v46 }
 0x1b7   : > { %v3098_v12 = vand.u32 4294901760, %v7806_v34 }
 0x1b8   : > { %5771 = vmatmul.mubr.f32.gmra.mrb[18].mxu1 %v9181_v7 }
 0x1b9   : > { %5773 = vmatprep.mubr.f32.mxu1 %v9182_v5  ;;  %6206 = vmatpush3.bf16.msra.mxu1 %v6203_v46  ;;  %v7816_v46 = vld [vmem:[%s9099_s5] ss:$0 sm:$0xff]  ;;  %v3105_v5 = vand.u32 4294901760, %v7811_v45  ;;  %v3099_v19 = vsub.f32 %v7806_v34, %v3098_v12 }
 0x1ba   : > { %6208 = vmatprep.subr.bf16.mxu1 %v6207_v26 }
 0x1bc   : > { %5774 = vmatmul.mubr.f32.gmra.mrb[20].mxu1 %v9185_v31 }
 0x1bd   : > { %5776 = vmatprep.mubr.f32.mxu1 %v1722_v10  ;;  %6210 = vmatpush3.bf16.msra.mxu1 %v6207_v26  ;;  %v9191_v10 = vand.u32 4294901760, %v7502_v13 }
 0x1be   : > { %6212 = vmatprep.subr.bf16.mxu1 %v6211_v4 }
 0x1c0   : > { %5777 = vmatmul.mubr.f32.gmra.mrb[22].mxu1 %v9186_v24 }
 0x1c1   : > { %5779 = vmatprep.mubr.f32.mxu1 %v9187_v25  ;;  %6214 = vmatpush3.bf16.msra.mxu1 %v6211_v4 }
 0x1c2   : > { %6216 = vmatprep.subr.bf16.mxu1 %v7172_v39 }
 0x1c4   : > { %5780 = vmatmul.mubr.f32.gmra.mrb[24].mxu1 %v9188_v53  ;;  %v3106_v53 = vsub.f32 %v7811_v45, %v3105_v5 }
 0x1c5   : > { %5782 = vmatprep.mubr.f32.mxu1 %v9189_v54 }
 0x1c8   : > { %5783 = vmatmul.mubr.f32.gmra.mrb[26].mxu1 %v9190_v23 }
 0x1c9   : > { %5785 = vmatprep.mubr.f32.mxu1 %v9191_v10 }
 0x1cc   : > { %5786 = vmatmul.mubr.f32.gmra.mrb[28].mxu1 %v1792_v49 }
 0x1cd   : > { %5788 = vmatprep.mubr.f32.mxu1 %v1802_v63 }
 0x1d0   : > { %5789 = vmatmul.mubr.f32.gmra.mrb[30].mxu1 %v1812_v56 }
 0x1d1   : > { %5807 = vmatprep.mubr.f32.mxu1 %v7369_v41 }
 0x1d4   : > { %5808 = vmatmul.mubr.f32.vlgmr.msra.gmra.mrb[16].mxu1 %v7366_v38 }
 0x1d5   : > { %6218 = vmatpush3.bf16.msra.mxu1 %v7172_v39  ;;  %5810 = vmatprep.mubr.f32.mxu1 %v7386_v30  ;;  %v2789_v39 = vld [vmem:[%s9100_s6 + $0x20] sm:$0xff] }
 0x1d6   : > { %6220 = vmatprep.subr.bf16.mxu1 %v7224_v52 }
 0x1d8   : > { %5811 = vmatmul.mubr.f32.gmra.mrb[18].mxu1 %v7383_v17 }
 0x1d9   : > { %5813 = vmatprep.mubr.f32.mxu1 %v7407_v61  ;;  %6222 = vmatpush3.bf16.msra.mxu1 %v7224_v52  ;;  %v2790_v52 = vld [vmem:[%s9100_s6 + $0x28] sm:$0xff] }
 0x1da   : > { %6224 = vmatprep.subr.bf16.mxu1 %v7263_v32 }
 0x1dc   : > { %5814 = vmatmul.mubr.f32.gmra.mrb[20].mxu1 %v7404_v1 }
 0x1dd   : > { %5816 = vmatprep.mubr.f32.mxu1 %v7426_v11  ;;  %6226 = vmatpush3.bf16.msra.mxu1 %v7263_v32  ;;  %v2861_v32 = vand.u32 4294901760, %v2789_v39 }
 0x1de   : > { %6228 = vmatprep.subr.bf16.mxu1 %v7273_v42 }
 0x1df   : > { %v7762_v28 = vsub.f32 %v2789_v39, %v2861_v32 }
 0x1e0   : > { %5817 = vmatmul.mubr.f32.gmra.mrb[22].mxu1 %v7420_v22 }
 0x1e1   : > { %5819 = vmatprep.mubr.f32.mxu1 %v7446_v48  ;;  %6230 = vmatpush3.bf16.msra.mxu1 %v7273_v42  ;;  %v2864_v42 = vand.u32 4294901760, %v2790_v52 }
 0x1e4   : > { %5820 = vmatmul.mubr.f32.gmra.mrb[24].mxu1 %v7442_v57 }
 0x1e5   : > { %5822 = vmatprep.mubr.f32.mxu1 %v7469_v14 }
 0x1e8   : > { %5823 = vmatmul.mubr.f32.gmra.mrb[26].mxu1 %v7466_v40 }
 0x1e9   : > { %5825 = vmatprep.mubr.f32.mxu1 %v7490_v33 }
 0x1ec   : > { %5826 = vmatmul.mubr.f32.gmra.mrb[28].mxu1 %v7484_v55 }
 0x1ed   : > { %5828 = vmatprep.mubr.f32.mxu1 %v7516_v58 }
 0x1f0   : > { %5829 = vmatmul.mubr.f32.gmra.mrb[30].mxu1 %v7509_v47 }
 0x1f1   : > { %5847 = vmatprep.mubr.f32.mxu1 %v7369_v41  ;;  %v2792_v41 = vld [vmem:[%s9100_s6 + $0x38] sm:$0xff] }
 0x1f4   : > { %5848 = vmatmul.mubr.f32.vlgmr.msra.gmra.mrb[16].mxu1 %v7366_v38  ;;  %v2791_v38 = vld [vmem:[%s9100_s6 + $0x30] sm:$0xff] }
 0x1f5   : > { %5850 = vmatprep.mubr.f32.mxu1 %v7386_v30  ;;  %v2870_v30 = vand.u32 4294901760, %v2792_v41 }
 0x1f7   : > { %v7777_v35 = vsub.f32 %v2792_v41, %v2870_v30  ;;  %v3100_v41 = vand.u32 4294901760, %v3099_v19 }
 0x1f8   : > { %5851 = vmatmul.mubr.f32.gmra.mrb[18].mxu1 %v7383_v17  ;;  %v2867_v17 = vand.u32 4294901760, %v2791_v38 }
 0x1f9   : > { %5853 = vmatprep.mubr.f32.mxu1 %v7407_v61  ;;  %v7745_v61 = vsub.f32 %v7574_v0, %v2849_v62  ;;  %v9122_v56 = vand.u32 4294901760, %v7777_v35 }
 0x1fb   : > { %v3084_v59 = vand.u32 4294901760, %v7745_v61  ;;  %v3134_v49 = vsub.f32 %v7777_v35, %v9122_v56  ;;  %v7793_v62 = vpack.c.bf16 %v7750_v20, %v7745_v61 }
 0x1fc   : > { %5854 = vmatmul.mubr.f32.gmra.mrb[20].mxu1 %v7404_v1  ;;  %v7738_v1 = vpack.c.bf16 %v2870_v30, %v2867_v17 }
 0x1fd   : > { %5856 = vmatprep.mubr.f32.mxu1 %v7426_v11  ;;  %v3085_v11 = vsub.f32 %v7745_v61, %v3084_v59  ;;  %v3135_v0 = vand.u32 4294901760, %v3134_v49  ;;  %v8110_v61 = vld [vmem:[%s8037_s18 + $0x50] sm:$0xff] }
 0x1ff   : > { %v3086_v50 = vand.u32 4294901760, %v3085_v11 }
 0x200   : > { %5857 = vmatmul.mubr.f32.gmra.mrb[22].mxu1 %v7420_v22  ;;  %v3091_v22 = vand.u32 4294901760, %v7750_v20 }
 0x201   : > { %5859 = vmatprep.mubr.f32.mxu1 %v7446_v48 }
 0x202   : > { %v3092_v16 = vsub.f32 %v7750_v20, %v3091_v22  ;;  %v8114_v20 = vld [vmem:[%s8037_s18 + $0x58] sm:$0xff] }
 0x204   : > { %5860 = vmatmul.mubr.f32.gmra.mrb[24].mxu1 %v7442_v57  ;;  %v7728_v57 = vpack.c.bf16 %v2864_v42, %v2861_v32  ;;  %v3093_v48 = vand.u32 4294901760, %v3092_v16 }
 0x205   : > { %5862 = vmatprep.mubr.f32.mxu1 %v7469_v14  ;;  %v9130_v14 = vand.u32 4294901760, %v7762_v28 }
 0x206   : > { %6240 = vmatprep.subr.bf16.mxu0 %v7728_v57  ;;  %v7760_v29 = vpack.c.bf16 %v3093_v48, %v3086_v50  ;;  %v3107_v50 = vand.u32 4294901760, %v3106_v53 }
 0x207   : > { %6242 = vmatpush3.bf16.msra.mxu0 %v7728_v57  ;;  %v3113_v8 = vsub.f32 %v7762_v28, %v9130_v14 }
 0x208   : > { %5863 = vmatmul.mubr.f32.gmra.mrb[26].mxu1 %v7466_v40  ;;  %6244 = vmatprep.subr.bf16.mxu0 %v7738_v1  ;;  %v7764_v40 = vsub.f32 %v2790_v52, %v2864_v42 }
 0x209   : > { %5865 = vmatprep.mubr.f32.mxu1 %v7490_v33  ;;  %v7775_v33 = vsub.f32 %v2791_v38, %v2867_v17  ;;  %v3114_v13 = vand.u32 4294901760, %v3113_v8 }
 0x20a   : > { %v9128_v36 = vand.u32 4294901760, %v7764_v40  ;;  %v7797_v18 = vpack.c.bf16 %v7764_v40, %v7762_v28 }
 0x20b   : > { %6246 = vmatpush3.bf16.msra.mxu0 %v7738_v1  ;;  %v7801_v26 = vpack.c.bf16 %v7777_v35, %v7775_v33 }
 0x20c   : > { %5866 = vmatmul.mubr.f32.gmra.mrb[28].mxu1 %v7484_v55  ;;  %6248 = vmatprep.subr.bf16.mxu0 %v7760_v29  ;;  %v3120_v55 = vsub.f32 %v7764_v40, %v9128_v36 }
 0x20d   : > { %5868 = vmatprep.mubr.f32.mxu1 %v7516_v58  ;;  %v9123_v58 = vand.u32 4294901760, %v7775_v33 }
 0x20f   : > { %v3127_v21 = vsub.f32 %v7775_v33, %v9123_v58 }
 0x210   : > { %5869 = vmatmul.mubr.f32.gmra.mrb[30].mxu1 %v7509_v47  ;;  %v3121_v47 = vand.u32 4294901760, %v3120_v55 }
 0x211   : > { %v3128_v63 = vand.u32 4294901760, %v3127_v21 }
 0x212   : > { %v7781_v15 = vpack.c.bf16 %v3121_v47, %v3114_v13 }
 0x213   : > { %v7789_v2 = vpack.c.bf16 %v3135_v0, %v3128_v63 }
 0x2c7   : > { %v5849_v51 = vpop.f32.mrb[16].mxu1 }
 0x2c8   : > { %v6359_v27 = vadd.f32 %v5849_v51, %v7816_v46  ;;  %v2675_v7 = vpop.f32.mrb[17].mxu1 }
 0x2c9   : > { %v6360_v3 = vadd.f32 %v7816_v46, %v2675_v7 }
 0x2ca   : > { %v2770_v6 = vmax.f32 %v6359_v27, 0.0 }
 0x2cb   : > { %v2769_v60 = vmax.f32 %v6360_v3, 0.0  ;;  %v5852_v4 = vpop.f32.mrb[18].mxu1 }
 0x2cc   : > { %v2804_v31 = vsel %vm1538_vm1, %v2770_v6, 0  ;;  %v6361_v24 = vadd.f32 %v5852_v4, %v7816_v46  ;;  %v2687_v25 = vpop.f32.mrb[19].mxu1 }
 0x2cd   : > { %v7830_v54 = vand.u32 4294901760, %v2804_v31  ;;  %v2801_v23 = vsel %vm1538_vm1, %v2769_v60, 0  ;;  %v6362_v10 = vadd.f32 %v7816_v46, %v2687_v25 }
 0x2ce   : > { %v7834_v39 = vand.u32 4294901760, %v2801_v23  ;;  %v2772_v52 = vmax.f32 %v6361_v24, 0.0 }
 0x2cf   : > { %v7837_v32 = vsub.f32 %v2804_v31, %v7830_v54  ;;  %v2771_v42 = vmax.f32 %v6362_v10, 0.0  ;;  %v5855_v38 = vpop.f32.mrb[20].mxu1  ;;  %v6251_v31 = vpack.c.bf16 %v3107_v50, %v3100_v41 }
 0x2d0   : > { %v7840_v17 = vsub.f32 %v2801_v23, %v7834_v39  ;;  %v2810_v30 = vsel %vm1538_vm1, %v2772_v52, 0  ;;  %v6363_v11 = vadd.f32 %v5855_v38, %v7816_v46  ;;  %v2699_v16 = vpop.f32.mrb[21].mxu1 }
 0x2d1   : > { %v9136_v48 = vand.u32 4294901760, %v7837_v32  ;;  %v7845_v8 = vand.u32 4294901760, %v2810_v30  ;;  %v2807_v55 = vsel %vm1538_vm1, %v2771_v42, 0  ;;  %v6364_v13 = vadd.f32 %v7816_v46, %v2699_v16 }
 0x2d2   : > { %v7849_v47 = vand.u32 4294901760, %v2807_v55  ;;  %v2774_v21 = vmax.f32 %v6363_v11, 0.0  ;;  %v2923_v49 = vand.u32 4294901760, %v7840_v17 }
 0x2d3   : > { %v2934_v63 = vsub.f32 %v7837_v32, %v9136_v48  ;;  %v7856_v0 = vsub.f32 %v2810_v30, %v7845_v8  ;;  %v2773_v44 = vmax.f32 %v6364_v13, 0.0  ;;  %v5858_v43 = vpop.f32.mrb[22].mxu1 }
 0x2d4   : > { %v7859_v51 = vsub.f32 %v2807_v55, %v7849_v47  ;;  %v2816_v27 = vsel %vm1538_vm1, %v2774_v21, 0  ;;  %v6365_v7 = vadd.f32 %v5858_v43, %v7816_v46  ;;  %v2711_v3 = vpop.f32.mrb[23].mxu1  ;;  %v2924_v6 = vsub.f32 %v7840_v17, %v2923_v49 }
 0x2d5   : > { %v7866_v60 = vand.u32 4294901760, %v2816_v27  ;;  %v2813_v4 = vsel %vm1538_vm1, %v2773_v44, 0  ;;  %v6366_v19 = vadd.f32 %v7816_v46, %v2711_v3  ;;  %v2935_v10 = vand.u32 4294901760, %v2934_v63 }
 0x2d6   : > { %v7870_v24 = vand.u32 4294901760, %v2813_v4  ;;  %v2776_v25 = vmax.f32 %v6365_v7, 0.0  ;;  %v2925_v53 = vand.u32 4294901760, %v2924_v6  ;;  %v9132_v23 = vand.u32 4294901760, %v7859_v51 }
 0x2d7   : > { %v7874_v52 = vsub.f32 %v2816_v27, %v7866_v60  ;;  %v2775_v42 = vmax.f32 %v6366_v19, 0.0  ;;  %v5861_v38 = vpop.f32.mrb[24].mxu1  ;;  %v9127_v30 = vand.u32 4294901760, %v7856_v0 }
 0x2d8   : > { %v7878_v11 = vsub.f32 %v2813_v4, %v7870_v24  ;;  %v2822_v16 = vsel %vm1538_vm1, %v2776_v25, 0  ;;  %v6367_v41 = vadd.f32 %v5861_v38, %v7816_v46  ;;  %v2723_v50 = vpop.f32.mrb[25].mxu1  ;;  %5887 = vmatprep.mubr.f32.mxu0 %v2925_v53  ;;  %v2944_v55 = vsub.f32 %v7859_v51, %v9132_v23 }
 0x2d9   : > { %v7885_v13 = vand.u32 4294901760, %v2822_v16  ;;  %v2819_v21 = vsel %vm1538_vm1, %v2775_v42, 0  ;;  %v6368_v63 = vadd.f32 %v7816_v46, %v2723_v50  ;;  %5888 = vmatmul.mubr.f32.vlgmr.msra.gmra.mrb[16].mxu0 %v2935_v10  ;;  %v2954_v44 = vsub.f32 %v7856_v0, %v9127_v30 }
 0x2da   : > { %v7892_v43 = vand.u32 4294901760, %v2819_v21  ;;  %v2778_v27 = vmax.f32 %v6367_v41, 0.0  ;;  %6250 = vmatpush3.bf16.msra.mxu0 %v7760_v29  ;;  %v2945_v7 = vand.u32 4294901760, %v2944_v55  ;;  %v9125_v3 = vand.u32 4294901760, %v7878_v11 }
 0x2db   : > { %v7897_v6 = vsub.f32 %v2822_v16, %v7885_v13  ;;  %v2777_v4 = vmax.f32 %v6368_v63, 0.0  ;;  %v5864_v19 = vpop.f32.mrb[26].mxu1  ;;  %v2955_v25 = vand.u32 4294901760, %v2954_v44  ;;  %6252 = vmatprep.subr.bf16.mxu0 %v6251_v31  ;;  %v9124_v53 = vand.u32 4294901760, %v7874_v52 }
 0x2dc   : > { %v7901_v10 = vsub.f32 %v2819_v21, %v7892_v43  ;;  %v2828_v42 = vsel %vm1538_vm1, %v2778_v27, 0  ;;  %v6369_v38 = vadd.f32 %v5864_v19, %v7816_v46  ;;  %v2735_v29 = vpop.f32.mrb[27].mxu1  ;;  %5890 = vmatprep.mubr.f32.mxu0 %v2945_v7  ;;  %v2964_v16 = vsub.f32 %v7878_v11, %v9125_v3 }
 0x2dd   : > { %v7908_v41 = vand.u32 4294901760, %v2828_v42  ;;  %v2825_v50 = vsel %vm1538_vm1, %v2777_v4, 0  ;;  %v6370_v55 = vadd.f32 %v7816_v46, %v2735_v29  ;;  %5891 = vmatmul.mubr.f32.gmra.mrb[18].mxu0 %v2955_v25  ;;  %v2974_v21 = vsub.f32 %v7874_v52, %v9124_v53 }
 0x2de   : > { %v7915_v63 = vand.u32 4294901760, %v2825_v50  ;;  %v2780_v44 = vmax.f32 %v6369_v38, 0.0  ;;  %v2965_v27 = vand.u32 4294901760, %v2964_v16  ;;  %6254 = vmatpush3.bf16.msra.mxu0 %v6251_v31  ;;  %v9126_v7 = vand.u32 4294901760, %v7901_v10 }
 0x2df   : > { %v7919_v19 = vsub.f32 %v2828_v42, %v7908_v41  ;;  %v2779_v56 = vmax.f32 %v6370_v55, 0.0  ;;  %v5867_v58 = vpop.f32.mrb[28].mxu1  ;;  %v2975_v4 = vand.u32 4294901760, %v2974_v21  ;;  %v9129_v29 = vand.u32 4294901760, %v7897_v6  ;;  %6256 = vmatprep.subr.bf16.mxu0 %v7781_v15 }
 0x2e0   : > { %v7924_v25 = vsub.f32 %v2825_v50, %v7915_v63  ;;  %v2834_v53 = vsel %vm1538_vm1, %v2780_v44, 0  ;;  %v6371_v38 = vadd.f32 %v5867_v58, %v7816_v46  ;;  %v2747_v31 = vpop.f32.mrb[29].mxu1  ;;  %5893 = vmatprep.mubr.f32.mxu0 %v2965_v27  ;;  %v2984_v42 = vsub.f32 %v7901_v10, %v9126_v7 }
 0x2e1   : > { %v7931_v16 = vand.u32 4294901760, %v2834_v53  ;;  %v2831_v55 = vsel %vm1538_vm1, %v2779_v56, 0  ;;  %v6372_v21 = vadd.f32 %v7816_v46, %v2747_v31  ;;  %5894 = vmatmul.mubr.f32.gmra.mrb[20].mxu0 %v2975_v4  ;;  %v2994_v50 = vsub.f32 %v7897_v6, %v9129_v29 }
 0x2e2   : > { %v7938_v44 = vand.u32 4294901760, %v2831_v55  ;;  %v2782_v58 = vmax.f32 %v6371_v38, 0.0  ;;  %v2985_v3 = vand.u32 4294901760, %v2984_v42  ;;  %v9131_v27 = vand.u32 4294901760, %v7924_v25  ;;  %6258 = vmatpush3.bf16.msra.mxu0 %v7781_v15 }
 0x2e3   : > { %v7943_v7 = vsub.f32 %v2834_v53, %v7931_v16  ;;  %v2781_v30 = vmax.f32 %v6372_v21, 0.0  ;;  %v5870_v56 = vpop.f32.mrb[30].mxu1  ;;  %v2995_v36 = vand.u32 4294901760, %v2994_v50  ;;  %v9135_v4 = vand.u32 4294901760, %v7919_v19  ;;  %6260 = vmatprep.subr.bf16.mxu0 %v7789_v2 }
 0x2e4   : > { %v7948_v31 = vsub.f32 %v2831_v55, %v7938_v44  ;;  %v2840_v38 = vsel %vm1538_vm1, %v2782_v58, 0  ;;  %v6373_v42 = vadd.f32 %v5870_v56, %v7816_v46  ;;  %v2759_v29 = vpop.f32.mrb[31].mxu1  ;;  %5896 = vmatprep.mubr.f32.mxu0 %v2985_v3  ;;  %v3004_v15 = vsub.f32 %v7924_v25, %v9131_v27 }
 0x2e5   : > { %v7955_v53 = vand.u32 4294901760, %v2840_v38  ;;  %v2837_v21 = vsel %vm1538_vm1, %v2781_v30, 0  ;;  %v6374_v50 = vadd.f32 %v7816_v46, %v2759_v29  ;;  %5897 = vmatmul.mubr.f32.gmra.mrb[22].mxu0 %v2995_v36  ;;  %v3014_v55 = vsub.f32 %v7919_v19, %v9135_v4 }
 0x2e6   : > { %v7962_v58 = vand.u32 4294901760, %v2837_v21  ;;  %v2784_v56 = vmax.f32 %v6373_v42, 0.0  ;;  %v3005_v14 = vand.u32 4294901760, %v3004_v15  ;;  %v9133_v3 = vand.u32 4294901760, %v7948_v31  ;;  %6262 = vmatpush3.bf16.msra.mxu0 %v7789_v2 }
 0x2e7   : > { %v7967_v27 = vsub.f32 %v2840_v38, %v7955_v53  ;;  %v2783_v23 = vmax.f32 %v6374_v50, 0.0  ;;  %v3015_v30 = vand.u32 4294901760, %v3014_v55  ;;  %v9134_v46 = vand.u32 4294901760, %v7943_v7  ;;  %6264 = vmatprep.subr.bf16.mxu0 %v7793_v62 }
 0x2e8   : > { %v7972_v36 = vsub.f32 %v2837_v21, %v7962_v58  ;;  %v2846_v29 = vsel %vm1538_vm1, %v2784_v56, 0  ;;  %5899 = vmatprep.mubr.f32.mxu0 %v3005_v14  ;;  %v3024_v42 = vsub.f32 %v7948_v31, %v9133_v3 }
 0x2e9   : > { %v7978_v2 = vand.u32 4294901760, %v2846_v29  ;;  %v2843_v38 = vsel %vm1538_vm1, %v2783_v23, 0  ;;  %5900 = vmatmul.mubr.f32.gmra.mrb[24].mxu0 %v3015_v30  ;;  %v3034_v15 = vsub.f32 %v7943_v7, %v9134_v46  ;;  %v9137_v50 = vand.u32 4294901760, %v7967_v27 }
 0x2ea   : > { %v7985_v21 = vand.u32 4294901760, %v2843_v38  ;;  %v3025_v55 = vand.u32 4294901760, %v3024_v42  ;;  %v9140_v14 = vand.u32 4294901760, %v7972_v36 }
 0x2eb   : > { %v7989_v56 = vsub.f32 %v2846_v29, %v7978_v2  ;;  %v3035_v3 = vand.u32 4294901760, %v3034_v15  ;;  %v3054_v23 = vsub.f32 %v7967_v27, %v9137_v50 }
 0x2ec   : > { %v7995_v30 = vsub.f32 %v2843_v38, %v7985_v21  ;;  %5902 = vmatprep.mubr.f32.mxu0 %v3025_v55  ;;  %v3044_v46 = vsub.f32 %v7972_v36, %v9140_v14  ;;  %v9198_v14 = vand.u32 4294901760, %v7837_v32 }
 0x2ed   : > { %5903 = vmatmul.mubr.f32.gmra.mrb[26].mxu0 %v3035_v3  ;;  %v9138_v42 = vand.u32 4294901760, %v7989_v56  ;;  %v3055_v48 = vand.u32 4294901760, %v3054_v23  ;;  %v6267_v3 = vpack.c.bf16 %v7811_v45, %v7806_v34  ;;  %v8083_v23 = vld [vmem:[%s8037_s18 + $0x38] sm:$0xff]  ;;  %v9203_v34 = vand.u32 4294901760, %v7878_v11 }
 0x2ee   : > { %v3045_v4 = vand.u32 4294901760, %v3044_v46  ;;  %v9139_v29 = vand.u32 4294901760, %v7995_v30  ;;  %v8069_v46 = vld [vmem:[%s8037_s18 + $0x28] sm:$0xff]  ;;  %v9204_v45 = vand.u32 4294901760, %v7775_v33  ;;  %v9210_v33 = vand.u32 4294901760, %v7919_v19 }
 0x2ef   : > { %v3074_v15 = vsub.f32 %v7989_v56, %v9138_v42  ;;  %v8138_v42 = vld [vmem:[%s8037_s18 + $0x78] sm:$0xff] }
 0x2f0   : > { %5905 = vmatprep.mubr.f32.mxu0 %v3045_v4  ;;  %v3064_v38 = vsub.f32 %v7995_v30, %v9139_v29  ;;  %v8065_v4 = vld [vmem:[%s8037_s18 + $0x20] sm:$0xff]  ;;  %9197 = vst [vmem:[#allocation8_spill] sm:$0xff] %v8138_v42  ;;  %v6299_v29 = vpack.c.bf16 %v3105_v5, %v3098_v12  ;;  %v9205_v12 = vand.u32 4294901760, %v7777_v35  ;;  %v9211_v35 = vand.u32 4294901760, %v7948_v31 }
 0x2f1   : > { %5906 = vmatmul.mubr.f32.gmra.mrb[28].mxu0 %v3055_v48  ;;  %v3075_v50 = vand.u32 4294901760, %v3074_v15  ;;  %v8055_v48 = vld [vmem:[%s8037_s18 + $0x18] sm:$0xff]  ;;  %v6295_v15 = vpack.c.bf16 %v3091_v22, %v3084_v59  ;;  %v8122_v59 = vld [vmem:[%s8037_s18 + $0x60] sm:$0xff]  ;;  %v8126_v22 = vld [vmem:[%s8037_s18 + $0x68] sm:$0xff] }
 0x2f2   : > { %v3065_v55 = vand.u32 4294901760, %v3064_v38  ;;  %v8097_v38 = vld [vmem:[%s8037_s18 + $0x40] sm:$0xff]  ;;  %9194 = vst [vmem:[#allocation5_spill] sm:$0xff] %v8122_v59  ;;  %9195 = vst [vmem:[#allocation6_spill] sm:$0xff] %v8126_v22  ;;  %v6307_v5 = vpack.c.bf16 %v9205_v12, %v9204_v45 }
 0x2f4   : > { %5908 = vmatprep.mubr.f32.mxu0 %v3065_v55  ;;  %v8101_v55 = vld [vmem:[%s8037_s18 + $0x48] sm:$0xff] }
 0x2f5   : > { %5909 = vmatmul.mubr.f32.gmra.mrb[30].mxu0 %v3075_v50  ;;  %v8079_v50 = vld [vmem:[%s8037_s18 + $0x30] sm:$0xff] }
 0x2f6   : > { %5927 = vmatprep.mubr.f32.mxu0 %v7834_v39 }
 0x2f9   : > { %5928 = vmatmul.mubr.f32.vlgmr.msra.gmra.mrb[16].mxu0 %v7830_v54 }
 0x2fa   : > { %6266 = vmatpush3.bf16.msra.mxu0 %v7793_v62  ;;  %5930 = vmatprep.mubr.f32.mxu0 %v7849_v47  ;;  %v8041_v62 = vld [vmem:[%s8037_s18] sm:$0xff] }
 0x2fb   : > { %6268 = vmatprep.subr.bf16.mxu0 %v6267_v3  ;;  %4158 = vrot.lane.b32.xlu0 %v8041_v62, %s6882_s19 }
 0x2fd   : > { %5931 = vmatmul.mubr.f32.gmra.mrb[18].mxu0 %v7845_v8 }
 0x2fe   : > { %5933 = vmatprep.mubr.f32.mxu0 %v7870_v24  ;;  %6270 = vmatpush3.bf16.msra.mxu0 %v6267_v3  ;;  %v8134_v3 = vld [vmem:[%s8037_s18 + $0x70] sm:$0xff] }
 0x2ff   : > { %6272 = vmatprep.subr.bf16.mxu0 %v7797_v18  ;;  %9196 = vst [vmem:[#allocation7_spill] sm:$0xff] %v8134_v3 }
 0x301   : > { %5934 = vmatmul.mubr.f32.gmra.mrb[20].mxu0 %v7866_v60 }
 0x302   : > { %5936 = vmatprep.mubr.f32.mxu0 %v7892_v43  ;;  %6274 = vmatpush3.bf16.msra.mxu0 %v7797_v18  ;;  %v8044_v18 = vld [vmem:[%s8037_s18 + $0x10] sm:$0xff] }
 0x303   : > { %6276 = vmatprep.subr.bf16.mxu0 %v7801_v26  ;;  %4162 = vrot.lane.b32.xlu1 %v8044_v18, %s6882_s19 }
 0x305   : > { %5937 = vmatmul.mubr.f32.gmra.mrb[22].mxu0 %v7885_v13 }
 0x306   : > { %5939 = vmatprep.mubr.f32.mxu0 %v7915_v63  ;;  %6278 = vmatpush3.bf16.msra.mxu0 %v7801_v26  ;;  %v8051_v26 = vld [vmem:[%s8037_s18 + $0x8] sm:$0xff]  ;;  %s6818_s18 = scalar_lea.vmem %s9044_s10, 2048 }
 0x307   : > { %6280 = vmatprep.subr.bf16.mxu0 %v7600_v9  ;;  %4160 = vrot.lane.b32.xlu0 %v8051_v26, %s6882_s19  ;;  %p6819_p11 = scmp.ne.s32.totalorder %s9044_s10, %s6818_s18 }
 0x308   : > { %4164 = vrot.lane.b32.xlu1 %v8055_v48, %s6882_s19 }
 0x309   : > { %5940 = vmatmul.mubr.f32.gmra.mrb[24].mxu0 %v7908_v41  ;;  %p6820_p12 = pnand %p6819_p11, %p6970_p5 }
 0x30a   : > { %5942 = vmatprep.mubr.f32.mxu0 %v7938_v44 }
 0x30b   : > { %4166 = vrot.lane.b32.xlu0 %v8065_v4, %s6882_s19  ;;  %p6821_p13 = pneg %p6820_p12 }
 0x30c   : > { %4168 = vrot.lane.b32.xlu1 %v8069_v46, %s6882_s19 }
 0x30d   : > { %5943 = vmatmul.mubr.f32.gmra.mrb[26].mxu0 %v7931_v16 }
 0x30e   : > { %5945 = vmatprep.mubr.f32.mxu0 %v7962_v58 }
 0x30f   : > { %4170 = vrot.lane.b32.xlu0 %v8079_v50, %s6882_s19 }
 0x310   : > { %4172 = vrot.lane.b32.xlu1 %v8083_v23, %s6882_s19 }
 0x311   : > { %5946 = vmatmul.mubr.f32.gmra.mrb[28].mxu0 %v7955_v53 }
 0x312   : > { %5948 = vmatprep.mubr.f32.mxu0 %v7985_v21 }
 0x313   : > { %4174 = vrot.lane.b32.xlu0 %v8097_v38, %s6882_s19 }
 0x314   : > { %4176 = vrot.lane.b32.xlu1 %v8101_v55, %s6882_s19 }
 0x315   : > { %5949 = vmatmul.mubr.f32.gmra.mrb[30].mxu0 %v7978_v2 }
 0x316   : > { %5967 = vmatprep.mubr.f32.mxu0 %v7840_v17  ;;  %v9202_v17 = vand.u32 4294901760, %v7856_v0 }
 0x317   : > { %4178 = vrot.lane.b32.xlu0 %v8110_v61, %s6882_s19 }
 0x318   : > { %4180 = vrot.lane.b32.xlu1 %v8114_v20, %s6882_s19 }
 0x319   : > { %5968 = vmatmul.mubr.f32.vlgmr.msra.gmra.mrb[16].mxu0 %v7837_v32  ;;  %v9206_v32 = vand.u32 4294901760, %v7874_v52 }
 0x31a   : > { %6282 = vmatpush3.bf16.msra.mxu0 %v7600_v9  ;;  %5970 = vmatprep.mubr.f32.mxu0 %v7859_v51 }
 0x31b   : > { %6284 = vmatprep.subr.bf16.mxu0 %v7607_v37  ;;  %4182 = vrot.lane.b32.xlu0 %v8122_v59, %s6882_s19  ;;  %v9199_v59 = vand.u32 4294901760, %v7859_v51  ;;  %v9213_v51 = vand.u32 4294901760, %v7972_v36 }
 0x31c   : > { %4184 = vrot.lane.b32.xlu1 %v8126_v22, %s6882_s19 }
 0x31d   : > { %5971 = vmatmul.mubr.f32.gmra.mrb[18].mxu0 %v7856_v0  ;;  %v9212_v0 = vand.u32 4294901760, %v7943_v7 }
 0x31e   : > { %5973 = vmatprep.mubr.f32.mxu0 %v7878_v11  ;;  %6286 = vmatpush3.bf16.msra.mxu0 %v7607_v37  ;;  %v9215_v11 = vand.u32 4294901760, %v7995_v30 }
 0x31f   : > { %6288 = vmatprep.subr.bf16.mxu0 %v7728_v57  ;;  %4186 = vrot.lane.b32.xlu0 %v8134_v3, %s6882_s19  ;;  %v9200_v3 = vand.u32 4294901760, %v7762_v28  ;;  %v9207_v28 = vand.u32 4294901760, %v7901_v10 }
 0x320   : > { %4188 = vrot.lane.b32.xlu1 %v8138_v42, %s6882_s19  ;;  %v9201_v42 = vand.u32 4294901760, %v7764_v40  ;;  %v9208_v40 = vand.u32 4294901760, %v7897_v6 }
 0x321   : > { %5974 = vmatmul.mubr.f32.gmra.mrb[20].mxu0 %v7874_v52  ;;  %v9214_v52 = vand.u32 4294901760, %v7967_v27 }
 0x322   : > { %5976 = vmatprep.mubr.f32.mxu0 %v7901_v10  ;;  %6290 = vmatpush3.bf16.msra.mxu0 %v7728_v57  ;;  %v6303_v22 = vpack.c.bf16 %v9201_v42, %v9200_v3 }
 0x323   : > { %6292 = vmatprep.subr.bf16.mxu0 %v7738_v1 }
 0x325   : > { %5977 = vmatmul.mubr.f32.gmra.mrb[22].mxu0 %v7897_v6  ;;  %v9216_v6 = vand.u32 4294901760, %v7989_v56 }
 0x326   : > { %5979 = vmatprep.mubr.f32.mxu0 %v7924_v25  ;;  %6294 = vmatpush3.bf16.msra.mxu0 %v7738_v1 }
 0x327   : > { %6296 = vmatprep.subr.bf16.mxu0 %v6295_v15 }
 0x329   : > { %5980 = vmatmul.mubr.f32.gmra.mrb[24].mxu0 %v7919_v19 }
 0x32a   : > { %5982 = vmatprep.mubr.f32.mxu0 %v7948_v31 }
 0x32d   : > { %5983 = vmatmul.mubr.f32.gmra.mrb[26].mxu0 %v7943_v7 }
 0x32e   : > { %5985 = vmatprep.mubr.f32.mxu0 %v7972_v36 }
 0x331   : > { %5986 = vmatmul.mubr.f32.gmra.mrb[28].mxu0 %v7967_v27 }
 0x332   : > { %5988 = vmatprep.mubr.f32.mxu0 %v7995_v30 }
 0x335   : > { %5989 = vmatmul.mubr.f32.gmra.mrb[30].mxu0 %v7989_v56 }
 0x336   : > { %6007 = vmatprep.mubr.f32.mxu0 %v2923_v49  ;;  %v9209_v49 = vand.u32 4294901760, %v7924_v25 }
 0x339   : > { %6008 = vmatmul.mubr.f32.vlgmr.msra.gmra.mrb[16].mxu0 %v9198_v14 }
 0x33a   : > { %6298 = vmatpush3.bf16.msra.mxu0 %v6295_v15  ;;  %6010 = vmatprep.mubr.f32.mxu0 %v9199_v59 }
 0x33b   : > { %6300 = vmatprep.subr.bf16.mxu0 %v6299_v29 }
 0x33d   : > { %6011 = vmatmul.mubr.f32.gmra.mrb[18].mxu0 %v9202_v17 }
 0x33e   : > { %6013 = vmatprep.mubr.f32.mxu0 %v9203_v34  ;;  %6302 = vmatpush3.bf16.msra.mxu0 %v6299_v29 }
 0x33f   : > { %6304 = vmatprep.subr.bf16.mxu0 %v6303_v22 }
 0x341   : > { %6014 = vmatmul.mubr.f32.gmra.mrb[20].mxu0 %v9206_v32 }
 0x342   : > { %6016 = vmatprep.mubr.f32.mxu0 %v9207_v28  ;;  %6306 = vmatpush3.bf16.msra.mxu0 %v6303_v22 }
 0x343   : > { %6308 = vmatprep.subr.bf16.mxu0 %v6307_v5 }
 0x345   : > { %6017 = vmatmul.mubr.f32.gmra.mrb[22].mxu0 %v9208_v40 }
 0x346   : > { %6019 = vmatprep.mubr.f32.mxu0 %v9209_v49  ;;  %6310 = vmatpush3.bf16.msra.mxu0 %v6307_v5 }
 0x347   : > { %6312 = vmatprep.subr.bf16.mxu0 %v7600_v9 }
 0x349   : > { %6020 = vmatmul.mubr.f32.gmra.mrb[24].mxu0 %v9210_v33 }
 0x34a   : > { %6022 = vmatprep.mubr.f32.mxu0 %v9211_v35 }
 0x34d   : > { %6023 = vmatmul.mubr.f32.gmra.mrb[26].mxu0 %v9212_v0 }
 0x34e   : > { %6025 = vmatprep.mubr.f32.mxu0 %v9213_v51 }
 0x351   : > { %6026 = vmatmul.mubr.f32.gmra.mrb[28].mxu0 %v9214_v52 }
 0x352   : > { %6028 = vmatprep.mubr.f32.mxu0 %v9215_v11 }
 0x355   : > { %6029 = vmatmul.mubr.f32.gmra.mrb[30].mxu0 %v9216_v6 }
 0x356   : > { %6047 = vmatprep.mubr.f32.mxu0 %v7834_v39 }
 0x359   : > { %6048 = vmatmul.mubr.f32.vlgmr.msra.gmra.mrb[16].mxu0 %v7830_v54 }
 0x35a   : > { %6314 = vmatpush3.bf16.msra.mxu0 %v7600_v9  ;;  %6050 = vmatprep.mubr.f32.mxu0 %v7849_v47  ;;  %v8233_v9 = vld [vmem:[%s9101_s7] ss:$0 sm:$0xff] }
 0x35b   : > { %6316 = vmatprep.subr.bf16.mxu0 %v7607_v37 }
 0x35d   : > { %6051 = vmatmul.mubr.f32.gmra.mrb[18].mxu0 %v7845_v8 }
 0x35e   : > { %6053 = vmatprep.mubr.f32.mxu0 %v7870_v24  ;;  %6318 = vmatpush3.bf16.msra.mxu0 %v7607_v37 }
 0x35f   : > { %6320 = vmatprep.subr.bf16.mxu0 %v7728_v57 }
 0x361   : > { %6054 = vmatmul.mubr.f32.gmra.mrb[20].mxu0 %v7866_v60 }
 0x362   : > { %6056 = vmatprep.mubr.f32.mxu0 %v7892_v43  ;;  %6322 = vmatpush3.bf16.msra.mxu0 %v7728_v57 }
 0x363   : > { %6324 = vmatprep.subr.bf16.mxu0 %v7738_v1 }
 0x365   : > { %6057 = vmatmul.mubr.f32.gmra.mrb[22].mxu0 %v7885_v13 }
 0x366   : > { %6059 = vmatprep.mubr.f32.mxu0 %v7915_v63  ;;  %6326 = vmatpush3.bf16.msra.mxu0 %v7738_v1 }
 0x369   : > { %6060 = vmatmul.mubr.f32.gmra.mrb[24].mxu0 %v7908_v41 }
 0x36a   : > { %6062 = vmatprep.mubr.f32.mxu0 %v7938_v44 }
 0x36d   : > { %6063 = vmatmul.mubr.f32.gmra.mrb[26].mxu0 %v7931_v16  ;;  %v4159_v51 = vpop.permute.xlu0 %4158 }
 0x36e   : > { %6065 = vmatprep.mubr.f32.mxu0 %v7962_v58 }
 0x371   : > { %6066 = vmatmul.mubr.f32.gmra.mrb[28].mxu0 %v7955_v53 }
 0x372   : > { %6068 = vmatprep.mubr.f32.mxu0 %v7985_v21 }
 0x375   : > { %6069 = vmatmul.mubr.f32.gmra.mrb[30].mxu0 %v7978_v2 }
 0x376   : > { %6087 = vmatprep.mubr.f32.mxu0 %v7834_v39 }
 0x379   : > { %6088 = vmatmul.mubr.f32.vlgmr.msra.gmra.mrb[16].mxu0 %v7830_v54 }
 0x37a   : > { %6090 = vmatprep.mubr.f32.mxu0 %v7849_v47 }
 0x37d   : > { %6091 = vmatmul.mubr.f32.gmra.mrb[18].mxu0 %v7845_v8 }
 0x37e   : > { %6093 = vmatprep.mubr.f32.mxu0 %v7870_v24 }
 0x381   : > { %6094 = vmatmul.mubr.f32.gmra.mrb[20].mxu0 %v7866_v60 }
 0x382   : > { %6096 = vmatprep.mubr.f32.mxu0 %v7892_v43 }
 0x385   : > { %6097 = vmatmul.mubr.f32.gmra.mrb[22].mxu0 %v7885_v13 }
 0x386   : > { %6099 = vmatprep.mubr.f32.mxu0 %v7915_v63 }
 0x389   : > { %6100 = vmatmul.mubr.f32.gmra.mrb[24].mxu0 %v7908_v41 }
 0x38a   : > { %6102 = vmatprep.mubr.f32.mxu0 %v7938_v44 }
 0x38d   : > { %6103 = vmatmul.mubr.f32.gmra.mrb[26].mxu0 %v7931_v16 }
 0x38e   : > { %6105 = vmatprep.mubr.f32.mxu0 %v7962_v58 }
 0x391   : > { %6106 = vmatmul.mubr.f32.gmra.mrb[28].mxu0 %v7955_v53 }
 0x392   : > { %6108 = vmatprep.mubr.f32.mxu0 %v7985_v21 }
 0x395   : > { %6109 = vmatmul.mubr.f32.gmra.mrb[30].mxu0 %v7978_v2 }
 0x44c   : > { %v6089_v37 = vpop.f32.mrb[16].mxu0 }
 0x44d   : > { %v8236_v57 = vadd.f32 %v6089_v37, %v8233_v9  ;;  %v3936_v1 = vpop.f32.mrb[17].mxu0 }
 0x44e   : > { %v8239_v54 = vadd.f32 %v8233_v9, %v3936_v1 }
 0x44f   : > { %6658 = vtanh.f32 %v8236_v57 }
 0x450   : > { %6660 = vtanh.f32 %v8239_v54  ;;  %v6092_v39 = vpop.f32.mrb[18].mxu0 }
 0x451   : > { %v8244_v8 = vadd.f32 %v6092_v39, %v8233_v9  ;;  %v3948_v47 = vpop.f32.mrb[19].mxu0 }
 0x452   : > { %v8247_v60 = vadd.f32 %v8233_v9, %v3948_v47  ;;  %v8310_v47 = vpop.permute.xlu1 %4162 }
 0x453   : > { %6662 = vtanh.f32 %v8244_v8 }
 0x454   : > { %6664 = vtanh.f32 %v8247_v60  ;;  %v6095_v24 = vpop.f32.mrb[20].mxu0 }
 0x455   : > { %v8252_v13 = vadd.f32 %v6095_v24, %v8233_v9  ;;  %v3960_v43 = vpop.f32.mrb[21].mxu0 }
 0x456   : > { %v8255_v10 = vadd.f32 %v8233_v9, %v3960_v43 }
 0x457   : > { %6666 = vtanh.f32 %v8252_v13 }
 0x458   : > { %6668 = vtanh.f32 %v8255_v10  ;;  %v6098_v41 = vpop.f32.mrb[22].mxu0 }
 0x459   : > { %v8259_v63 = vpop.eup %6658  ;;  %v8262_v7 = vadd.f32 %v6098_v41, %v8233_v9  ;;  %v3972_v19 = vpop.f32.mrb[23].mxu0 }
 0x45a   : > { %v8264_v25 = vpop.eup %6660  ;;  %v8267_v16 = vadd.f32 %v8233_v9, %v3972_v19  ;;  %v4047_v44 = vadd.f32 1.0, %v8259_v63 }
 0x45b   : > { %6670 = vtanh.f32 %v8262_v7  ;;  %v4046_v27 = vadd.f32 1.0, %v8264_v25 }
 0x45c   : > { %6672 = vtanh.f32 %v8267_v16  ;;  %v6101_v31 = vpop.f32.mrb[24].mxu0  ;;  %v4063_v53 = vmul.f32 11.0, %v4047_v44 }
 0x45d   : > { %v8273_v58 = vpop.eup %6662  ;;  %v8276_v36 = vadd.f32 %v6101_v31, %v8233_v9  ;;  %v3984_v2 = vpop.f32.mrb[25].mxu0  ;;  %v4062_v21 = vmul.f32 11.0, %v4046_v27 }
 0x45e   : > { %v8278_v14 = vpop.eup %6664  ;;  %v8281_v56 = vadd.f32 %v8233_v9, %v3984_v2  ;;  %v4079_v30 = vadd.f32 -20.0, %v4063_v53  ;;  %v4049_v42 = vadd.f32 1.0, %v8273_v58 }
 0x45f   : > { %6674 = vtanh.f32 %v8276_v36  ;;  %v4078_v29 = vadd.f32 -20.0, %v4062_v21  ;;  %v4048_v15 = vadd.f32 1.0, %v8278_v14 }
 0x460   : > { %9217 = vst [vmem:[#allocation9_spill] sm:$0xff] %v8281_v56  ;;  %6676 = vtanh.f32 %v8281_v56  ;;  %4368 = vrot.lane.b32.xlu1 %v4079_v30, %s6883_s20  ;;  %v4096_v59 = vmul.f32 1.442695, %v4079_v30  ;;  %v6104_v22 = vpop.f32.mrb[26].mxu0  ;;  %v4065_v3 = vmul.f32 11.0, %v4049_v42 }
 0x461   : > { %v8288_v17 = vpop.eup %6666  ;;  %v8291_v34 = vadd.f32 %v6104_v22, %v8233_v9  ;;  %v3996_v45 = vpop.f32.mrb[27].mxu0  ;;  %4366 = vrot.lane.b32.xlu0 %v4078_v29, %s6883_s20  ;;  %v4094_v12 = vmul.f32 1.442695, %v4078_v29  ;;  %v4064_v5 = vmul.f32 11.0, %v4048_v15 }
 0x462   : > { %v8294_v32 = vpop.eup %6668  ;;  %6678 = vpow2.f32 %v4096_v59  ;;  %v8297_v28 = vadd.f32 %v8233_v9, %v3996_v45  ;;  %v4081_v40 = vadd.f32 -20.0, %v4065_v3  ;;  %v4051_v49 = vadd.f32 1.0, %v8288_v17  ;;  %v4161_v22 = vpop.permute.xlu0 %4160 }
 0x463   : > { %9218 = vst [vmem:[#allocation10_spill] sm:$0xff] %v8291_v34  ;;  %6680 = vtanh.f32 %v8291_v34  ;;  %v4080_v33 = vadd.f32 -20.0, %v4064_v5  ;;  %v4050_v35 = vadd.f32 1.0, %v8294_v32  ;;  %v4165_v5 = vpop.permute.xlu1 %4164 }
 0x464   : > { %9219 = vst [vmem:[#allocation11_spill] sm:$0xff] %v8297_v28  ;;  %6682 = vtanh.f32 %v8297_v28  ;;  %4372 = vrot.lane.b32.xlu1 %v4081_v40, %s6883_s20  ;;  %v6107_v0 = vpop.f32.mrb[28].mxu0  ;;  %v4067_v52 = vmul.f32 11.0, %v4051_v49  ;;  %v4100_v6 = vmul.f32 1.442695, %v4081_v40 }
 0x465   : > { %v8304_v11 = vpop.eup %6670  ;;  %6684 = vpow2.f32 %v4094_v12  ;;  %v8307_v37 = vadd.f32 %v6107_v0, %v8233_v9  ;;  %v4008_v1 = vpop.f32.mrb[29].mxu0  ;;  %4370 = vrot.lane.b32.xlu0 %v4080_v33, %s6883_s20  ;;  %v4066_v39 = vmul.f32 11.0, %v4050_v35  ;;  %v4098_v41 = vmul.f32 1.442695, %v4080_v33 }
 0x466   : > { %v8312_v24 = vpop.eup %6672  ;;  %v8315_v43 = vadd.f32 %v8233_v9, %v4008_v1  ;;  %v4083_v19 = vadd.f32 -20.0, %v4067_v52  ;;  %v4053_v44 = vadd.f32 1.0, %v8304_v11 }
 0x467   : > { %9220 = vst [vmem:[#allocation12_spill] sm:$0xff] %v8307_v37  ;;  %6686 = vtanh.f32 %v8307_v37  ;;  %v4082_v27 = vadd.f32 -20.0, %v4066_v39  ;;  %v4052_v31 = vadd.f32 1.0, %v8312_v24 }
 0x468   : > { %9221 = vst [vmem:[#allocation13_spill] sm:$0xff] %v8315_v43  ;;  %6688 = vtanh.f32 %v8315_v43  ;;  %4376 = vrot.lane.b32.xlu1 %v4083_v19, %s6883_s20  ;;  %v6110_v53 = vpop.f32.mrb[30].mxu0  ;;  %v4069_v2 = vmul.f32 11.0, %v4053_v44  ;;  %v4104_v35 = vmul.f32 1.442695, %v4083_v19 }
 0x469   : > { %v8322_v21 = vpop.eup %6674  ;;  %6690 = vpow2.f32 %v4100_v6  ;;  %v8325_v30 = vadd.f32 %v6110_v53, %v8233_v9  ;;  %v4020_v42 = vpop.f32.mrb[31].mxu0  ;;  %4374 = vrot.lane.b32.xlu0 %v4082_v27, %s6883_s20  ;;  %v4068_v29 = vmul.f32 11.0, %v4052_v31  ;;  %v4102_v39 = vmul.f32 1.442695, %v4082_v27 }
 0x46a   : > { %v8328_v15 = vpop.eup %6676  ;;  %6692 = vpow2.f32 %v4098_v41  ;;  %v8331_v59 = vadd.f32 %v8233_v9, %v4020_v42  ;;  %v4085_v3 = vadd.f32 -20.0, %v4069_v2  ;;  %v4055_v45 = vadd.f32 1.0, %v8322_v21  ;;  %v4169_v2 = vpop.permute.xlu1 %4168 }
 0x46b   : > { %9222 = vst [vmem:[#allocation14_spill] sm:$0xff] %v8325_v30  ;;  %6694 = vtanh.f32 %v8325_v30  ;;  %v4084_v12 = vadd.f32 -20.0, %v4068_v29  ;;  %v4054_v40 = vadd.f32 1.0, %v8328_v15 }
 0x46c   : > { %9223 = vst [vmem:[#allocation15_spill] sm:$0xff] %v8331_v59  ;;  %v6679_v49 = vpop.eup %6678  ;;  %6696 = vtanh.f32 %v8331_v59  ;;  %4380 = vrot.lane.b32.xlu1 %v4085_v3, %s6883_s20  ;;  %v4071_v0 = vmul.f32 11.0, %v4055_v45  ;;  %v4108_v19 = vmul.f32 1.442695, %v4085_v3 }
 0x46d   : > { %v8338_v33 = vpop.eup %6680  ;;  %v4207_v9 = vmul.f32 %v6679_v49, %v4161_v22  ;;  %4378 = vrot.lane.b32.xlu0 %v4084_v12, %s6883_s20  ;;  %v4070_v41 = vmul.f32 11.0, %v4054_v40  ;;  %6698 = vpow2.f32 %v4104_v35  ;;  %v4106_v49 = vmul.f32 1.442695, %v4084_v12 }
 0x46e   : > { %v8341_v52 = vpop.eup %6682  ;;  %v4057_v6 = vadd.f32 1.0, %v8338_v33  ;;  %v4087_v42 = vadd.f32 -20.0, %v4071_v0  ;;  %6700 = vpow2.f32 %v4102_v39  ;;  %v4173_v43 = vpop.permute.xlu1 %4172 }
 0x46f   : > { %v6685_v1 = vpop.eup %6684  ;;  %v4056_v44 = vadd.f32 1.0, %v8341_v52  ;;  %6702 = vpow2.f32 %v4108_v19 }
 0x470   : > { %v4206_v31 = vmul.f32 %v6685_v1, %v4159_v51  ;;  %4240 = vrot.lane.b32.xlu1 %v4207_v9, %s6883_s20  ;;  %v4073_v29 = vmul.f32 11.0, %v4057_v6  ;;  %v4167_v51 = vpop.permute.xlu0 %4166  ;;  %v4086_v9 = vadd.f32 -20.0, %v4070_v41  ;;  %v4112_v0 = vmul.f32 1.442695, %v4087_v42 }
 0x471   : > { %v8346_v53 = vpop.eup %6686  ;;  %v4072_v1 = vmul.f32 11.0, %v4056_v44  ;;  %6704 = vpow2.f32 %v4106_v49 }
 0x472   : > { %v8348_v22 = vpop.eup %6688  ;;  %v4059_v45 = vadd.f32 1.0, %v8346_v53  ;;  %4238 = vrot.lane.b32.xlu0 %v4206_v31, %s6883_s20  ;;  %v4089_v6 = vadd.f32 -20.0, %v4073_v29  ;;  %v4110_v44 = vmul.f32 1.442695, %v4086_v9  ;;  %6706 = vpow2.f32 %v4112_v0 }
 0x473   : > { %v6691_v27 = vpop.eup %6690  ;;  %v4058_v40 = vadd.f32 1.0, %v8348_v22  ;;  %v4088_v37 = vadd.f32 -20.0, %v4072_v1 }
 0x474   : > { %v6693_v59 = vpop.eup %6692  ;;  %4384 = vrot.lane.b32.xlu1 %v4087_v42, %s6883_s20  ;;  %v4075_v35 = vmul.f32 11.0, %v4059_v45  ;;  %v4209_v31 = vmul.f32 %v6691_v27, %v4165_v5  ;;  %v4171_v42 = vpop.permute.xlu0 %4170  ;;  %v4116_v29 = vmul.f32 1.442695, %v4089_v6  ;;  %6708 = vpow2.f32 %v4110_v44 }
 0x475   : > { %v8354_v3 = vpop.eup %6694  ;;  %v4074_v39 = vmul.f32 11.0, %v4058_v40  ;;  %v4208_v28 = vmul.f32 %v6693_v59, %v8310_v47  ;;  %v4114_v27 = vmul.f32 1.442695, %v4088_v37  ;;  %v4177_v47 = vpop.permute.xlu1 %4176 }
 0x476   : > { %9224 = vst [vmem:[#allocation16_spill] sm:$0xff] %v8354_v3  ;;  %v8356_v30 = vpop.eup %6696  ;;  %v4061_v12 = vadd.f32 1.0, %v8354_v3  ;;  %4382 = vrot.lane.b32.xlu0 %v4086_v9, %s6883_s20  ;;  %v8363_v45 = vadd.f32 -20.0, %v4075_v35  ;;  %6710 = vpow2.f32 %v4116_v29 }
 0x477   : > { %9225 = vst [vmem:[#allocation17_spill] sm:$0xff] %v8356_v30  ;;  %v4060_v41 = vadd.f32 1.0, %v8356_v30  ;;  %v6699_v5 = vpop.eup %6698  ;;  %v8366_v40 = vadd.f32 -20.0, %v4074_v39  ;;  %6712 = vpow2.f32 %v4114_v27 }
 0x478   : > { %4244 = vrot.lane.b32.xlu1 %v4209_v31, %s6883_s20  ;;  %v4077_v19 = vmul.f32 11.0, %v4061_v12  ;;  %v6701_v9 = vpop.eup %6700  ;;  %v4120_v59 = vmul.f32 1.442695, %v8363_v45  ;;  %v4211_v0 = vmul.f32 %v6699_v5, %v4169_v2 }
 0x479   : > { %v4076_v49 = vmul.f32 11.0, %v4060_v41  ;;  %v6703_v35 = vpop.eup %6702  ;;  %v4118_v12 = vmul.f32 1.442695, %v8366_v40  ;;  %v4181_v2 = vpop.permute.xlu1 %4180 }
 0x47a   : > { %4242 = vrot.lane.b32.xlu0 %v4208_v28, %s6883_s20  ;;  %v8370_v1 = vadd.f32 -20.0, %v4077_v19  ;;  %v4175_v28 = vpop.permute.xlu0 %4174  ;;  %6714 = vpow2.f32 %v4120_v59  ;;  %v4213_v44 = vmul.f32 %v6703_v35, %v4173_v43 }
 0x47b   : > { %v8374_v31 = vadd.f32 -20.0, %v4076_v49  ;;  %v6705_v39 = vpop.eup %6704  ;;  %6716 = vpow2.f32 %v4118_v12 }
 0x47c   : > { %4388 = vrot.lane.b32.xlu1 %v4089_v6, %s6883_s20  ;;  %v4210_v6 = vmul.f32 %v6701_v9, %v4167_v51  ;;  %v4124_v41 = vmul.f32 1.442695, %v8370_v1  ;;  %v4212_v29 = vmul.f32 %v6705_v39, %v4171_v42  ;;  %v6884_v42 = vmov 0.0  }
 0x47d   : > { %v4122_v19 = vmul.f32 1.442695, %v8374_v31  ;;  %4815 = vst [vmem:[%s8386_s25] sm:$0xff] %v6884_v42  ;;  %4816 = vst [vmem:[%s8386_s25 + $0x8] sm:$0xff] %v6884_v42 }
 0x47e   : > { %4386 = vrot.lane.b32.xlu0 %v4088_v37, %s6883_s20  ;;  %v6707_v37 = vpop.eup %6706  ;;  %v4179_v49 = vpop.permute.xlu0 %4178  ;;  %6718 = vpow2.f32 %v4124_v41  ;;  %4817 = vst [vmem:[%s8386_s25 + $0x10] sm:$0xff] %v6884_v42  ;;  %4818 = vst [vmem:[%s8386_s25 + $0x18] sm:$0xff] %v6884_v42 }
 0x47f   : > { %v6709_v5 = vpop.eup %6708  ;;  %v4215_v51 = vmul.f32 %v6707_v37, %v4177_v47  ;;  %6720 = vpow2.f32 %v4122_v19  ;;  %4819 = vst [vmem:[%s8386_s25 + $0x20] sm:$0xff] %v6884_v42  ;;  %4820 = vst [vmem:[%s8386_s25 + $0x28] sm:$0xff] %v6884_v42  ;;  %v4185_v47 = vpop.permute.xlu1 %4184 }
 0x480   : > { %4248 = vrot.lane.b32.xlu1 %v4211_v0, %s6883_s20  ;;  %v6711_v43 = vpop.eup %6710  ;;  %v4214_v27 = vmul.f32 %v6709_v5, %v4175_v28  ;;  %4821 = vst [vmem:[%s8386_s25 + $0x30] sm:$0xff] %v6884_v42  ;;  %4822 = vst [vmem:[%s8386_s25 + $0x38] sm:$0xff] %v6884_v42  ;;  %v4323_v5 = vmul.f32 -0.5, %v8069_v46 }
 0x481   : > { %4823 = vst [vmem:[%s8386_s25 + $0x40] sm:$0xff] %v6884_v42  ;;  %4824 = vst [vmem:[%s8386_s25 + $0x48] sm:$0xff] %v6884_v42  ;;  %v6713_v9 = vpop.eup %6712  ;;  %v4217_v59 = vmul.f32 %v6711_v43, %v4181_v2  ;;  %v4324_v43 = vmul.f32 -0.5, %v8079_v50 }
 0x482   : > { %4246 = vrot.lane.b32.xlu0 %v4210_v6, %s6883_s20  ;;  %4825 = vst [vmem:[%s8386_s25 + $0x50] sm:$0xff] %v6884_v42  ;;  %4826 = vst [vmem:[%s8386_s25 + $0x58] sm:$0xff] %v6884_v42  ;;  %v4183_v35 = vpop.permute.xlu0 %4182  ;;  %v4216_v28 = vmul.f32 %v6713_v9, %v4179_v49  ;;  %v4322_v49 = vmul.f32 -0.5, %v8065_v4 }
 0x483   : > { %4827 = vst [vmem:[%s8386_s25 + $0x60] sm:$0xff] %v6884_v42  ;;  %4828 = vst [vmem:[%s8386_s25 + $0x68] sm:$0xff] %v6884_v42  ;;  %v4189_v41 = vpop.permute.xlu1 %4188 }
 0x484   : > { %4252 = vrot.lane.b32.xlu1 %v4213_v44, %s6883_s20  ;;  %4829 = vst [vmem:[%s8386_s25 + $0x70] sm:$0xff] %v6884_v42  ;;  %4830 = vst [vmem:[%s8386_s25 + $0x78] sm:$0xff] %v6884_v42  ;;  %v6715_v0 = vpop.eup %6714  ;;  %v4326_v42 = vmul.f32 -0.5, %v8097_v38  ;;  %v4338_v3 = vmul.f32 %v4322_v49, %v8065_v4 }
 0x485   : > { %v6717_v12 = vpop.eup %6716  ;;  %v4219_v39 = vmul.f32 %v6715_v0, %v4185_v47  ;;  %v4329_v47 = vmul.f32 -0.5, %v8114_v20  ;;  %v9226_v0 = vld [vmem:[#allocation6_spill] sm:$0xff] }
 0x486   : > { %4250 = vrot.lane.b32.xlu0 %v4212_v29, %s6883_s20  ;;  %v4218_v44 = vmul.f32 %v6717_v12, %v4183_v35  ;;  %v4187_v19 = vpop.permute.xlu0 %4186  ;;  %v4331_v35 = vmul.f32 -0.5, %v9226_v0  ;;  %v8516_v4 = vmul.f32 %v4326_v42, %v8097_v38 }
 0x488   : > { %4256 = vrot.lane.b32.xlu1 %v4215_v51, %s6883_s20  ;;  %v6719_v6 = vpop.eup %6718  ;;  %v8533_v38 = vmul.f32 %v4331_v35, %v9226_v0 }
 0x489   : > { %v6721_v37 = vpop.eup %6720  ;;  %v4221_v29 = vmul.f32 %v6719_v6, %v4189_v41  ;;  %v9228_v6 = vld [vmem:[#allocation8_spill] sm:$0xff] }
 0x48a   : > { %4254 = vrot.lane.b32.xlu0 %v4214_v27, %s6883_s20  ;;  %v4220_v2 = vmul.f32 %v6721_v37, %v4187_v19  ;;  %v4327_v27 = vmul.f32 -0.5, %v8101_v55  ;;  %v4333_v41 = vmul.f32 -0.5, %v9228_v6  ;;  %9230 = vst [vmem:[#allocation6_spill] sm:$0xff] %v8533_v38 }
 0x48c   : > { %4260 = vrot.lane.b32.xlu1 %v4217_v59, %s6883_s20  ;;  %v4328_v59 = vmul.f32 -0.5, %v8110_v61 }
 0x48e   : > { %4258 = vrot.lane.b32.xlu0 %v4216_v28, %s6883_s20  ;;  %v9227_v28 = vld [vmem:[#allocation5_spill] sm:$0xff] }
 0x48f   : > { %v4330_v12 = vmul.f32 -0.5, %v9227_v28 }
 0x490   : > { %4264 = vrot.lane.b32.xlu1 %v4219_v39, %s6883_s20 }
 0x492   : > { %4262 = vrot.lane.b32.xlu0 %v4218_v44, %s6883_s20  ;;  %v9229_v44 = vld [vmem:[#allocation7_spill] sm:$0xff] }
 0x493   : > { %v4332_v37 = vmul.f32 -0.5, %v9229_v44 }
 0x494   : > { %4268 = vrot.lane.b32.xlu1 %v4221_v29, %s6883_s20 }
 0x496   : > { %4266 = vrot.lane.b32.xlu0 %v4220_v2, %s6883_s20 }
 0x498   : > { %4392 = vrot.lane.b32.xlu1 %v8363_v45, %s6883_s20 }
 0x49a   : > { %4390 = vrot.lane.b32.xlu0 %v8366_v40, %s6883_s20  ;;  %v4320_v40 = vmul.f32 -0.5, %v8044_v18 }
 0x49c   : > { %4396 = vrot.lane.b32.xlu1 %v8370_v1, %s6883_s20  ;;  %v4319_v1 = vmul.f32 -0.5, %v8051_v26 }
 0x49e   : > { %4394 = vrot.lane.b32.xlu0 %v8374_v31, %s6883_s20  ;;  %v4321_v31 = vmul.f32 -0.5, %v8055_v48  ;;  %v4335_v19 = vmul.f32 %v4319_v1, %v8051_v26  ;;  %s6824_s20 = scalar_lea.vmem %s6823_s22, 4096 }
 0x49f   : > { %p6826_p1 = scmp.lt.s32.totalorder %s6824_s20, %s6818_s18 }
 0x4a0   : > { %4863 = vrot.lane.b32.xlu1 %v8264_v25, %s6882_s19 }
 0x4a1   : > { %p6827_p2 = por %p6826_p1, %p6825_p0 }
 0x4a2   : > { %4865 = vrot.lane.b32.xlu0 %v8259_v63, %s6882_s19 }
 0x4a3   : > { %p6828_p3 = pnand %p6827_p2, %p6821_p13 }
 0x4a4   : > { %4867 = vrot.lane.b32.xlu1 %v8278_v14, %s6882_s19 }
 0x4a6   : > { %4871 = vrot.lane.b32.xlu0 %v8294_v32, %s6882_s19 }
 0x4a8   : > { %4869 = vrot.lane.b32.xlu1 %v8273_v58, %s6882_s19 }
 0x4aa   : > { %4875 = vrot.lane.b32.xlu0 %v8312_v24, %s6882_s19 }
 0x4ac   : > { %4873 = vrot.lane.b32.xlu1 %v8288_v17, %s6882_s19 }
 0x4ae   : > { %4879 = vrot.lane.b32.xlu0 %v8328_v15, %s6882_s19 }
 0x4b0   : > { %4877 = vrot.lane.b32.xlu1 %v8304_v11, %s6882_s19 }
 0x4b2   : > { %4883 = vrot.lane.b32.xlu0 %v8341_v52, %s6882_s19 }
 0x4b4   : > { %4881 = vrot.lane.b32.xlu1 %v8322_v21, %s6882_s19 }
 0x4b6   : > { %4887 = vrot.lane.b32.xlu0 %v8348_v22, %s6882_s19  ;;  %v4318_v22 = vmul.f32 -0.5, %v8041_v62 }
 0x4b8   : > { %4885 = vrot.lane.b32.xlu1 %v8338_v33, %s6882_s19  ;;  %v4334_v2 = vmul.f32 %v4318_v22, %v8041_v62  ;;  %v8510_v62 = vmul.f32 %v4327_v27, %v8101_v55 }
 0x4bc   : > { %4889 = vrot.lane.b32.xlu1 %v8346_v53, %s6882_s19 }
 0x4d2   : > { %v8447_v63 = vpop.permute.xlu1 %4368 }
 0x4d3   : > { %v8449_v25 = vpop.permute.xlu0 %4366 }
 0x4d4   : > { %v4414_v55 = vsub.f32 %v4334_v2, %v8449_v25 }
 0x4d6   : > { %v8451_v58 = vpop.permute.xlu1 %4372 }
 0x4d7   : > { %v8453_v14 = vpop.permute.xlu0 %4370 }
 0x4da   : > { %v8455_v17 = vpop.permute.xlu1 %4376 }
 0x4db   : > { %v8457_v32 = vpop.permute.xlu0 %4374 }
 0x4de   : > { %v8459_v11 = vpop.permute.xlu1 %4380 }
 0x4df   : > { %v8461_v24 = vpop.permute.xlu0 %4378 }
 0x4e2   : > { %v4241_v21 = vpop.permute.xlu1 %4240 }
 0x4e3   : > { %v8464_v15 = vadd.f32 %v8236_v57, %v4241_v21  ;;  %v4337_v21 = vmul.f32 %v4321_v31, %v8055_v48 }
 0x4e4   : > { %v4239_v33 = vpop.permute.xlu0 %4238 }
 0x4e5   : > { %6722 = vtanh.f32 %v8464_v15  ;;  %v8468_v52 = vmul.f32 -2.0, %v8464_v15  ;;  %v8471_v53 = vadd.f32 %v8239_v54, %v4239_v33  ;;  %v4325_v54 = vmul.f32 -0.5, %v8083_v23 }
 0x4e6   : > { %v8474_v45 = vpop.permute.xlu1 %4384  ;;  %v4336_v33 = vmul.f32 %v4320_v40, %v8044_v18  ;;  %v4417_v22 = vsub.f32 %v4337_v21, %v8451_v58  ;;  %v4418_v40 = vsub.f32 %v4338_v3, %v8457_v32  ;;  %v8562_v32 = vadd.f32 -0.9189385, %v4414_v55 }
 0x4e7   : > { %v4495_v57 = vand.u32 2147483647, %v8468_v52  ;;  %6724 = vtanh.f32 %v8471_v53  ;;  %v4341_v26 = vmul.f32 %v4325_v54, %v8083_v23  ;;  %v8523_v23 = vmul.f32 %v4328_v59, %v8110_v61 }
 0x4e8   : > { %v8484_v51 = vpop.permute.xlu0 %4382  ;;  %v4416_v61 = vsub.f32 %v4336_v33, %v8453_v14  ;;  %v8568_v27 = vadd.f32 -0.9189385, %v4417_v22 }
 0x4e9   : > { %v4511_v9 = vsub.f32 0.0, %v4495_v57  ;;  %v4339_v57 = vmul.f32 %v4323_v5, %v8069_v46  ;;  %v8520_v46 = vmul.f32 %v4329_v47, %v8114_v20  ;;  %v8548_v5 = vmul.f32 %v4330_v12, %v9227_v28 }
 0x4ea   : > { %v4245_v39 = vpop.permute.xlu1 %4244  ;;  %v4421_v58 = vsub.f32 %v4341_v26, %v8459_v11  ;;  %v8570_v11 = vadd.f32 -0.9189385, %v4416_v61  ;;  %v4422_v2 = vsub.f32 %v8516_v4, %v8484_v51  ;;  %v9245_v51 = vld [vmem:[#allocation13_spill] sm:$0xff] }
 0x4eb   : > { %v8497_v29 = vadd.f32 %v8244_v8, %v4245_v39  ;;  %v4528_v34 = vmul.f32 1.442695, %v4511_v9  ;;  %v4340_v8 = vmul.f32 %v4324_v43, %v8079_v50  ;;  %v4415_v50 = vsub.f32 %v4335_v19, %v8447_v63  ;;  %9231 = vst [vmem:[#allocation5_spill] sm:$0xff] %v8548_v5 }
 0x4ec   : > { %v4243_v30 = vpop.permute.xlu0 %4242  ;;  %v4419_v25 = vsub.f32 %v4339_v57, %v8455_v17  ;;  %v8558_v17 = vmul.f32 %v4333_v41, %v9228_v6  ;;  %v8566_v43 = vmul.f32 %v4332_v37, %v9229_v44  ;;  %v8578_v9 = vadd.f32 -0.9189385, %v4418_v40  ;;  %v9236_v40 = vld [vmem:[#allocation9_spill] sm:$0xff]  ;;  %v9247_v57 = vld [vmem:[#allocation14_spill] sm:$0xff] }
 0x4ed   : > { %v8505_v56 = vadd.f32 %v8247_v60, %v4243_v30  ;;  %6726 = vtanh.f32 %v8497_v29  ;;  %v8528_v60 = vmul.f32 -2.0, %v8471_v53  ;;  %v8540_v63 = vmul.f32 -2.0, %v8497_v29 }
 0x4ee   : > { %v8513_v18 = vpop.permute.xlu1 %4388  ;;  %9232 = vst [vmem:[#allocation8_spill] sm:$0xff] %v8558_v17  ;;  %v8560_v3 = vadd.f32 -0.9189385, %v4415_v50  ;;  %9233 = vst [vmem:[#allocation7_spill] sm:$0xff] %v8566_v43  ;;  %v8576_v42 = vadd.f32 -0.9189385, %v4419_v25  ;;  %v4423_v19 = vsub.f32 %v8510_v62, %v8474_v45 }
 0x4ef   : > { %v6723_v48 = vpop.eup %6722  ;;  %6728 = vtanh.f32 %v8505_v56  ;;  %v8545_v1 = vmul.f32 -2.0, %v8505_v56  ;;  %v4494_v49 = vand.u32 2147483647, %v8528_v60  ;;  %v8582_v0 = vadd.f32 -0.9189385, %v4421_v58 }
 0x4f0   : > { %v8530_v30 = vpop.permute.xlu0 %4386  ;;  %4832 = vst.msk [vmem:[%s8386_s25 + $0x8] sm:$0xff] %vm4766_vm2, %v6723_v48  ;;  %6730 = vpow2.f32 %v4528_v34  ;;  %v4420_v34 = vsub.f32 %v4340_v8, %v8461_v24  ;;  %v8626_v22 = vadd.f32 -0.9189385, %v4423_v19  ;;  %v8628_v61 = vadd.f32 -0.9189385, %v4422_v2 }
 0x4f1   : > { %v6725_v20 = vpop.eup %6724  ;;  %v4496_v47 = vand.u32 2147483647, %v8545_v1  ;;  %v4510_v39 = vsub.f32 0.0, %v4494_v49 }
 0x4f2   : > { %v4249_v31 = vpop.permute.xlu1 %4248  ;;  %4831 = vst.msk [vmem:[%s8386_s25] sm:$0xff] %vm4766_vm2, %v6725_v20  ;;  %v8584_v35 = vadd.f32 -0.9189385, %v4420_v34  ;;  %9234 = vst [vmem:[#allocation18_spill] sm:$0xff] %v8626_v22 }
 0x4f3   : > { %v8555_v14 = vadd.f32 %v8252_v13, %v4249_v31  ;;  %v4497_v13 = vand.u32 2147483647, %v8540_v63  ;;  %v4526_v48 = vmul.f32 1.442695, %v4510_v39  ;;  %9235 = vst [vmem:[#allocation19_spill] sm:$0xff] %v8628_v61 }
 0x4f4   : > { %v4247_v54 = vpop.permute.xlu0 %4246 }
 0x4f5   : > { %v8574_v24 = vadd.f32 %v8255_v10, %v4247_v54  ;;  %6732 = vtanh.f32 %v8555_v14  ;;  %v8587_v28 = vmul.f32 -2.0, %v8555_v14  ;;  %v4513_v21 = vsub.f32 0.0, %v4497_v13 }
 0x4f6   : > { %v4253_v59 = vpop.permute.xlu1 %4252 }
 0x4f7   : > { %6734 = vtanh.f32 %v8574_v24  ;;  %v6727_v10 = vpop.eup %6726  ;;  %v8592_v6 = vmul.f32 -2.0, %v8574_v24  ;;  %v8595_v41 = vadd.f32 %v8262_v7, %v4253_v59  ;;  %v4512_v7 = vsub.f32 0.0, %v4496_v47 }
 0x4f8   : > { %v4251_v44 = vpop.permute.xlu0 %4250  ;;  %4834 = vst.msk [vmem:[%s8386_s25 + $0x18] sm:$0xff] %vm4766_vm2, %v6727_v10  ;;  %v4499_v62 = vand.u32 2147483647, %v8587_v28  ;;  %v4532_v25 = vmul.f32 1.442695, %v4513_v21 }
 0x4f9   : > { %v6729_v37 = vpop.eup %6728  ;;  %v8602_v33 = vadd.f32 %v8267_v16, %v4251_v44  ;;  %6736 = vtanh.f32 %v8595_v41  ;;  %v8616_v16 = vmul.f32 -2.0, %v8595_v41  ;;  %v4498_v4 = vand.u32 2147483647, %v8592_v6 }
 0x4fa   : > { %v4257_v8 = vpop.permute.xlu1 %4256  ;;  %4833 = vst.msk [vmem:[%s8386_s25 + $0x10] sm:$0xff] %vm4766_vm2, %v6729_v37  ;;  %v8611_v45 = vpop.eup %6730  ;;  %v4530_v34 = vmul.f32 1.442695, %v4512_v7  ;;  %v9237_v7 = vld [vmem:[#allocation10_spill] sm:$0xff]  ;;  %v9282_v22 = vmax.f32 %v8592_v6, 0.0 }
 0x4fb   : > { %6738 = vtanh.f32 %v8602_v33  ;;  %v8621_v50 = vmul.f32 -2.0, %v8602_v33  ;;  %v8624_v55 = vadd.f32 %v8276_v36, %v4257_v8  ;;  %v4567_v54 = vadd.f32 1.0, %v8611_v45 }
 0x4fc   : > { %v4255_v20 = vpop.permute.xlu0 %4254  ;;  %v4515_v36 = vsub.f32 0.0, %v4499_v62  ;;  %v4501_v13 = vand.u32 2147483647, %v8616_v16  ;;  %v4514_v10 = vsub.f32 0.0, %v4498_v4  ;;  %v9239_v4 = vld [vmem:[#allocation11_spill] sm:$0xff]  ;;  %v9285_v6 = vmax.f32 %v8616_v16, 0.0 }
 0x4fd   : > { %v8631_v31 = vadd.f32 %v9236_v40, %v4255_v20  ;;  %6740 = vtanh.f32 %v8624_v55  ;;  %v8638_v47 = vmul.f32 -2.0, %v8624_v55  ;;  %v4500_v39 = vand.u32 2147483647, %v8621_v50 }
 0x4fe   : > { %v4261_v49 = vpop.permute.xlu1 %4260  ;;  %v4517_v21 = vsub.f32 0.0, %v4501_v13 }
 0x4ff   : > { %6742 = vtanh.f32 %v8631_v31  ;;  %v6733_v59 = vpop.eup %6732  ;;  %v8643_v44 = vmul.f32 -2.0, %v8631_v31  ;;  %v8648_v8 = vadd.f32 %v9237_v7, %v4261_v49  ;;  %v4516_v7 = vsub.f32 0.0, %v4500_v39 }
 0x500   : > { %6744 = vpow2.f32 %v4526_v48  ;;  %v4259_v37 = vpop.permute.xlu0 %4258  ;;  %4836 = vst.msk [vmem:[%s8386_s25 + $0x28] sm:$0xff] %vm4766_vm2, %v6733_v59  ;;  %v4503_v48 = vand.u32 2147483647, %v8638_v47 }
 0x501   : > { %v6735_v19 = vpop.eup %6734  ;;  %6746 = vpow2.f32 %v4532_v25  ;;  %9238 = vst [vmem:[#allocation9_spill] sm:$0xff] %v8648_v8  ;;  %v8656_v20 = vadd.f32 %v9239_v4, %v4259_v37  ;;  %v4536_v25 = vmul.f32 1.442695, %v4515_v36  ;;  %v8661_v49 = vmul.f32 -2.0, %v8648_v8  ;;  %v9243_v36 = vld [vmem:[#allocation12_spill] sm:$0xff] }
 0x502   : > { %6748 = vpow2.f32 %v4530_v34  ;;  %v4265_v40 = vpop.permute.xlu1 %4264  ;;  %4835 = vst.msk [vmem:[%s8386_s25 + $0x20] sm:$0xff] %vm4766_vm2, %v6735_v19  ;;  %v4534_v34 = vmul.f32 1.442695, %v4514_v10  ;;  %v4502_v62 = vand.u32 2147483647, %v8643_v44  ;;  %v4519_v10 = vsub.f32 0.0, %v4503_v48 }
 0x503   : > { %9240 = vst [vmem:[#allocation10_spill] sm:$0xff] %v8656_v20  ;;  %9241 = vst [vmem:[#allocation11_spill] sm:$0xff] %v8661_v49  ;;  %6750 = vlog2.f32 %v4567_v54  ;;  %v6737_v59 = vpop.eup %6736  ;;  %v8665_v58 = vmul.f32 -2.0, %v8656_v20  ;;  %v4505_v54 = vand.u32 2147483647, %v8661_v49  ;;  %v8680_v26 = vadd.f32 %v9243_v36, %v4265_v40 }
 0x504   : > { %v4263_v37 = vpop.permute.xlu0 %4262  ;;  %6752 = vtanh.f32 %v8648_v8  ;;  %4838 = vst.msk [vmem:[%s8386_s25 + $0x38] sm:$0xff] %vm4766_vm2, %v6737_v59  ;;  %v4540_v19 = vmul.f32 1.442695, %v4517_v21  ;;  %v4538_v13 = vmul.f32 1.442695, %v4516_v7  ;;  %v4518_v48 = vsub.f32 0.0, %v4502_v62 }
 0x505   : > { %9242 = vst [vmem:[#allocation20_spill] sm:$0xff] %v8665_v58  ;;  %v6739_v4 = vpop.eup %6738  ;;  %6754 = vtanh.f32 %v8656_v20  ;;  %v4504_v39 = vand.u32 2147483647, %v8665_v58  ;;  %9244 = vst [vmem:[#allocation12_spill] sm:$0xff] %v8680_v26  ;;  %v8683_v12 = vadd.f32 %v9245_v51, %v4263_v37  ;;  %v4521_v21 = vsub.f32 0.0, %v4505_v54 }
 0x506   : > { %v4269_v2 = vpop.permute.xlu1 %4268  ;;  %4837 = vst.msk [vmem:[%s8386_s25 + $0x30] sm:$0xff] %vm4766_vm2, %v6739_v4  ;;  %6756 = vpow2.f32 %v4536_v25  ;;  %v8691_v40 = vmul.f32 -2.0, %v8680_v26  ;;  %v4544_v62 = vmul.f32 1.442695, %v4519_v10  ;;  %v4570_v54 = vmul.f32 -0.5, %v8611_v45 }
 0x507   : > { %9246 = vst [vmem:[#allocation13_spill] sm:$0xff] %v8683_v12  ;;  %v6741_v59 = vpop.eup %6740  ;;  %6758 = vpow2.f32 %v4534_v34  ;;  %v8686_v43 = vadd.f32 %v9247_v57, %v4269_v2  ;;  %v4520_v34 = vsub.f32 0.0, %v4504_v39  ;;  %v8699_v57 = vmul.f32 -2.0, %v8683_v12 }
 0x508   : > { %v4267_v17 = vpop.permute.xlu0 %4266  ;;  %6760 = vtanh.f32 %v8680_v26  ;;  %9249 = vst [vmem:[#allocation21_spill] sm:$0xff] %v8691_v40  ;;  %4840 = vst.msk [vmem:[%s8386_s25 + $0x48] sm:$0xff] %vm4766_vm2, %v6741_v59  ;;  %v4507_v36 = vand.u32 2147483647, %v8691_v40  ;;  %v4542_v39 = vmul.f32 1.442695, %v4518_v48 }
 0x509   : > { %9248 = vst [vmem:[#allocation14_spill] sm:$0xff] %v8686_v43  ;;  %v6743_v4 = vpop.eup %6742  ;;  %6762 = vtanh.f32 %v8683_v12  ;;  %9250 = vst [vmem:[#allocation22_spill] sm:$0xff] %v8699_v57  ;;  %v4506_v59 = vand.u32 2147483647, %v8699_v57  ;;  %v8714_v25 = vmul.f32 -2.0, %v8686_v43 }
 0x50a   : > { %v8695_v51 = vpop.eup %6744  ;;  %v8701_v2 = vpop.permute.xlu1 %4392  ;;  %4839 = vst.msk [vmem:[%s8386_s25 + $0x40] sm:$0xff] %vm4766_vm2, %v6743_v4  ;;  %6764 = vpow2.f32 %v4540_v19  ;;  %v4548_v38 = vmul.f32 1.442695, %v4521_v21  ;;  %v9254_v19 = vld [vmem:[#allocation15_spill] sm:$0xff]  ;;  %v4546_v12 = vmul.f32 1.442695, %v4520_v34 }
 0x50b   : > { %9251 = vst [vmem:[#allocation23_spill] sm:$0xff] %v8701_v2  ;;  %v8705_v7 = vpop.eup %6746  ;;  %6766 = vpow2.f32 %v4538_v13  ;;  %9252 = vst [vmem:[#allocation24_spill] sm:$0xff] %v8714_v25  ;;  %v4523_v2 = vsub.f32 0.0, %v4507_v36  ;;  %v8720_v37 = vadd.f32 %v9254_v19, %v4267_v17  ;;  %v4522_v13 = vsub.f32 0.0, %v4506_v59 }
 0x50c   : > { %v8710_v10 = vpop.eup %6748  ;;  %v8716_v5 = vpop.permute.xlu0 %4390  ;;  %6768 = vtanh.f32 %v8686_v43  ;;  %v4509_v48 = vand.u32 2147483647, %v8714_v25  ;;  %v4573_v36 = vand.u32 2147483647, %v8611_v45 }
 0x50d   : > { %9253 = vst [vmem:[#allocation25_spill] sm:$0xff] %v8716_v5  ;;  %v6751_v4 = vpop.eup %6750  ;;  %9255 = vst [vmem:[#allocation15_spill] sm:$0xff] %v8720_v37  ;;  %6770 = vpow2.f32 %v4544_v62  ;;  %v4552_v61 = vmul.f32 1.442695, %v4523_v2  ;;  %v8727_v21 = vmul.f32 -2.0, %v8720_v37 }
 0x50e   : > { %v8723_v57 = vpop.permute.xlu1 %4396  ;;  %v6753_v40 = vpop.eup %6752  ;;  %6772 = vtanh.f32 %v8720_v37  ;;  %v4550_v34 = vmul.f32 1.442695, %v4522_v13  ;;  %v4525_v59 = vsub.f32 0.0, %v4509_v48  ;;  %v4571_v37 = vadd.f32 1.0, %v4570_v54 }
 0x50f   : > { %9256 = vst [vmem:[#allocation26_spill] sm:$0xff] %v8723_v57  ;;  %9257 = vst [vmem:[#allocation27_spill] sm:$0xff] %v8727_v21  ;;  %v6755_v17 = vpop.eup %6754  ;;  %6774 = vpow2.f32 %v4542_v39  ;;  %v4508_v5 = vand.u32 2147483647, %v8727_v21  ;;  %v4564_v54 = vand.u32 2147483647, %v8695_v51 }
 0x510   : > { %v8731_v19 = vpop.permute.xlu0 %4394  ;;  %4842 = vst.msk [vmem:[%s8386_s25 + $0x58] sm:$0xff] %vm4766_vm2, %v6753_v40  ;;  %v8735_v57 = vpop.eup %6756  ;;  %6776 = vpow2.f32 %v4548_v38  ;;  %4841 = vst.msk [vmem:[%s8386_s25 + $0x50] sm:$0xff] %vm4766_vm2, %v6755_v17  ;;  %v4556_v13 = vmul.f32 1.442695, %v4525_v59  ;;  %v4569_v40 = vmul.f32 0.6931472, %v6751_v4 }
 0x511   : > { %9258 = vst [vmem:[#allocation28_spill] sm:$0xff] %v8731_v19  ;;  %v8742_v62 = vpop.eup %6758  ;;  %6778 = vpow2.f32 %v4546_v12  ;;  %v4524_v2 = vsub.f32 0.0, %v4508_v5  ;;  %v4558_v38 = vadd.f32 1.0, %v8695_v51  ;;  %v4561_v12 = vmul.f32 -0.5, %v8695_v51 }
 0x512   : > { %v4864_v48 = vpop.permute.xlu1 %4863  ;;  %v6761_v19 = vpop.eup %6760  ;;  %6780 = vpow2.f32 %v4552_v61  ;;  %v4572_v5 = vmul.f32 %v8611_v45, %v4571_v37  ;;  %v4585_v59 = vadd.f32 1.0, %v8705_v7  ;;  %vm4574_vm4 = vcmp.lt.f32.partialorder %v4573_v36, 0.0004427343 }
 0x513   : > { %4912 = vst.msk [vmem:[%s8386_s25] sm:$0xff] %vm4911_vm3, %v4864_v48  ;;  %v6763_v17 = vpop.eup %6762  ;;  %6782 = vpow2.f32 %v4550_v34  ;;  %v4588_v39 = vmul.f32 -0.5, %v8705_v7  ;;  %v4562_v37 = vadd.f32 1.0, %v4561_v12  ;;  %v9259_v36 = vmax.f32 %v8468_v52, 0.0 }
 0x514   : > { %4844 = vst.msk [vmem:[%s8386_s25 + $0x68] sm:$0xff] %vm4766_vm2, %v6761_v19  ;;  %v4866_v4 = vpop.permute.xlu0 %4865  ;;  %v8753_v61 = vpop.eup %6764  ;;  %6784 = vlog2.f32 %v4558_v38  ;;  %4843 = vst.msk [vmem:[%s8386_s25 + $0x60] sm:$0xff] %vm4766_vm2, %v6763_v17  ;;  %v4554_v19 = vmul.f32 1.442695, %v4524_v2  ;;  %v4575_v45 = vsel %vm4574_vm4, %v4572_v5, %v4569_v40  ;;  %v4576_v38 = vadd.f32 1.0, %v8710_v10 }
 0x515   : > { %4913 = vst.msk [vmem:[%s8386_s25 + $0x8] sm:$0xff] %vm4911_vm3, %v4866_v4  ;;  %v8762_v34 = vpop.eup %6766  ;;  %6786 = vpow2.f32 %v4556_v13  ;;  %v4579_v17 = vmul.f32 -0.5, %v8710_v10  ;;  %v4703_v2 = vadd.f32 %v4575_v45, %v9259_v36  ;;  %v4591_v40 = vand.u32 2147483647, %v8705_v7 }
 0x516   : > { %v4868_v48 = vpop.permute.xlu1 %4867  ;;  %v6769_v21 = vpop.eup %6768  ;;  %6788 = vlog2.f32 %v4585_v59  ;;  %vm8778_vm5 = vcmp.lt.f32.partialorder %v4564_v54, 0.0004427343  ;;  %v4589_v13 = vadd.f32 1.0, %v4588_v39  ;;  %v4582_v36 = vand.u32 2147483647, %v8710_v10 }
 0x517   : > { %4914 = vst.msk [vmem:[%s8386_s25 + $0x10] sm:$0xff] %vm4911_vm3, %v4868_v48  ;;  %v8769_v4 = vpop.eup %6770  ;;  %6790 = vlog2.f32 %v4576_v38  ;;  %v4603_v5 = vadd.f32 1.0, %v8735_v57  ;;  %v4606_v54 = vmul.f32 -0.5, %v8735_v57  ;;  %v4580_v39 = vadd.f32 1.0, %v4579_v17 }
 0x518   : > { %4846 = vst.msk [vmem:[%s8386_s25 + $0x78] sm:$0xff] %vm4766_vm2, %v6769_v21  ;;  %v4872_v25 = vpop.permute.xlu0 %4871  ;;  %v6773_v12 = vpop.eup %6772  ;;  %v9262_v21 = vsub.f32 0.6931472, %v8464_v15  ;;  %6792 = vpow2.f32 %v4554_v19  ;;  %v4594_v15 = vadd.f32 1.0, %v8742_v62  ;;  %vm8801_vm6 = vcmp.lt.f32.partialorder %v4591_v40, 0.0004427343 }
 0x519   : > { %4916 = vst.msk [vmem:[%s8386_s25 + $0x20] sm:$0xff] %vm4911_vm3, %v4872_v25  ;;  %v8784_v52 = vpop.eup %6774  ;;  %v4563_v25 = vmul.f32 %v8695_v51, %v4562_v37  ;;  %6794 = vlog2.f32 %v4603_v5  ;;  %v4609_v26 = vand.u32 2147483647, %v8735_v57  ;;  %v4597_v19 = vmul.f32 -0.5, %v8742_v62 }
 0x51a   : > { %v4719_v45 = vsub.f32 %v9262_v21, %v4703_v2  ;;  %4845 = vst.msk [vmem:[%s8386_s25 + $0x70] sm:$0xff] %vm4766_vm2, %v6773_v12  ;;  %v4870_v59 = vpop.permute.xlu1 %4869  ;;  %v8793_v43 = vpop.eup %6776  ;;  %v4590_v37 = vmul.f32 %v8705_v7, %v4589_v13  ;;  %v4607_v17 = vadd.f32 1.0, %v4606_v54  ;;  %6796 = vlog2.f32 %v4594_v15 }
 0x51b   : > { %4915 = vst.msk [vmem:[%s8386_s25 + $0x18] sm:$0xff] %vm4911_vm3, %v4870_v59  ;;  %v8799_v38 = vpop.eup %6778  ;;  %v4621_v40 = vadd.f32 1.0, %v8753_v61  ;;  %vm8816_vm7 = vcmp.lt.f32.partialorder %v4582_v36, 0.0004427343  ;;  %v4600_v20 = vand.u32 2147483647, %v8742_v62  ;;  %v4581_v49 = vmul.f32 %v8710_v10, %v4580_v39 }
 0x51c   : > { %v4735_v2 = vmul.f32 2.0, %v4719_v45  ;;  %v4876_v21 = vpop.permute.xlu0 %4875  ;;  %v8807_v51 = vpop.eup %6780  ;;  %v4624_v7 = vmul.f32 -0.5, %v8753_v61  ;;  %v4598_v54 = vadd.f32 1.0, %v4597_v19  ;;  %v4627_v15 = vand.u32 2147483647, %v8753_v61 }
 0x51d   : > { %4918 = vst.msk [vmem:[%s8386_s25 + $0x30] sm:$0xff] %vm4911_vm3, %v4876_v21  ;;  %v8813_v45 = vpop.eup %6782  ;;  %6798 = vlog2.f32 %v4621_v40  ;;  %v4612_v21 = vadd.f32 1.0, %v8762_v34  ;;  %vm8830_vm8 = vcmp.lt.f32.partialorder %v4609_v26, 0.0004427343  ;;  %v4615_v40 = vmul.f32 -0.5, %v8762_v34 }
 0x51e   : > { %9265 = vst [vmem:[#allocation29_spill] sm:$0xff] %v8813_v45  ;;  %v4751_v59 = vsub.f32 %v8560_v3, %v4735_v2  ;;  %v4874_v58 = vpop.permute.xlu1 %4873  ;;  %v6785_v13 = vpop.eup %6784  ;;  %v4625_v19 = vadd.f32 1.0, %v4624_v7  ;;  %vm8840_vm9 = vcmp.lt.f32.partialorder %v4600_v20, 0.0004427343  ;;  %v4639_v39 = vadd.f32 1.0, %v8769_v4 }
 0x51f   : > { %4917 = vst.msk [vmem:[%s8386_s25 + $0x28] sm:$0xff] %vm4911_vm3, %v4874_v58  ;;  %v8826_v3 = vpop.eup %6786  ;;  %v4560_v2 = vmul.f32 0.6931472, %v6785_v13  ;;  %v4608_v58 = vmul.f32 %v8735_v57, %v4607_v17  ;;  %6800 = vlog2.f32 %v4612_v21  ;;  %v9273_v57 = vmax.f32 %v8528_v60, 0.0 }
 0x520   : > { %9268 = vst [vmem:[#allocation30_spill] sm:$0xff] %v8826_v3  ;;  %v4770_v36 = vsel %vm4766_vm2, %v4751_v59, 0.0  ;;  %v4880_v45 = vpop.permute.xlu0 %4879  ;;  %v6789_v3 = vpop.eup %6788  ;;  %v4599_v48 = vmul.f32 %v8742_v62, %v4598_v54  ;;  %vm8851_vm10 = vcmp.lt.f32.partialorder %v4627_v15, 0.0004427343  ;;  %6802 = vlog2.f32 %v4639_v39 }
 0x521   : > { %4771 = vadd.xlane.f32.xlu1 %v4770_v36  ;;  %4920 = vst.msk [vmem:[%s8386_s25 + $0x40] sm:$0xff] %vm4911_vm3, %v4880_v45  ;;  %v4566_v59 = vsel %vm8778_vm5, %v4563_v25, %v4560_v2  ;;  %v4642_v45 = vmul.f32 -0.5, %v8769_v4  ;;  %v6791_v13 = vpop.eup %6790  ;;  %v4587_v7 = vmul.f32 0.6931472, %v6789_v3  ;;  %v4616_v36 = vadd.f32 1.0, %v4615_v40 }
 0x522   : > { %v4878_v10 = vpop.permute.xlu1 %4877  ;;  %v4702_v17 = vadd.f32 %v4566_v59, %v9273_v57  ;;  %v4578_v20 = vmul.f32 0.6931472, %v6791_v13  ;;  %v4618_v2 = vand.u32 2147483647, %v8762_v34  ;;  %v8856_v8 = vpop.eup %6792  ;;  %v9276_v60 = vsub.f32 0.6931472, %v8471_v53 }
 0x523   : > { %4919 = vst.msk [vmem:[%s8386_s25 + $0x38] sm:$0xff] %vm4911_vm3, %v4878_v10  ;;  %v4593_v59 = vsel %vm8801_vm6, %v4590_v37, %v4587_v7  ;;  %v4626_v62 = vmul.f32 %v8753_v61, %v4625_v19  ;;  %v4630_v54 = vadd.f32 1.0, %v8784_v52  ;;  %v6795_v15 = vpop.eup %6794  ;;  %v9277_v40 = vmax.f32 %v8540_v63, 0.0 }
 0x524   : > { %v4884_v21 = vpop.permute.xlu0 %4883  ;;  %v4718_v3 = vsub.f32 %v9276_v60, %v4702_v17  ;;  %v4584_v39 = vsel %vm8816_vm7, %v4581_v49, %v4578_v20  ;;  %v4643_v53 = vadd.f32 1.0, %v4642_v45  ;;  %v4645_v57 = vand.u32 2147483647, %v8769_v4  ;;  %v6797_v12 = vpop.eup %6796 }
 0x525   : > { %4922 = vst.msk [vmem:[%s8386_s25 + $0x50] sm:$0xff] %vm4911_vm3, %v4884_v21  ;;  %v4705_v10 = vadd.f32 %v4593_v59, %v9277_v40  ;;  %v9278_v17 = vmax.f32 %v8545_v1, 0.0  ;;  %v4605_v61 = vmul.f32 0.6931472, %v6795_v15  ;;  %6804 = vlog2.f32 %v4630_v54 }
 0x526   : > { %v4882_v13 = vpop.permute.xlu1 %4881  ;;  %v4734_v37 = vmul.f32 2.0, %v4718_v3  ;;  %v9279_v63 = vsub.f32 0.6931472, %v8497_v29  ;;  %v4596_v21 = vmul.f32 0.6931472, %v6797_v12  ;;  %v4617_v49 = vmul.f32 %v8762_v34, %v4616_v36 }
 0x527   : > { %v4704_v7 = vadd.f32 %v4584_v39, %v9278_v17  ;;  %4921 = vst.msk [vmem:[%s8386_s25 + $0x48] sm:$0xff] %vm4911_vm3, %v4882_v13  ;;  %v4633_v45 = vmul.f32 -0.5, %v8784_v52  ;;  %v6799_v20 = vpop.eup %6798  ;;  %v9280_v1 = vsub.f32 0.6931472, %v8505_v56  ;;  %v4611_v59 = vsel %vm8830_vm8, %v4608_v58, %v4605_v61 }
 0x528   : > { %v4721_v19 = vsub.f32 %v9279_v63, %v4705_v10  ;;  %v4888_v5 = vpop.permute.xlu0 %4887  ;;  %v4750_v60 = vsub.f32 %v8562_v32, %v4734_v37  ;;  %v4657_v29 = vadd.f32 1.0, %v8793_v43  ;;  %v9281_v34 = vmax.f32 %v8587_v28, 0.0 }
 0x529   : > { %v4720_v3 = vsub.f32 %v9280_v1, %v4704_v7  ;;  %4924 = vst.msk [vmem:[%s8386_s25 + $0x60] sm:$0xff] %vm4911_vm3, %v4888_v5  ;;  %v4602_v15 = vsel %vm8840_vm9, %v4599_v48, %v4596_v21  ;;  %v4623_v40 = vmul.f32 0.6931472, %v6799_v20  ;;  %v6801_v32 = vpop.eup %6800  ;;  %v4634_v13 = vadd.f32 1.0, %v4633_v45 }
 0x52a   : > { %v4737_v54 = vmul.f32 2.0, %v4721_v19  ;;  %v4707_v36 = vadd.f32 %v4611_v59, %v9281_v34  ;;  %v4886_v10 = vpop.permute.xlu1 %4885  ;;  %v4767_v56 = vsel %vm4766_vm2, %v4750_v60, 0.0  ;;  %v4706_v58 = vadd.f32 %v4602_v15, %v9282_v22  ;;  %v6803_v19 = vpop.eup %6802 }
 0x52b   : > { %v4736_v39 = vmul.f32 2.0, %v4720_v3  ;;  %4923 = vst.msk [vmem:[%s8386_s25 + $0x58] sm:$0xff] %vm4911_vm3, %v4886_v10  ;;  %4768 = vadd.xlane.f32.xlu0 %v4767_v56  ;;  %v9283_v28 = vsub.f32 0.6931472, %v8555_v14  ;;  %v4629_v26 = vsel %vm8851_vm10, %v4626_v62, %v4623_v40  ;;  %v4614_v48 = vmul.f32 0.6931472, %v6801_v32 }
 0x52c   : > { %v4753_v12 = vsub.f32 %v8568_v27, %v4737_v54  ;;  %v9284_v17 = vsub.f32 0.6931472, %v8574_v24  ;;  %v4709_v61 = vadd.f32 %v4629_v26, %v9285_v6  ;;  %vm4619_vm11 = vcmp.lt.f32.partialorder %v4618_v2, 0.0004427343 }
 0x52d   : > { %v4723_v37 = vsub.f32 %v9283_v28, %v4707_v36  ;;  %v4636_v63 = vand.u32 2147483647, %v8784_v52  ;;  %v4752_v14 = vsub.f32 %v8570_v11, %v4736_v39  ;;  %v4620_v5 = vsel %vm4619_vm11, %v4617_v49, %v4614_v48 }
 0x52e   : > { %v4722_v7 = vsub.f32 %v9284_v17, %v4706_v58  ;;  %v4776_v27 = vsel %vm4766_vm2, %v4753_v12, 0.0  ;;  %v4890_v25 = vpop.permute.xlu1 %4889  ;;  %v9286_v45 = vsub.f32 0.6931472, %v8595_v41  ;;  %v9287_v24 = vmax.f32 %v8621_v50, 0.0  ;;  %v9296_v17 = vld [vmem:[#allocation29_spill] sm:$0xff] }
 0x52f   : > { %v4739_v21 = vmul.f32 2.0, %v4723_v37  ;;  %v4644_v16 = vmul.f32 %v8769_v4, %v4643_v53  ;;  %4925 = vst.msk [vmem:[%s8386_s25 + $0x68] sm:$0xff] %vm4911_vm3, %v4890_v25  ;;  %4777 = vadd.xlane.f32.xlu0 %v4776_v27  ;;  %v4641_v2 = vmul.f32 0.6931472, %v6803_v19  ;;  %vm4646_vm12 = vcmp.lt.f32.partialorder %v4645_v57, 0.0004427343  ;;  %v6805_v11 = vpop.eup %6804 }
 0x530   : > { %v4738_v62 = vmul.f32 2.0, %v4722_v7  ;;  %v4725_v20 = vsub.f32 %v9286_v45, %v4709_v61  ;;  %v4708_v60 = vadd.f32 %v4620_v5, %v9287_v24  ;;  %v4635_v1 = vmul.f32 %v8784_v52, %v4634_v13  ;;  %v9297_v61 = vld [vmem:[#allocation11_spill] sm:$0xff]  ;;  %v9298_v19 = vld [vmem:[#allocation10_spill] sm:$0xff]  ;;  %v9300_v25 = vld [vmem:[#allocation12_spill] sm:$0xff] }
 0x531   : > { %6806 = vlog2.f32 %v4657_v29  ;;  %v4755_v49 = vsub.f32 %v8576_v42, %v4739_v21  ;;  %v9288_v59 = vsub.f32 0.6931472, %v8602_v33  ;;  %v4773_v54 = vsel %vm4766_vm2, %v4752_v14, 0.0  ;;  %v9299_v14 = vld [vmem:[#allocation20_spill] sm:$0xff]  ;;  %v9301_v45 = vld [vmem:[#allocation19_spill] sm:$0xff] }
 0x532   : > { %v4754_v3 = vsub.f32 %v8578_v9, %v4738_v62  ;;  %v4741_v41 = vmul.f32 2.0, %v4725_v20  ;;  %v4647_v4 = vsel %vm4646_vm12, %v4644_v16, %v4641_v2  ;;  %v4632_v53 = vmul.f32 0.6931472, %v6805_v11  ;;  %v9302_v2 = vld [vmem:[#allocation30_spill] sm:$0xff] }
 0x533   : > { %v4724_v50 = vsub.f32 %v9288_v59, %v4708_v60  ;;  %vm4637_vm13 = vcmp.lt.f32.partialorder %v4636_v63, 0.0004427343  ;;  %v9289_v52 = vmax.f32 %v8638_v47, 0.0  ;;  %v4660_v36 = vmul.f32 -0.5, %v8793_v43  ;;  %4774 = vadd.xlane.f32.xlu0 %v4773_v54 }
 0x534   : > { %v4779_v34 = vsel %vm4766_vm2, %v4754_v3, 0.0  ;;  %v4454_v42 = vsub.f32 0.6931472, %v8631_v31  ;;  %v4757_v9 = vsub.f32 %v8582_v0, %v4741_v41  ;;  %v4638_v33 = vsel %vm4637_vm13, %v4635_v1, %v4632_v53  ;;  %v9304_v53 = vld [vmem:[#allocation13_spill] sm:$0xff] }
 0x535   : > { %v4740_v57 = vmul.f32 2.0, %v4724_v50  ;;  %v4711_v29 = vadd.f32 %v4647_v4, %v9289_v52  ;;  %4780 = vadd.xlane.f32.xlu1 %v4779_v34  ;;  %v4648_v15 = vadd.f32 1.0, %v8799_v38  ;;  %v4782_v40 = vsel %vm4766_vm2, %v4755_v49, 0.0 }
 0x536   : > { %v9290_v32 = vsub.f32 0.6931472, %v8624_v55  ;;  %v9291_v47 = vmax.f32 %v8643_v44, 0.0  ;;  %v9292_v31 = vsub.f32 %v8520_v46, %v8513_v18  ;;  %v9293_v0 = vsub.f32 %v8523_v23, %v8530_v30  ;;  %v9294_v44 = vld [vmem:[#allocation9_spill] sm:$0xff]  ;;  %v9295_v23 = vld [vmem:[#allocation18_spill] sm:$0xff] }
 0x537   : > { %v4756_v10 = vsub.f32 %v8584_v35, %v4740_v57  ;;  %6808 = vlog2.f32 %v4648_v15  ;;  %v4675_v13 = vadd.f32 1.0, %v8807_v51  ;;  %v4661_v28 = vadd.f32 1.0, %v4660_v36  ;;  %4783 = vadd.xlane.f32.xlu0 %v4782_v40  ;;  %v9305_v57 = vld [vmem:[#allocation14_spill] sm:$0xff]  ;;  %v9307_v40 = vld [vmem:[#allocation23_spill] sm:$0xff] }
 0x538   : > { %v4727_v56 = vsub.f32 %v9290_v32, %v4711_v29  ;;  %v4710_v39 = vadd.f32 %v4638_v33, %v9291_v47  ;;  %v8937_v22 = vadd.f32 -0.9189385, %v9292_v31  ;;  %v8942_v58 = vadd.f32 -0.9189385, %v9293_v0  ;;  %v9309_v0 = vld [vmem:[#allocation24_spill] sm:$0xff] }
 0x539   : > { %v4785_v35 = vsel %vm4766_vm2, %v4756_v10, 0.0  ;;  %v4457_v37 = vsub.f32 0.6931472, %v9294_v44  ;;  %v4788_v18 = vsel %vm4766_vm2, %v4757_v9, 0.0  ;;  %v4663_v46 = vand.u32 2147483647, %v8793_v43 }
 0x53a   : > { %v4743_v55 = vmul.f32 2.0, %v4727_v56  ;;  %v4726_v12 = vsub.f32 %v4454_v42, %v4710_v39  ;;  %4786 = vadd.xlane.f32.xlu1 %v4785_v35  ;;  %6810 = vlog2.f32 %v4675_v13  ;;  %v4651_v48 = vmul.f32 -0.5, %v8799_v38  ;;  %v9306_v42 = vld [vmem:[#allocation22_spill] sm:$0xff] }
 0x53b   : > { %v4666_v7 = vadd.f32 1.0, %v9296_v17  ;;  %v6807_v6 = vpop.eup %6806  ;;  %v4489_v63 = vmax.f32 %v9297_v61, 0.0  ;;  %v4456_v27 = vsub.f32 0.6931472, %v9298_v19  ;;  %v4488_v21 = vmax.f32 %v9299_v14, 0.0  ;;  %4789 = vadd.xlane.f32.xlu0 %v4788_v18  ;;  %v9308_v10 = vld [vmem:[#allocation6_spill] sm:$0xff] }
 0x53c   : > { %v4759_v30 = vsub.f32 %v9295_v23, %v4743_v55  ;;  %v4742_v26 = vmul.f32 2.0, %v4726_v12  ;;  %v4678_v5 = vmul.f32 -0.5, %v8807_v51  ;;  %v4459_v62 = vsub.f32 0.6931472, %v9300_v25 }
 0x53d   : > { %v4659_v24 = vmul.f32 0.6931472, %v6807_v6  ;;  %v4662_v60 = vmul.f32 %v8793_v43, %v4661_v28  ;;  %vm4664_vm14 = vcmp.lt.f32.partialorder %v4663_v46, 0.0004427343  ;;  %v4654_v16 = vand.u32 2147483647, %v8799_v38 }
 0x53e   : > { %v4758_v20 = vsub.f32 %v9301_v45, %v4742_v26  ;;  %6812 = vlog2.f32 %v4666_v7  ;;  %v4693_v1 = vadd.f32 1.0, %v9302_v2  ;;  %v4794_v11 = vsel %vm4766_vm2, %v4759_v30, 0.0  ;;  %v9303_v43 = vld [vmem:[#allocation21_spill] sm:$0xff] }
 0x53f   : > { %v4665_v3 = vsel %vm4664_vm14, %v4662_v60, %v4659_v24  ;;  %v4652_v41 = vadd.f32 1.0, %v4651_v48  ;;  %v4679_v50 = vadd.f32 1.0, %v4678_v5  ;;  %v4684_v54 = vadd.f32 1.0, %v8856_v8  ;;  %4795 = vadd.xlane.f32.xlu0 %v4794_v11  ;;  %v9310_v30 = vld [vmem:[#allocation25_spill] sm:$0xff]  ;;  %v9313_v24 = vld [vmem:[#allocation8_spill] sm:$0xff]  ;;  %v9314_v11 = vld [vmem:[#allocation27_spill] sm:$0xff] }
 0x540   : > { %v4791_v49 = vsel %vm4766_vm2, %v4758_v20, 0.0  ;;  %v4713_v59 = vadd.f32 %v4665_v3, %v4489_v63  ;;  %6814 = vlog2.f32 %v4693_v1  ;;  %v4491_v4 = vmax.f32 %v9303_v43, 0.0  ;;  %v9311_v26 = vld [vmem:[#allocation5_spill] sm:$0xff]  ;;  %v9312_v20 = vld [vmem:[#allocation26_spill] sm:$0xff] }
 0x541   : > { %4792 = vadd.xlane.f32.xlu1 %v4791_v49  ;;  %v4458_v34 = vsub.f32 0.6931472, %v9304_v53  ;;  %v4461_v52 = vsub.f32 0.6931472, %v9305_v57  ;;  %v4669_v29 = vmul.f32 -0.5, %v9296_v17  ;;  %v6809_v36 = vpop.eup %6808  ;;  %v4490_v9 = vmax.f32 %v9306_v42, 0.0 }
 0x542   : > { %v4729_v33 = vsub.f32 %v4457_v37, %v4713_v59  ;;  %v4681_v15 = vand.u32 2147483647, %v8807_v51  ;;  %6816 = vlog2.f32 %v4684_v54  ;;  %v4427_v32 = vsub.f32 %v9308_v10, %v9307_v40  ;;  %v9317_v10 = vld [vmem:[#allocation7_spill] sm:$0xff] }
 0x543   : > { %v4650_v56 = vmul.f32 0.6931472, %v6809_v36  ;;  %v4653_v47 = vmul.f32 %v8799_v38, %v4652_v41  ;;  %v4696_v39 = vmul.f32 -0.5, %v9302_v2  ;;  %v4493_v13 = vmax.f32 %v9309_v0, 0.0 }
 0x544   : > { %v6811_v31 = vpop.eup %6810  ;;  %v4745_v35 = vmul.f32 2.0, %v4729_v33  ;;  %vm4655_vm15 = vcmp.lt.f32.partialorder %v4654_v16, 0.0004427343  ;;  %v4680_v55 = vmul.f32 %v8807_v51, %v4679_v50  ;;  %v4670_v44 = vadd.f32 1.0, %v4669_v29  ;;  %v9315_v33 = vld [vmem:[#allocation15_spill] sm:$0xff] }
 0x545   : > { %v4656_v12 = vsel %vm4655_vm15, %v4653_v47, %v4650_v56  ;;  %v4677_v28 = vmul.f32 0.6931472, %v6811_v31  ;;  %v4687_v37 = vmul.f32 -0.5, %v8856_v8  ;;  %vm4682_vm0 = vcmp.lt.f32.partialorder %v4681_v15, 0.0004427343 }
 0x546   : > { %v4761_v18 = vsub.f32 %v8937_v22, %v4745_v35  ;;  %v4712_v46 = vadd.f32 %v4656_v12, %v4488_v21  ;;  %v4672_v38 = vand.u32 2147483647, %v9296_v17  ;;  %v5058_v23 = vadd.f32 -0.9189385, %v4427_v32 }
 0x547   : > { %v4426_v48 = vsub.f32 %v9311_v26, %v9310_v30  ;;  %v4683_v7 = vsel %vm4682_vm0, %v4680_v55, %v4677_v28  ;;  %v4697_v6 = vadd.f32 1.0, %v4696_v39  ;;  %v4699_v14 = vand.u32 2147483647, %v9302_v2 }
 0x548   : > { %v6813_v61 = vpop.eup %6812  ;;  %v4800_v51 = vsel %vm4766_vm2, %v4761_v18, 0.0  ;;  %v4728_v63 = vsub.f32 %v4456_v27, %v4712_v46  ;;  %v4715_v19 = vadd.f32 %v4683_v7, %v4491_v4  ;;  %v4671_v22 = vmul.f32 %v9296_v17, %v4670_v44  ;;  %v9318_v44 = vld [vmem:[#allocation16_spill] sm:$0xff] }
 0x549   : > { %4801 = vadd.xlane.f32.xlu0 %v4800_v51  ;;  %v4668_v5 = vmul.f32 0.6931472, %v6813_v61  ;;  %v4688_v21 = vadd.f32 1.0, %v4687_v37  ;;  %v4690_v25 = vand.u32 2147483647, %v8856_v8  ;;  %v4429_v60 = vsub.f32 %v9313_v24, %v9312_v20  ;;  %v9319_v37 = vld [vmem:[#allocation17_spill] sm:$0xff] }
 0x54a   : > { %v6815_v45 = vpop.eup %6814  ;;  %v4744_v16 = vmul.f32 2.0, %v4728_v63  ;;  %v4731_v1 = vsub.f32 %v4459_v62, %v4715_v19  ;;  %vm4673_vm1 = vcmp.lt.f32.partialorder %v4672_v38, 0.0004427343  ;;  %v4492_v49 = vmax.f32 %v9314_v11, 0.0 }
 0x54b   : > { %v4674_v27 = vsel %vm4673_vm1, %v4671_v22, %v4668_v5  ;;  %v4695_v3 = vmul.f32 0.6931472, %v6815_v45  ;;  %v4698_v41 = vmul.f32 %v9302_v2, %v4697_v6  ;;  %vm4700_vm4 = vcmp.lt.f32.partialorder %v4699_v14, 0.0004427343  ;;  %v9316_v2 = vld [vmem:[#allocation28_spill] sm:$0xff] }
 0x54c   : > { %v6817_v59 = vpop.eup %6816  ;;  %v4760_v50 = vsub.f32 %v8942_v58, %v4744_v16  ;;  %v4747_v17 = vmul.f32 2.0, %v4731_v1  ;;  %v4714_v54 = vadd.f32 %v4674_v27, %v4490_v9  ;;  %v4689_v53 = vmul.f32 %v8856_v8, %v4688_v21 }
 0x54d   : > { %v4701_v43 = vsel %vm4700_vm4, %v4698_v41, %v4695_v3  ;;  %v4686_v4 = vmul.f32 0.6931472, %v6817_v59  ;;  %vm4691_vm5 = vcmp.lt.f32.partialorder %v4690_v25, 0.0004427343  ;;  %v4460_v15 = vsub.f32 0.6931472, %v9315_v33 }
 0x54e   : > { %v4797_v62 = vsel %vm4766_vm2, %v4760_v50, 0.0  ;;  %v4763_v29 = vsub.f32 %v5058_v23, %v4747_v17  ;;  %v4730_v36 = vsub.f32 %v4458_v34, %v4714_v54  ;;  %v4717_v42 = vadd.f32 %v4701_v43, %v4493_v13 }
 0x54f   : > { %v5057_v40 = vadd.f32 -0.9189385, %v4426_v48  ;;  %v4428_v32 = vsub.f32 %v9317_v10, %v9316_v2  ;;  %4798 = vadd.xlane.f32.xlu1 %v4797_v62  ;;  %v4692_v58 = vsel %vm4691_vm5, %v4689_v53, %v4686_v4  ;;  %v5060_v39 = vadd.f32 -0.9189385, %v4429_v60 }
 0x550   : > { %v4806_v9 = vsel %vm4766_vm2, %v4763_v29, 0.0  ;;  %v4746_v56 = vmul.f32 2.0, %v4730_v36  ;;  %v4733_v8 = vsub.f32 %v4461_v52, %v4717_v42  ;;  %v4716_v47 = vadd.f32 %v4692_v58, %v4492_v49 }
 0x551   : > { %4807 = vadd.xlane.f32.xlu0 %v4806_v9  ;;  %v5059_v13 = vadd.f32 -0.9189385, %v4428_v32  ;;  %vm4928_vm6 = vcmask 138368  }
 0x552   : > { %v4762_v31 = vsub.f32 %v5057_v40, %v4746_v56  ;;  %v4749_v34 = vmul.f32 2.0, %v4733_v8  ;;  %v4732_v0 = vsub.f32 %v4460_v15, %v4716_v47 }
 0x554   : > { %v4803_v35 = vsel %vm4766_vm2, %v4762_v31, 0.0  ;;  %v4765_v55 = vsub.f32 %v5060_v39, %v4749_v34  ;;  %v4748_v12 = vmul.f32 2.0, %v4732_v0 }
 0x555   : > { %4804 = vadd.xlane.f32.xlu1 %v4803_v35 }
 0x556   : > { %v4812_v28 = vsel %vm4766_vm2, %v4765_v55, 0.0  ;;  %v4764_v57 = vsub.f32 %v5059_v13, %v4748_v12 }
 0x557   : > { %4813 = vadd.xlane.f32.xlu0 %v4812_v28 }
 0x558   : > { %v4809_v52 = vsel %vm4766_vm2, %v4764_v57, 0.0 }
 0x559   : > { %4810 = vadd.xlane.f32.xlu1 %v4809_v52 }
 0x56a   : > { %4893 = vrot.lane.b32.xlu1 %v9318_v44, %s6882_s19 }
 0x56d   : > { %4891 = vrot.lane.b32.xlu0 %v9319_v37, %s6882_s19 }
 0x5ae   : > { %v4772_v18 = vpop.xlane.xlu1 %4771 }
 0x5af   : > { %4930 = vst.msk [vmem:[%s8386_s25 + $0x8] sm:$0xff] %vm4928_vm6, %v4772_v18 }
 0x5b8   : > { %v4769_v46 = vpop.xlane.xlu0 %4768 }
 0x5b9   : > { %4929 = vst.msk [vmem:[%s8386_s25] sm:$0xff] %vm4928_vm6, %v4769_v46 }
 0x5bc   : > { %v4778_v38 = vpop.xlane.xlu0 %4777 }
 0x5bd   : > { %4932 = vst.msk [vmem:[%s8386_s25 + $0x18] sm:$0xff] %vm4928_vm6, %v4778_v38 }
 0x5c0   : > { %v4775_v23 = vpop.xlane.xlu0 %4774 }
 0x5c1   : > { %4931 = vst.msk [vmem:[%s8386_s25 + $0x10] sm:$0xff] %vm4928_vm6, %v4775_v23 }
 0x5c2   : > { %v4781_v30 = vpop.xlane.xlu1 %4780 }
 0x5c3   : > { %4933 = vst.msk [vmem:[%s8386_s25 + $0x20] sm:$0xff] %vm4928_vm6, %v4781_v30 }
 0x5c4   : > { %v4784_v26 = vpop.xlane.xlu0 %4783 }
 0x5c5   : > { %4934 = vst.msk [vmem:[%s8386_s25 + $0x28] sm:$0xff] %vm4928_vm6, %v4784_v26 }
 0x5c7   : > { %v4787_v48 = vpop.xlane.xlu1 %4786 }
 0x5c8   : > { %4935 = vst.msk [vmem:[%s8386_s25 + $0x30] sm:$0xff] %vm4928_vm6, %v4787_v48  ;;  %v4790_v7 = vpop.xlane.xlu0 %4789 }
 0x5c9   : > { %4936 = vst.msk [vmem:[%s8386_s25 + $0x38] sm:$0xff] %vm4928_vm6, %v4790_v7 }
 0x5cc   : > { %v4796_v61 = vpop.xlane.xlu0 %4795 }
 0x5cd   : > { %4938 = vst.msk [vmem:[%s8386_s25 + $0x48] sm:$0xff] %vm4928_vm6, %v4796_v61 }
 0x5ce   : > { %v4793_v6 = vpop.xlane.xlu1 %4792 }
 0x5cf   : > { %4937 = vst.msk [vmem:[%s8386_s25 + $0x40] sm:$0xff] %vm4928_vm6, %v4793_v6 }
 0x5d6   : > { %v4802_v51 = vpop.xlane.xlu0 %4801 }
 0x5d7   : > { %4940 = vst.msk [vmem:[%s8386_s25 + $0x58] sm:$0xff] %vm4928_vm6, %v4802_v51 }
 0x5dc   : > { %v4799_v63 = vpop.xlane.xlu1 %4798 }
 0x5dd   : > { %4939 = vst.msk [vmem:[%s8386_s25 + $0x50] sm:$0xff] %vm4928_vm6, %v4799_v63 }
 0x5de   : > { %v4808_v19 = vpop.xlane.xlu0 %4807 }
 0x5df   : > { %4942 = vst.msk [vmem:[%s8386_s25 + $0x68] sm:$0xff] %vm4928_vm6, %v4808_v19 }
 0x5e2   : > { %v4805_v14 = vpop.xlane.xlu1 %4804 }
 0x5e3   : > { %4941 = vst.msk [vmem:[%s8386_s25 + $0x60] sm:$0xff] %vm4928_vm6, %v4805_v14 }
 0x5e4   : > { %v4814_v5 = vpop.xlane.xlu0 %4813 }
 0x5e6   : > { %v4811_v22 = vpop.xlane.xlu1 %4810 }
 0x5e8   : > { %v4892_v21 = vpop.permute.xlu0 %4891 }
 0x5e9   : > { %4926 = vst.msk [vmem:[%s8386_s25 + $0x70] sm:$0xff] %vm4911_vm3, %v4892_v21 }
 0x5ea   : > { %4943 = vst.msk [vmem:[%s8386_s25 + $0x70] sm:$0xff] %vm4928_vm6, %v4811_v22  ;;  %v4894_v25 = vpop.permute.xlu1 %4893 }
 0x5eb   : > { %4927 = vst.msk [vmem:[%s8386_s25 + $0x78] sm:$0xff] %vm4911_vm3, %v4894_v25 }
 0x5ec   : > { %4944 = vst.msk [vmem:[%s8386_s25 + $0x78] sm:$0xff] %vm4928_vm6, %v4814_v5 }
 0x5ed   : > { %6831 = shalt.err (!%p6828_p3)
}
 0x5ee   : > { %s6832_s23 = scalar_lea.hbm %s9040_s17, 2048  ;;  %s6836_s26 = scalar_lea.hbm %s9102_s8, 4096 }
 0x5ef   : > { %p6833_p4 = scmp.ne.s32.totalorder %s9040_s17, %s6832_s23  ;;  %p6837_p9 = scmp.lt.u32.totalorder %s9040_s17, %s9102_s8 }
 0x5f0   : > { %p6838_p10 = scmp.lt.u32.totalorder %s6836_s26, %s6832_s23  ;;  %p6840_p12 = scmp.lt.u32.totalorder %s6832_s23, %s9040_s17 }
 0x5f1   : > { %p6834_p7 = pnand %p6833_p4, %p6970_p5 }
 0x5f2   : > { %p6839_p11 = por %p6838_p10, %p6837_p9 }
 0x5f3   : > { %p6835_p8 = pneg %p6834_p7 }
 0x5f4   : > { %p6841_p13 = por %p6840_p12, %p6839_p11 }
 0x5f6   : > { %p6842_p0 = pnand %p6841_p13, %p6835_p8 }
 0x5f8   : > { %6845 = shalt.err (!%p6842_p0)
}
 0x5f9   : > { %s6886_s18 = smov 128  }
 0x5fa   : > { %6615 = dma.vmem_to_hbm [thread:$0]  (%p6970_p5), %s9044_s10, 2048, %s9040_s17, %s9052_s9, %s6886_s18, %s6886_s18, %s6882_s19  }
 0x5fb PF: > { %p6621_p1 = scmp.ge.s32.totalorder %s6880_s30, 2  ;;  %s4974_s21 = sand.u32 1, %s6868_s27  }
 0x5fc   : > { %s4975_s22 = scalar_lea.sflag [#allocation3], %s4974_s21 }
 0x5fd   : > { %p6618_p2 = pnand %p6621_p1, %p6974_p6 }
 0x5ff   : > { %6863 = dma.done.wait (!%p6618_p2), %s4975_s22, 2048  }
 0x600   : > { %6865 = vsyncadd (!%p6618_p2), %s4975_s22, 4294965248  ;;  %p18_p3 = scmp.ge.s32.totalorder %s6957_s11, 4   ;;  %s9320_s27 = smov %s6872_s28 }
 0x601   : > { %s9321_s28 = smov %s6876_s29  ;;  %s9322_s29 = smov %s6968_s14 }
 0x602   : > { %s9323_s30 = smov %s6957_s11  ;;  %20 = sbr.rel (!%p18_p3) target bundleno = 3 (0x3), region = 90 }
 0x609   :  { %4980 = vsyncpa [#allocation3], 1 }
 0x60a   :  { %4982 = vsyncpa [#allocation3 + $0x1], 1 }

</bundles_post_ra>
